<compile_context>
chip_gen: v7x
topology: tpu7x:2x2x1
jax: 0.10.0
libtpu: 0.0.40
codegen_flags: <defaults>
</compile_context>

<pallas_src>
import functools

import jax
import jax.numpy as jnp
from jax import lax
from jax.experimental import pallas as pl
from jax.experimental.pallas import tpu as pltpu


def _round_up(x, m):
    return (x + m - 1) // m * m


def _fullspec(shape):
    # whole-array block; grid is empty so the kernel runs exactly once
    return pl.BlockSpec(shape, lambda: (0,) * len(shape))


# ---------------------------------------------------------------------------
# Fused kernel: image branch + multi-layer LSTM + fusion head
# ---------------------------------------------------------------------------
def multimodal_kernel(
        # image branch
        x_img_ref, wproj_ref, bproj_ref, wimgfe_ref, bimgfe_ref,
        # text branch (time-major [T*Bp, Hp], batch- and lane-padded)
        x_seq_ref, h0_ref, c0_ref, wih_ref, whh_ref, blstm_ref,
        wtxtfc1_ref, btxtfc1_ref,
        # fused head (block-diagonal tower weights)
        wt1_ref, bt1_ref, wt2_ref, bt2_ref, wm1_ref, bm1_ref, wm2_ref, bm2_ref,
        # output
        o_ref,
        # scratch
        seq_ref, xp_ref):
    f32 = jnp.float32
    L, Bp, Hp = h0_ref.shape
    T = x_seq_ref.shape[0] // Bp

    # ---------------- image tower ----------------
    # TODO(synk): the torchvision resnet18(pretrained) backbone has no in-script Pallas
    # equivalent; replaced by a deterministic linear projection (+ReLU) to 512 features.
    feat = jnp.maximum(
        jnp.dot(x_img_ref[...], wproj_ref[...], preferred_element_type=f32)
        + bproj_ref[...], 0.0)                                      # [Bp, 512]
    # ImageOnly.fc_img1 + tanh. Weight cols [2H:4H] are zero -> that half is tanh(0)=0.
    z_img = jnp.tanh(
        jnp.dot(feat, wimgfe_ref[...], preferred_element_type=f32)
        + bimgfe_ref[...])                                          # [Bp, 4H]

    # ---------------- text tower: multi-layer LSTM ----------------
    # PyTorch gate order i, f, g, o; each gate occupies a full 128-lane block (width Hp).
    h_top = None
    for l in range(L):                        # static layer unroll (L is small)
        # Hoisted input projection for every timestep of this layer, bias folded in:
        # one [T*Bp, Hp] @ [Hp, 4*Hp] matmul, off the sequential critical path.
        src = x_seq_ref if l == 0 else seq_ref
        xp_ref[...] = (
            jnp.dot(src[...], wih_ref[l], preferred_element_type=f32) + blstm_ref[l])
        whh = whh_ref[l]                      # [Hp, 4*Hp]

        def step(t, carry, _l=l, _whh=whh):
            h, c = carry
            off = pl.multiple_of(t * Bp, Bp)
            gates = xp_ref[pl.ds(off, Bp), :] + jnp.dot(
                h, _whh, preferred_element_type=f32)                # [Bp, 4*Hp]
            i_g = jax.nn.sigmoid(gates[:, 0 * Hp:1 * Hp])
            f_g = jax.nn.sigmoid(gates[:, 1 * Hp:2 * Hp])
            g_g = jnp.tanh(gates[:, 2 * Hp:3 * Hp])
            o_g = jax.nn.sigmoid(gates[:, 3 * Hp:4 * Hp])
            c_new = f_g * c + i_g * g_g
            h_new = o_g * jnp.tanh(c_new)
            if _l < L - 1:                    # feed the next layer (skip on top layer)
                seq_ref[pl.ds(off, Bp), :] = h_new
            return (h_new, c_new)

        h_top, _ = lax.fori_loop(0, T, step, (h0_ref[l], c0_ref[l]), unroll=True)

    # TextOnly.fc1 + ReLU (dropout == identity). Weight cols [0:2H] are zero -> relu(0)=0.
    z_txt = jnp.maximum(
        jnp.dot(h_top, wtxtfc1_ref[...], preferred_element_type=f32)
        + btxtfc1_ref[...], 0.0)                                    # [Bp, 4H]

    # ---------------- fusion head ----------------
    # z == concat([img_feat, txt_feat], -1): the two halves are complementary
    # zero-padded, so a single add realizes the concat with no lane shuffle.
    z = z_img + z_txt                                               # [Bp, 4H]
    # fc_img1 / fc_txt1 fused into one block-diagonal matmul, then tanh.
    y1 = jnp.tanh(jnp.dot(z, wt1_ref[...], preferred_element_type=f32) + bt1_ref[...])
    # fc_img2 / fc_txt2 fused into one block-diagonal matmul, then relu -> [y_img | y_txt].
    y2 = jnp.maximum(
        jnp.dot(y1, wt2_ref[...], preferred_element_type=f32) + bt2_ref[...], 0.0)
    # fc_multi1 on the concat, then relu.
    y3 = jnp.maximum(
        jnp.dot(y2, wm1_ref[...], preferred_element_type=f32) + bm1_ref[...], 0.0)
    # fc_multi2: output padded to 128 lanes -> unmasked, lane-dense store.
    o_ref[...] = jnp.dot(y3, wm2_ref[...], preferred_element_type=f32) + bm2_ref[...]


# ---------------------------------------------------------------------------
# Parameter init (natural layout, deterministic, PyTorch-like defaults)
# ---------------------------------------------------------------------------
def _dense(key, fan_in, fan_out):
    kw, kb = jax.random.split(key)
    bound = 1.0 / (fan_in ** 0.5)
    w = jax.random.uniform(kw, (fan_in, fan_out), jnp.float32, -bound, bound)
    b = jax.random.uniform(kb, (1, fan_out), jnp.float32, -bound, bound)
    return w, b


def init_params(key, *, img_pixels, hidden_dim, max_words, lstm_layers, batch,
                num_classes):
    H = hidden_dim
    ks = iter(jax.random.split(key, 24))
    p = {}

    # image branch: backbone stub (-> 512) + ImageOnly.fc_img1 (512 -> 2H)
    p['w_proj'], p['b_proj'] = _dense(next(ks), img_pixels, 512)
    p['w_img_fe'], p['b_img_fe'] = _dense(next(ks), 512, 2 * H)

    # Embedding(max_words, H, padding_idx=0)
    emb = jax.random.normal(next(ks), (max_words, H), jnp.float32)
    p['emb'] = emb.at[0].set(0.0)

    # LSTM (stored transposed [in, 4H], gate order i|f|g|o), biases pre-summed
    bound = 1.0 / (H ** 0.5)
    p['w_ih'] = jax.random.uniform(next(ks), (lstm_layers, H, 4 * H), jnp.float32, -bound, bound)
    p['w_hh'] = jax.random.uniform(next(ks), (lstm_layers, H, 4 * H), jnp.float32, -bound, bound)
    b_ih = jax.random.uniform(next(ks), (lstm_layers, 1, 4 * H), jnp.float32, -bound, bound)
    b_hh = jax.random.uniform(next(ks), (lstm_layers, 1, 4 * H), jnp.float32, -bound, bound)
    p['b_lstm'] = b_ih + b_hh

    # TODO(synk): PyTorch re-draws xavier_normal_ h0/c0 every forward (non-deterministic);
    # drawn once here from a fixed key with the same xavier-normal std.
    fan_in, fan_out = batch * H, lstm_layers * H
    std = (2.0 / (fan_in + fan_out)) ** 0.5
    p['h0'] = std * jax.random.normal(next(ks), (lstm_layers, batch, H), jnp.float32)
    p['c0'] = std * jax.random.normal(next(ks), (lstm_layers, batch, H), jnp.float32)

    # TextOnly.fc1 (H -> 2H); fc2 == Identity
    p['w_txt_fc1'], p['b_txt_fc1'] = _dense(next(ks), H, 2 * H)

    # MultiModal head
    p['w_img1'], p['b_img1'] = _dense(next(ks), 2 * H, 2 * H)
    p['w_img2'], p['b_img2'] = _dense(next(ks), 2 * H, H)
    p['w_txt1'], p['b_txt1'] = _dense(next(ks), 2 * H, 2 * H)
    p['w_txt2'], p['b_txt2'] = _dense(next(ks), 2 * H, H)
    p['w_m1'], p['b_m1'] = _dense(next(ks), 2 * H, H)
    p['w_m2'], p['b_m2'] = _dense(next(ks), H, num_classes)
    return p


# ---------------------------------------------------------------------------
# Pack natural params into the padded / fused kernel layout (done once, outside jit)
# ---------------------------------------------------------------------------
def pack_params(p, *, hidden_dim, num_classes):
    H = hidden_dim
    Hp = _round_up(H, 128)          # padded hidden (lane-aligned gates)
    G = 4 * H                       # head concat width: [img 2H | txt 2H]
    Cp = _round_up(num_classes, 128)
    L = p['w_ih'].shape[0]
    B = p['h0'].shape[1]
    Bp = _round_up(B, 8)            # padded batch (full sublane tile)
    f32 = jnp.float32
    k = {}

    # LSTM weights: each gate gets its own 128-lane block; padded hidden rows are zero.
    wih = jnp.zeros((L, Hp, 4 * Hp), f32)
    whh = jnp.zeros((L, Hp, 4 * Hp), f32)
    bl = jnp.zeros((L, 1, 4 * Hp), f32)
    for g in range(4):
        wih = wih.at[:, :H, g * Hp:g * Hp + H].set(p['w_ih'][:, :, g * H:(g + 1) * H])
        whh = whh.at[:, :H, g * Hp:g * Hp + H].set(p['w_hh'][:, :, g * H:(g + 1) * H])
        bl = bl.at[:, :, g * Hp:g * Hp + H].set(p['b_lstm'][:, :, g * H:(g + 1) * H])
    k['w_ih'], k['w_hh'], k['b_lstm'] = wih, whh, bl

    k['h0'] = jnp.zeros((L, Bp, Hp), f32).at[:, :B, :H].set(p['h0'])
    k['c0'] = jnp.zeros((L, Bp, Hp), f32).at[:, :B, :H].set(p['c0'])

    # embedding table padded to Hp lanes
    k['emb'] = jnp.zeros((p['emb'].shape[0], Hp), f32).at[:, :H].set(p['emb'])

    # image branch: ImageOnly.fc_img1 output lands in cols [0:2H] of the 4H-wide z
    k['w_proj'], k['b_proj'] = p['w_proj'], p['b_proj']
    k['w_img_fe'] = jnp.zeros((512, G), f32).at[:, :2 * H].set(p['w_img_fe'])
    k['b_img_fe'] = jnp.zeros((1, G), f32).at[:, :2 * H].set(p['b_img_fe'])

    # TextOnly.fc1 output lands in cols [2H:4H]; padded hidden rows are zero
    k['w_txt_fc1'] = jnp.zeros((Hp, G), f32).at[:H, 2 * H:].set(p['w_txt_fc1'])
    k['b_txt_fc1'] = jnp.zeros((1, G), f32).at[:, 2 * H:].set(p['b_txt_fc1'])

    # block-diagonal fused towers: (fc_img1 | fc_txt1) and (fc_img2 | fc_txt2)
    wt1 = jnp.zeros((G, G), f32)
    wt1 = wt1.at[:2 * H, :2 * H].set(p['w_img1']).at[2 * H:, 2 * H:].set(p['w_txt1'])
    bt1 = jnp.zeros((1, G), f32).at[:, :2 * H].set(p['b_img1']).at[:, 2 * H:].set(p['b_txt1'])
    wt2 = jnp.zeros((G, 2 * H), f32)
    wt2 = wt2.at[:2 * H, :H].set(p['w_img2']).at[2 * H:, H:].set(p['w_txt2'])
    bt2 = jnp.zeros((1, 2 * H), f32).at[:, :H].set(p['b_img2']).at[:, H:].set(p['b_txt2'])
    k['w_tower1'], k['b_tower1'] = wt1, bt1
    k['w_tower2'], k['b_tower2'] = wt2, bt2

    k['w_m1'], k['b_m1'] = p['w_m1'], p['b_m1']
    k['w_m2'] = jnp.zeros((H, Cp), f32).at[:, :num_classes].set(p['w_m2'])
    k['b_m2'] = jnp.zeros((1, Cp), f32).at[:, :num_classes].set(p['b_m2'])
    return k


# ---------------------------------------------------------------------------
# Forward pass: glue (embedding lookup + layout padding) + a single pallas_call
# ---------------------------------------------------------------------------
def multimodal_forward(params, image, text_index, *, num_classes):
    B = image.shape[0]
    T = text_index.shape[1]
    Hp = params['emb'].shape[1]
    Bp = params['h0'].shape[1]
    Cp = params['w_m2'].shape[1]
    P = params['w_proj'].shape[0]

    # image: NCHW -> flat rows, batch padded to a full sublane tile
    x_img = image.reshape(B, -1).astype(jnp.float32)
    x_img = jnp.zeros((Bp, P), jnp.float32).at[:B].set(x_img)

    # text: embedding lookup (XLA gather), time-major, batch-padded, flattened [T*Bp, Hp]
    # TODO(synk): gather kept in the XLA wrapper; an in-kernel SMEM-indexed gather is a
    # further (smaller) optimization.
    emb_seq = jnp.take(params['emb'], text_index, axis=0)        # [B, T, Hp]
    x_seq = jnp.transpose(emb_seq, (1, 0, 2))                    # [T, B, Hp]
    x_seq = jnp.zeros((T, Bp, Hp), jnp.float32).at[:, :B].set(x_seq).reshape(T * Bp, Hp)

    args = (x_img, params['w_proj'], params['b_proj'],
            params['w_img_fe'], params['b_img_fe'],
            x_seq, params['h0'], params['c0'],
            params['w_ih'], params['w_hh'], params['b_lstm'],
            params['w_txt_fc1'], params['b_txt_fc1'],
            params['w_tower1'], params['b_tower1'],
            params['w_tower2'], params['b_tower2'],
            params['w_m1'], params['b_m1'],
            params['w_m2'], params['b_m2'])

    out_pad = pl.pallas_call(
        multimodal_kernel,
        out_shape=jax.ShapeDtypeStruct((Bp, Cp), jnp.float32),
        in_specs=[_fullspec(a.shape) for a in args],
        out_specs=_fullspec((Bp, Cp)),
        scratch_shapes=[pltpu.VMEM((T * Bp, Hp), jnp.float32),      # inter-layer sequence
                        pltpu.VMEM((T * Bp, 4 * Hp), jnp.float32)],  # hoisted x @ W_ih
    )(*args)
    return out_pad[:B, :num_classes]


if __name__ == "__main__":
    B, H, T = 2, 32, 8
    MAX_WORDS = 100
    LSTM_LAYERS = 2
    NUM_CLASSES = 5
    IMG = (3, 16, 16)  # CHW without batch

    key = jax.random.PRNGKey(0)
    k_param, k_img, k_txt = jax.random.split(key, 3)

    nat = init_params(
        k_param,
        img_pixels=IMG[0] * IMG[1] * IMG[2],
        hidden_dim=H,
        max_words=MAX_WORDS,
        lstm_layers=LSTM_LAYERS,
        batch=B,
        num_classes=NUM_CLASSES,
    )
    packed = pack_params(nat, hidden_dim=H, num_classes=NUM_CLASSES)

    image = jax.random.normal(k_img, (B,) + IMG, jnp.float32)              # [B,3,16,16]
    text_index = jax.random.randint(k_txt, (B, T), 0, MAX_WORDS, jnp.int32)

    fwd = jax.jit(functools.partial(multimodal_forward, num_classes=NUM_CLASSES))
    out = fwd(packed, image, text_index)
    out = jax.block_until_ready(out)

    assert out.shape == (B, NUM_CLASSES), out.shape
    assert bool(jnp.all(jnp.isfinite(out)))
    print("KERNEL_OK")
</pallas_src>

<mosaic_0001>
module attributes {stable_mosaic.version = 11 : i64} {
  func.func @multimodal_kernel(%arg0: memref<8x768xf32, #tpu.memory_space<vmem>>, %arg1: memref<768x512xf32, #tpu.memory_space<vmem>>, %arg2: memref<1x512xf32, #tpu.memory_space<vmem>>, %arg3: memref<512x128xf32, #tpu.memory_space<vmem>>, %arg4: memref<1x128xf32, #tpu.memory_space<vmem>>, %arg5: memref<64x128xf32, #tpu.memory_space<vmem>>, %arg6: memref<2x8x128xf32, #tpu.memory_space<vmem>>, %arg7: memref<2x8x128xf32, #tpu.memory_space<vmem>>, %arg8: memref<2x128x512xf32, #tpu.memory_space<vmem>>, %arg9: memref<2x128x512xf32, #tpu.memory_space<vmem>>, %arg10: memref<2x1x512xf32, #tpu.memory_space<vmem>>, %arg11: memref<128x128xf32, #tpu.memory_space<vmem>>, %arg12: memref<1x128xf32, #tpu.memory_space<vmem>>, %arg13: memref<128x128xf32, #tpu.memory_space<vmem>>, %arg14: memref<1x128xf32, #tpu.memory_space<vmem>>, %arg15: memref<128x64xf32, #tpu.memory_space<vmem>>, %arg16: memref<1x64xf32, #tpu.memory_space<vmem>>, %arg17: memref<64x32xf32, #tpu.memory_space<vmem>>, %arg18: memref<1x32xf32, #tpu.memory_space<vmem>>, %arg19: memref<32x128xf32, #tpu.memory_space<vmem>>, %arg20: memref<1x128xf32, #tpu.memory_space<vmem>>, %arg21: memref<8x128xf32, #tpu.memory_space<vmem>>, %arg22: memref<64x128xf32, #tpu.memory_space<vmem>>, %arg23: memref<64x512xf32, #tpu.memory_space<vmem>>) attributes {dimension_semantics = [], scalar_prefetch = 0 : i64, scratch_operands = 2 : i64, tpu.core_type = #tpu.core_type<tc>} {
    %c0 = arith.constant 0 : index
    %c0_0 = arith.constant 0 : index
    %0 = vector.load %arg0[%c0, %c0_0] : memref<8x768xf32, #tpu.memory_space<vmem>>, vector<8x768xf32>
    %c0_1 = arith.constant 0 : index
    %c0_2 = arith.constant 0 : index
    %1 = vector.load %arg1[%c0_1, %c0_2] : memref<768x512xf32, #tpu.memory_space<vmem>>, vector<768x512xf32>
    %cst = arith.constant dense<0.000000e+00> : vector<8x512xf32>
    %2 = tpu.matmul %0, %1, %cst {dimension_numbers = #tpu.dot_dimension_numbers<[1], [0], [0], [1], [0, 0, 1, 1], [], []>} : vector<8x768xf32>, vector<768x512xf32>, vector<8x512xf32> -> vector<8x512xf32>
    %c0_3 = arith.constant 0 : index
    %c0_4 = arith.constant 0 : index
    %3 = vector.load %arg2[%c0_3, %c0_4] : memref<1x512xf32, #tpu.memory_space<vmem>>, vector<1x512xf32>
    %4 = vector.broadcast %3 : vector<1x512xf32> to vector<8x512xf32>
    %5 = arith.addf %2, %4 : vector<8x512xf32>
    %cst_5 = arith.constant 0.000000e+00 : f32
    %6 = vector.broadcast %cst_5 : f32 to vector<8x512xf32>
    %7 = arith.maximumf %5, %6 : vector<8x512xf32>
    %c0_6 = arith.constant 0 : index
    %c0_7 = arith.constant 0 : index
    %8 = vector.load %arg3[%c0_6, %c0_7] : memref<512x128xf32, #tpu.memory_space<vmem>>, vector<512x128xf32>
    %cst_8 = arith.constant dense<0.000000e+00> : vector<8x128xf32>
    %9 = tpu.matmul %7, %8, %cst_8 {dimension_numbers = #tpu.dot_dimension_numbers<[1], [0], [0], [1], [0, 0, 1, 1], [], []>} : vector<8x512xf32>, vector<512x128xf32>, vector<8x128xf32> -> vector<8x128xf32>
    %c0_9 = arith.constant 0 : index
    %c0_10 = arith.constant 0 : index
    %10 = vector.load %arg4[%c0_9, %c0_10] : memref<1x128xf32, #tpu.memory_space<vmem>>, vector<1x128xf32>
    %11 = vector.broadcast %10 : vector<1x128xf32> to vector<8x128xf32>
    %12 = arith.addf %9, %11 : vector<8x128xf32>
    %13 = math.tanh %12 : vector<8x128xf32>
    %c0_11 = arith.constant 0 : index
    %c0_12 = arith.constant 0 : index
    %14 = vector.load %arg5[%c0_11, %c0_12] : memref<64x128xf32, #tpu.memory_space<vmem>>, vector<64x128xf32>
    %c0_13 = arith.constant 0 : index
    %c0_14 = arith.constant 0 : index
    %c0_15 = arith.constant 0 : index
    %15 = vector.load %arg8[%c0_13, %c0_14, %c0_15] : memref<2x128x512xf32, #tpu.memory_space<vmem>>, vector<1x128x512xf32>
    %16 = vector.shape_cast %15 : vector<1x128x512xf32> to vector<128x512xf32>
    %cst_16 = arith.constant dense<0.000000e+00> : vector<64x512xf32>
    %17 = tpu.matmul %14, %16, %cst_16 {dimension_numbers = #tpu.dot_dimension_numbers<[1], [0], [0], [1], [0, 0, 1, 1], [], []>} : vector<64x128xf32>, vector<128x512xf32>, vector<64x512xf32> -> vector<64x512xf32>
    %c0_17 = arith.constant 0 : index
    %c0_18 = arith.constant 0 : index
    %c0_19 = arith.constant 0 : index
    %18 = vector.load %arg10[%c0_17, %c0_18, %c0_19] : memref<2x1x512xf32, #tpu.memory_space<vmem>>, vector<1x1x512xf32>
    %19 = vector.shape_cast %18 : vector<1x1x512xf32> to vector<1x512xf32>
    %20 = vector.broadcast %19 : vector<1x512xf32> to vector<64x512xf32>
    %21 = arith.addf %17, %20 : vector<64x512xf32>
    %c0_20 = arith.constant 0 : index
    %c0_21 = arith.constant 0 : index
    %22 = vector.load %arg23[%c0_20, %c0_21] : memref<64x512xf32, #tpu.memory_space<vmem>>, vector<64x512xf32>
    tpu.vector_store %arg23[%c0_20, %c0_21], %21 {strides = array<i32>} : memref<64x512xf32, #tpu.memory_space<vmem>>, vector<64x512xf32>,
    %c0_22 = arith.constant 0 : index
    %c0_23 = arith.constant 0 : index
    %c0_24 = arith.constant 0 : index
    %23 = vector.load %arg9[%c0_22, %c0_23, %c0_24] : memref<2x128x512xf32, #tpu.memory_space<vmem>>, vector<1x128x512xf32>
    %24 = vector.shape_cast %23 : vector<1x128x512xf32> to vector<128x512xf32>
    %c0_25 = arith.constant 0 : index
    %c0_26 = arith.constant 0 : index
    %c0_27 = arith.constant 0 : index
    %25 = vector.load %arg6[%c0_25, %c0_26, %c0_27] : memref<2x8x128xf32, #tpu.memory_space<vmem>>, vector<1x8x128xf32>
    %26 = vector.shape_cast %25 : vector<1x8x128xf32> to vector<8x128xf32>
    %c0_28 = arith.constant 0 : index
    %c0_29 = arith.constant 0 : index
    %c0_30 = arith.constant 0 : index
    %27 = vector.load %arg7[%c0_28, %c0_29, %c0_30] : memref<2x8x128xf32, #tpu.memory_space<vmem>>, vector<1x8x128xf32>
    %28 = vector.shape_cast %27 : vector<1x8x128xf32> to vector<8x128xf32>
    %c0_i32 = arith.constant 0 : i32
    %c8_i32 = arith.constant 8 : i32
    %29 = arith.muli %c0_i32, %c8_i32 : i32
    %30 = tpu.assume_multiple %29, 8 : i32
    %31 = arith.index_cast %30 : i32 to index
    %c0_31 = arith.constant 0 : index
    %32 = vector.load %arg23[%31, %c0_31] : memref<64x512xf32, #tpu.memory_space<vmem>>, vector<8x512xf32>
    %cst_32 = arith.constant dense<0.000000e+00> : vector<8x512xf32>
    %33 = tpu.matmul %26, %24, %cst_32 {dimension_numbers = #tpu.dot_dimension_numbers<[1], [0], [0], [1], [0, 0, 1, 1], [], []>} : vector<8x128xf32>, vector<128x512xf32>, vector<8x512xf32> -> vector<8x512xf32>
    %34 = arith.addf %32, %33 : vector<8x512xf32>
    %35 = vector.extract_strided_slice %34 {offsets = [0, 0], sizes = [8, 128], strides = [1, 1]} : vector<8x512xf32> to vector<8x128xf32>
    %36 = arith.negf %35 : vector<8x128xf32>
    %37 = math.exp %36 : vector<8x128xf32>
    %cst_33 = arith.constant 1.000000e+00 : f32
    %38 = vector.broadcast %cst_33 : f32 to vector<8x128xf32>
    %39 = arith.addf %38, %37 : vector<8x128xf32>
    %40 = arith.divf %38, %39 : vector<8x128xf32>
    %41 = vector.extract_strided_slice %34 {offsets = [0, 128], sizes = [8, 128], strides = [1, 1]} : vector<8x512xf32> to vector<8x128xf32>
    %42 = arith.negf %41 : vector<8x128xf32>
    %43 = math.exp %42 : vector<8x128xf32>
    %cst_34 = arith.constant 1.000000e+00 : f32
    %44 = vector.broadcast %cst_34 : f32 to vector<8x128xf32>
    %45 = arith.addf %44, %43 : vector<8x128xf32>
    %46 = arith.divf %44, %45 : vector<8x128xf32>
    %47 = vector.extract_strided_slice %34 {offsets = [0, 256], sizes = [8, 128], strides = [1, 1]} : vector<8x512xf32> to vector<8x128xf32>
    %48 = math.tanh %47 : vector<8x128xf32>
    %49 = vector.extract_strided_slice %34 {offsets = [0, 384], sizes = [8, 128], strides = [1, 1]} : vector<8x512xf32> to vector<8x128xf32>
    %50 = arith.negf %49 : vector<8x128xf32>
    %51 = math.exp %50 : vector<8x128xf32>
    %cst_35 = arith.constant 1.000000e+00 : f32
    %52 = vector.broadcast %cst_35 : f32 to vector<8x128xf32>
    %53 = arith.addf %52, %51 : vector<8x128xf32>
    %54 = arith.divf %52, %53 : vector<8x128xf32>
    %55 = arith.mulf %46, %28 : vector<8x128xf32>
    %56 = arith.mulf %40, %48 : vector<8x128xf32>
    %57 = arith.addf %55, %56 : vector<8x128xf32>
    %58 = math.tanh %57 : vector<8x128xf32>
    %59 = arith.mulf %54, %58 : vector<8x128xf32>
    %60 = arith.index_cast %30 : i32 to index
    %c0_36 = arith.constant 0 : index
    %61 = vector.load %arg22[%60, %c0_36] : memref<64x128xf32, #tpu.memory_space<vmem>>, vector<8x128xf32>
    tpu.vector_store %arg22[%60, %c0_36], %59 {strides = array<i32>} : memref<64x128xf32, #tpu.memory_space<vmem>>, vector<8x128xf32>,
    %c1_i32 = arith.constant 1 : i32
    %c8_i32_37 = arith.constant 8 : i32
    %62 = arith.muli %c1_i32, %c8_i32_37 : i32
    %63 = tpu.assume_multiple %62, 8 : i32
    %64 = arith.index_cast %63 : i32 to index
    %c0_38 = arith.constant 0 : index
    %65 = vector.load %arg23[%64, %c0_38] : memref<64x512xf32, #tpu.memory_space<vmem>>, vector<8x512xf32>
    %cst_39 = arith.constant dense<0.000000e+00> : vector<8x512xf32>
    %66 = tpu.matmul %59, %24, %cst_39 {dimension_numbers = #tpu.dot_dimension_numbers<[1], [0], [0], [1], [0, 0, 1, 1], [], []>} : vector<8x128xf32>, vector<128x512xf32>, vector<8x512xf32> -> vector<8x512xf32>
    %67 = arith.addf %65, %66 : vector<8x512xf32>
    %68 = vector.extract_strided_slice %67 {offsets = [0, 0], sizes = [8, 128], strides = [1, 1]} : vector<8x512xf32> to vector<8x128xf32>
    %69 = arith.negf %68 : vector<8x128xf32>
    %70 = math.exp %69 : vector<8x128xf32>
    %cst_40 = arith.constant 1.000000e+00 : f32
    %71 = vector.broadcast %cst_40 : f32 to vector<8x128xf32>
    %72 = arith.addf %71, %70 : vector<8x128xf32>
    %73 = arith.divf %71, %72 : vector<8x128xf32>
    %74 = vector.extract_strided_slice %67 {offsets = [0, 128], sizes = [8, 128], strides = [1, 1]} : vector<8x512xf32> to vector<8x128xf32>
    %75 = arith.negf %74 : vector<8x128xf32>
    %76 = math.exp %75 : vector<8x128xf32>
    %cst_41 = arith.constant 1.000000e+00 : f32
    %77 = vector.broadcast %cst_41 : f32 to vector<8x128xf32>
    %78 = arith.addf %77, %76 : vector<8x128xf32>
    %79 = arith.divf %77, %78 : vector<8x128xf32>
    %80 = vector.extract_strided_slice %67 {offsets = [0, 256], sizes = [8, 128], strides = [1, 1]} : vector<8x512xf32> to vector<8x128xf32>
    %81 = math.tanh %80 : vector<8x128xf32>
    %82 = vector.extract_strided_slice %67 {offsets = [0, 384], sizes = [8, 128], strides = [1, 1]} : vector<8x512xf32> to vector<8x128xf32>
    %83 = arith.negf %82 : vector<8x128xf32>
    %84 = math.exp %83 : vector<8x128xf32>
    %cst_42 = arith.constant 1.000000e+00 : f32
    %85 = vector.broadcast %cst_42 : f32 to vector<8x128xf32>
    %86 = arith.addf %85, %84 : vector<8x128xf32>
    %87 = arith.divf %85, %86 : vector<8x128xf32>
    %88 = arith.mulf %79, %57 : vector<8x128xf32>
    %89 = arith.mulf %73, %81 : vector<8x128xf32>
    %90 = arith.addf %88, %89 : vector<8x128xf32>
    %91 = math.tanh %90 : vector<8x128xf32>
    %92 = arith.mulf %87, %91 : vector<8x128xf32>
    %93 = arith.index_cast %63 : i32 to index
    %c0_43 = arith.constant 0 : index
    %94 = vector.load %arg22[%93, %c0_43] : memref<64x128xf32, #tpu.memory_space<vmem>>, vector<8x128xf32>
    tpu.vector_store %arg22[%93, %c0_43], %92 {strides = array<i32>} : memref<64x128xf32, #tpu.memory_space<vmem>>, vector<8x128xf32>,
    %c2_i32 = arith.constant 2 : i32
    %c8_i32_44 = arith.constant 8 : i32
    %95 = arith.muli %c2_i32, %c8_i32_44 : i32
    %96 = tpu.assume_multiple %95, 8 : i32
    %97 = arith.index_cast %96 : i32 to index
    %c0_45 = arith.constant 0 : index
    %98 = vector.load %arg23[%97, %c0_45] : memref<64x512xf32, #tpu.memory_space<vmem>>, vector<8x512xf32>
    %cst_46 = arith.constant dense<0.000000e+00> : vector<8x512xf32>
    %99 = tpu.matmul %92, %24, %cst_46 {dimension_numbers = #tpu.dot_dimension_numbers<[1], [0], [0], [1], [0, 0, 1, 1], [], []>} : vector<8x128xf32>, vector<128x512xf32>, vector<8x512xf32> -> vector<8x512xf32>
    %100 = arith.addf %98, %99 : vector<8x512xf32>
    %101 = vector.extract_strided_slice %100 {offsets = [0, 0], sizes = [8, 128], strides = [1, 1]} : vector<8x512xf32> to vector<8x128xf32>
    %102 = arith.negf %101 : vector<8x128xf32>
    %103 = math.exp %102 : vector<8x128xf32>
    %cst_47 = arith.constant 1.000000e+00 : f32
    %104 = vector.broadcast %cst_47 : f32 to vector<8x128xf32>
    %105 = arith.addf %104, %103 : vector<8x128xf32>
    %106 = arith.divf %104, %105 : vector<8x128xf32>
    %107 = vector.extract_strided_slice %100 {offsets = [0, 128], sizes = [8, 128], strides = [1, 1]} : vector<8x512xf32> to vector<8x128xf32>
    %108 = arith.negf %107 : vector<8x128xf32>
    %109 = math.exp %108 : vector<8x128xf32>
    %cst_48 = arith.constant 1.000000e+00 : f32
    %110 = vector.broadcast %cst_48 : f32 to vector<8x128xf32>
    %111 = arith.addf %110, %109 : vector<8x128xf32>
    %112 = arith.divf %110, %111 : vector<8x128xf32>
    %113 = vector.extract_strided_slice %100 {offsets = [0, 256], sizes = [8, 128], strides = [1, 1]} : vector<8x512xf32> to vector<8x128xf32>
    %114 = math.tanh %113 : vector<8x128xf32>
    %115 = vector.extract_strided_slice %100 {offsets = [0, 384], sizes = [8, 128], strides = [1, 1]} : vector<8x512xf32> to vector<8x128xf32>
    %116 = arith.negf %115 : vector<8x128xf32>
    %117 = math.exp %116 : vector<8x128xf32>
    %cst_49 = arith.constant 1.000000e+00 : f32
    %118 = vector.broadcast %cst_49 : f32 to vector<8x128xf32>
    %119 = arith.addf %118, %117 : vector<8x128xf32>
    %120 = arith.divf %118, %119 : vector<8x128xf32>
    %121 = arith.mulf %112, %90 : vector<8x128xf32>
    %122 = arith.mulf %106, %114 : vector<8x128xf32>
    %123 = arith.addf %121, %122 : vector<8x128xf32>
    %124 = math.tanh %123 : vector<8x128xf32>
    %125 = arith.mulf %120, %124 : vector<8x128xf32>
    %126 = arith.index_cast %96 : i32 to index
    %c0_50 = arith.constant 0 : index
    %127 = vector.load %arg22[%126, %c0_50] : memref<64x128xf32, #tpu.memory_space<vmem>>, vector<8x128xf32>
    tpu.vector_store %arg22[%126, %c0_50], %125 {strides = array<i32>} : memref<64x128xf32, #tpu.memory_space<vmem>>, vector<8x128xf32>,
    %c3_i32 = arith.constant 3 : i32
    %c8_i32_51 = arith.constant 8 : i32
    %128 = arith.muli %c3_i32, %c8_i32_51 : i32
    %129 = tpu.assume_multiple %128, 8 : i32
    %130 = arith.index_cast %129 : i32 to index
    %c0_52 = arith.constant 0 : index
    %131 = vector.load %arg23[%130, %c0_52] : memref<64x512xf32, #tpu.memory_space<vmem>>, vector<8x512xf32>
    %cst_53 = arith.constant dense<0.000000e+00> : vector<8x512xf32>
    %132 = tpu.matmul %125, %24, %cst_53 {dimension_numbers = #tpu.dot_dimension_numbers<[1], [0], [0], [1], [0, 0, 1, 1], [], []>} : vector<8x128xf32>, vector<128x512xf32>, vector<8x512xf32> -> vector<8x512xf32>
    %133 = arith.addf %131, %132 : vector<8x512xf32>
    %134 = vector.extract_strided_slice %133 {offsets = [0, 0], sizes = [8, 128], strides = [1, 1]} : vector<8x512xf32> to vector<8x128xf32>
    %135 = arith.negf %134 : vector<8x128xf32>
    %136 = math.exp %135 : vector<8x128xf32>
    %cst_54 = arith.constant 1.000000e+00 : f32
    %137 = vector.broadcast %cst_54 : f32 to vector<8x128xf32>
    %138 = arith.addf %137, %136 : vector<8x128xf32>
    %139 = arith.divf %137, %138 : vector<8x128xf32>
    %140 = vector.extract_strided_slice %133 {offsets = [0, 128], sizes = [8, 128], strides = [1, 1]} : vector<8x512xf32> to vector<8x128xf32>
    %141 = arith.negf %140 : vector<8x128xf32>
    %142 = math.exp %141 : vector<8x128xf32>
    %cst_55 = arith.constant 1.000000e+00 : f32
    %143 = vector.broadcast %cst_55 : f32 to vector<8x128xf32>
    %144 = arith.addf %143, %142 : vector<8x128xf32>
    %145 = arith.divf %143, %144 : vector<8x128xf32>
    %146 = vector.extract_strided_slice %133 {offsets = [0, 256], sizes = [8, 128], strides = [1, 1]} : vector<8x512xf32> to vector<8x128xf32>
    %147 = math.tanh %146 : vector<8x128xf32>
    %148 = vector.extract_strided_slice %133 {offsets = [0, 384], sizes = [8, 128], strides = [1, 1]} : vector<8x512xf32> to vector<8x128xf32>
    %149 = arith.negf %148 : vector<8x128xf32>
    %150 = math.exp %149 : vector<8x128xf32>
    %cst_56 = arith.constant 1.000000e+00 : f32
    %151 = vector.broadcast %cst_56 : f32 to vector<8x128xf32>
    %152 = arith.addf %151, %150 : vector<8x128xf32>
    %153 = arith.divf %151, %152 : vector<8x128xf32>
    %154 = arith.mulf %145, %123 : vector<8x128xf32>
    %155 = arith.mulf %139, %147 : vector<8x128xf32>
    %156 = arith.addf %154, %155 : vector<8x128xf32>
    %157 = math.tanh %156 : vector<8x128xf32>
    %158 = arith.mulf %153, %157 : vector<8x128xf32>
    %159 = arith.index_cast %129 : i32 to index
    %c0_57 = arith.constant 0 : index
    %160 = vector.load %arg22[%159, %c0_57] : memref<64x128xf32, #tpu.memory_space<vmem>>, vector<8x128xf32>
    tpu.vector_store %arg22[%159, %c0_57], %158 {strides = array<i32>} : memref<64x128xf32, #tpu.memory_space<vmem>>, vector<8x128xf32>,
    %c4_i32 = arith.constant 4 : i32
    %c8_i32_58 = arith.constant 8 : i32
    %161 = arith.muli %c4_i32, %c8_i32_58 : i32
    %162 = tpu.assume_multiple %161, 8 : i32
    %163 = arith.index_cast %162 : i32 to index
    %c0_59 = arith.constant 0 : index
    %164 = vector.load %arg23[%163, %c0_59] : memref<64x512xf32, #tpu.memory_space<vmem>>, vector<8x512xf32>
    %cst_60 = arith.constant dense<0.000000e+00> : vector<8x512xf32>
    %165 = tpu.matmul %158, %24, %cst_60 {dimension_numbers = #tpu.dot_dimension_numbers<[1], [0], [0], [1], [0, 0, 1, 1], [], []>} : vector<8x128xf32>, vector<128x512xf32>, vector<8x512xf32> -> vector<8x512xf32>
    %166 = arith.addf %164, %165 : vector<8x512xf32>
    %167 = vector.extract_strided_slice %166 {offsets = [0, 0], sizes = [8, 128], strides = [1, 1]} : vector<8x512xf32> to vector<8x128xf32>
    %168 = arith.negf %167 : vector<8x128xf32>
    %169 = math.exp %168 : vector<8x128xf32>
    %cst_61 = arith.constant 1.000000e+00 : f32
    %170 = vector.broadcast %cst_61 : f32 to vector<8x128xf32>
    %171 = arith.addf %170, %169 : vector<8x128xf32>
    %172 = arith.divf %170, %171 : vector<8x128xf32>
    %173 = vector.extract_strided_slice %166 {offsets = [0, 128], sizes = [8, 128], strides = [1, 1]} : vector<8x512xf32> to vector<8x128xf32>
    %174 = arith.negf %173 : vector<8x128xf32>
    %175 = math.exp %174 : vector<8x128xf32>
    %cst_62 = arith.constant 1.000000e+00 : f32
    %176 = vector.broadcast %cst_62 : f32 to vector<8x128xf32>
    %177 = arith.addf %176, %175 : vector<8x128xf32>
    %178 = arith.divf %176, %177 : vector<8x128xf32>
    %179 = vector.extract_strided_slice %166 {offsets = [0, 256], sizes = [8, 128], strides = [1, 1]} : vector<8x512xf32> to vector<8x128xf32>
    %180 = math.tanh %179 : vector<8x128xf32>
    %181 = vector.extract_strided_slice %166 {offsets = [0, 384], sizes = [8, 128], strides = [1, 1]} : vector<8x512xf32> to vector<8x128xf32>
    %182 = arith.negf %181 : vector<8x128xf32>
    %183 = math.exp %182 : vector<8x128xf32>
    %cst_63 = arith.constant 1.000000e+00 : f32
    %184 = vector.broadcast %cst_63 : f32 to vector<8x128xf32>
    %185 = arith.addf %184, %183 : vector<8x128xf32>
    %186 = arith.divf %184, %185 : vector<8x128xf32>
    %187 = arith.mulf %178, %156 : vector<8x128xf32>
    %188 = arith.mulf %172, %180 : vector<8x128xf32>
    %189 = arith.addf %187, %188 : vector<8x128xf32>
    %190 = math.tanh %189 : vector<8x128xf32>
    %191 = arith.mulf %186, %190 : vector<8x128xf32>
    %192 = arith.index_cast %162 : i32 to index
    %c0_64 = arith.constant 0 : index
    %193 = vector.load %arg22[%192, %c0_64] : memref<64x128xf32, #tpu.memory_space<vmem>>, vector<8x128xf32>
    tpu.vector_store %arg22[%192, %c0_64], %191 {strides = array<i32>} : memref<64x128xf32, #tpu.memory_space<vmem>>, vector<8x128xf32>,
    %c5_i32 = arith.constant 5 : i32
    %c8_i32_65 = arith.constant 8 : i32
    %194 = arith.muli %c5_i32, %c8_i32_65 : i32
    %195 = tpu.assume_multiple %194, 8 : i32
    %196 = arith.index_cast %195 : i32 to index
    %c0_66 = arith.constant 0 : index
    %197 = vector.load %arg23[%196, %c0_66] : memref<64x512xf32, #tpu.memory_space<vmem>>, vector<8x512xf32>
    %cst_67 = arith.constant dense<0.000000e+00> : vector<8x512xf32>
    %198 = tpu.matmul %191, %24, %cst_67 {dimension_numbers = #tpu.dot_dimension_numbers<[1], [0], [0], [1], [0, 0, 1, 1], [], []>} : vector<8x128xf32>, vector<128x512xf32>, vector<8x512xf32> -> vector<8x512xf32>
    %199 = arith.addf %197, %198 : vector<8x512xf32>
    %200 = vector.extract_strided_slice %199 {offsets = [0, 0], sizes = [8, 128], strides = [1, 1]} : vector<8x512xf32> to vector<8x128xf32>
    %201 = arith.negf %200 : vector<8x128xf32>
    %202 = math.exp %201 : vector<8x128xf32>
    %cst_68 = arith.constant 1.000000e+00 : f32
    %203 = vector.broadcast %cst_68 : f32 to vector<8x128xf32>
    %204 = arith.addf %203, %202 : vector<8x128xf32>
    %205 = arith.divf %203, %204 : vector<8x128xf32>
    %206 = vector.extract_strided_slice %199 {offsets = [0, 128], sizes = [8, 128], strides = [1, 1]} : vector<8x512xf32> to vector<8x128xf32>
    %207 = arith.negf %206 : vector<8x128xf32>
    %208 = math.exp %207 : vector<8x128xf32>
    %cst_69 = arith.constant 1.000000e+00 : f32
    %209 = vector.broadcast %cst_69 : f32 to vector<8x128xf32>
    %210 = arith.addf %209, %208 : vector<8x128xf32>
    %211 = arith.divf %209, %210 : vector<8x128xf32>
    %212 = vector.extract_strided_slice %199 {offsets = [0, 256], sizes = [8, 128], strides = [1, 1]} : vector<8x512xf32> to vector<8x128xf32>
    %213 = math.tanh %212 : vector<8x128xf32>
    %214 = vector.extract_strided_slice %199 {offsets = [0, 384], sizes = [8, 128], strides = [1, 1]} : vector<8x512xf32> to vector<8x128xf32>
    %215 = arith.negf %214 : vector<8x128xf32>
    %216 = math.exp %215 : vector<8x128xf32>
    %cst_70 = arith.constant 1.000000e+00 : f32
    %217 = vector.broadcast %cst_70 : f32 to vector<8x128xf32>
    %218 = arith.addf %217, %216 : vector<8x128xf32>
    %219 = arith.divf %217, %218 : vector<8x128xf32>
    %220 = arith.mulf %211, %189 : vector<8x128xf32>
    %221 = arith.mulf %205, %213 : vector<8x128xf32>
    %222 = arith.addf %220, %221 : vector<8x128xf32>
    %223 = math.tanh %222 : vector<8x128xf32>
    %224 = arith.mulf %219, %223 : vector<8x128xf32>
    %225 = arith.index_cast %195 : i32 to index
    %c0_71 = arith.constant 0 : index
    %226 = vector.load %arg22[%225, %c0_71] : memref<64x128xf32, #tpu.memory_space<vmem>>, vector<8x128xf32>
    tpu.vector_store %arg22[%225, %c0_71], %224 {strides = array<i32>} : memref<64x128xf32, #tpu.memory_space<vmem>>, vector<8x128xf32>,
    %c6_i32 = arith.constant 6 : i32
    %c8_i32_72 = arith.constant 8 : i32
    %227 = arith.muli %c6_i32, %c8_i32_72 : i32
    %228 = tpu.assume_multiple %227, 8 : i32
    %229 = arith.index_cast %228 : i32 to index
    %c0_73 = arith.constant 0 : index
    %230 = vector.load %arg23[%229, %c0_73] : memref<64x512xf32, #tpu.memory_space<vmem>>, vector<8x512xf32>
    %cst_74 = arith.constant dense<0.000000e+00> : vector<8x512xf32>
    %231 = tpu.matmul %224, %24, %cst_74 {dimension_numbers = #tpu.dot_dimension_numbers<[1], [0], [0], [1], [0, 0, 1, 1], [], []>} : vector<8x128xf32>, vector<128x512xf32>, vector<8x512xf32> -> vector<8x512xf32>
    %232 = arith.addf %230, %231 : vector<8x512xf32>
    %233 = vector.extract_strided_slice %232 {offsets = [0, 0], sizes = [8, 128], strides = [1, 1]} : vector<8x512xf32> to vector<8x128xf32>
    %234 = arith.negf %233 : vector<8x128xf32>
    %235 = math.exp %234 : vector<8x128xf32>
    %cst_75 = arith.constant 1.000000e+00 : f32
    %236 = vector.broadcast %cst_75 : f32 to vector<8x128xf32>
    %237 = arith.addf %236, %235 : vector<8x128xf32>
    %238 = arith.divf %236, %237 : vector<8x128xf32>
    %239 = vector.extract_strided_slice %232 {offsets = [0, 128], sizes = [8, 128], strides = [1, 1]} : vector<8x512xf32> to vector<8x128xf32>
    %240 = arith.negf %239 : vector<8x128xf32>
    %241 = math.exp %240 : vector<8x128xf32>
    %cst_76 = arith.constant 1.000000e+00 : f32
    %242 = vector.broadcast %cst_76 : f32 to vector<8x128xf32>
    %243 = arith.addf %242, %241 : vector<8x128xf32>
    %244 = arith.divf %242, %243 : vector<8x128xf32>
    %245 = vector.extract_strided_slice %232 {offsets = [0, 256], sizes = [8, 128], strides = [1, 1]} : vector<8x512xf32> to vector<8x128xf32>
    %246 = math.tanh %245 : vector<8x128xf32>
    %247 = vector.extract_strided_slice %232 {offsets = [0, 384], sizes = [8, 128], strides = [1, 1]} : vector<8x512xf32> to vector<8x128xf32>
    %248 = arith.negf %247 : vector<8x128xf32>
    %249 = math.exp %248 : vector<8x128xf32>
    %cst_77 = arith.constant 1.000000e+00 : f32
    %250 = vector.broadcast %cst_77 : f32 to vector<8x128xf32>
    %251 = arith.addf %250, %249 : vector<8x128xf32>
    %252 = arith.divf %250, %251 : vector<8x128xf32>
    %253 = arith.mulf %244, %222 : vector<8x128xf32>
    %254 = arith.mulf %238, %246 : vector<8x128xf32>
    %255 = arith.addf %253, %254 : vector<8x128xf32>
    %256 = math.tanh %255 : vector<8x128xf32>
    %257 = arith.mulf %252, %256 : vector<8x128xf32>
    %258 = arith.index_cast %228 : i32 to index
    %c0_78 = arith.constant 0 : index
    %259 = vector.load %arg22[%258, %c0_78] : memref<64x128xf32, #tpu.memory_space<vmem>>, vector<8x128xf32>
    tpu.vector_store %arg22[%258, %c0_78], %257 {strides = array<i32>} : memref<64x128xf32, #tpu.memory_space<vmem>>, vector<8x128xf32>,
    %c7_i32 = arith.constant 7 : i32
    %c8_i32_79 = arith.constant 8 : i32
    %260 = arith.muli %c7_i32, %c8_i32_79 : i32
    %261 = tpu.assume_multiple %260, 8 : i32
    %262 = arith.index_cast %261 : i32 to index
    %c0_80 = arith.constant 0 : index
    %263 = vector.load %arg23[%262, %c0_80] : memref<64x512xf32, #tpu.memory_space<vmem>>, vector<8x512xf32>
    %cst_81 = arith.constant dense<0.000000e+00> : vector<8x512xf32>
    %264 = tpu.matmul %257, %24, %cst_81 {dimension_numbers = #tpu.dot_dimension_numbers<[1], [0], [0], [1], [0, 0, 1, 1], [], []>} : vector<8x128xf32>, vector<128x512xf32>, vector<8x512xf32> -> vector<8x512xf32>
    %265 = arith.addf %263, %264 : vector<8x512xf32>
    %266 = vector.extract_strided_slice %265 {offsets = [0, 0], sizes = [8, 128], strides = [1, 1]} : vector<8x512xf32> to vector<8x128xf32>
    %267 = arith.negf %266 : vector<8x128xf32>
    %268 = math.exp %267 : vector<8x128xf32>
    %cst_82 = arith.constant 1.000000e+00 : f32
    %269 = vector.broadcast %cst_82 : f32 to vector<8x128xf32>
    %270 = arith.addf %269, %268 : vector<8x128xf32>
    %271 = arith.divf %269, %270 : vector<8x128xf32>
    %272 = vector.extract_strided_slice %265 {offsets = [0, 128], sizes = [8, 128], strides = [1, 1]} : vector<8x512xf32> to vector<8x128xf32>
    %273 = arith.negf %272 : vector<8x128xf32>
    %274 = math.exp %273 : vector<8x128xf32>
    %cst_83 = arith.constant 1.000000e+00 : f32
    %275 = vector.broadcast %cst_83 : f32 to vector<8x128xf32>
    %276 = arith.addf %275, %274 : vector<8x128xf32>
    %277 = arith.divf %275, %276 : vector<8x128xf32>
    %278 = vector.extract_strided_slice %265 {offsets = [0, 256], sizes = [8, 128], strides = [1, 1]} : vector<8x512xf32> to vector<8x128xf32>
    %279 = math.tanh %278 : vector<8x128xf32>
    %280 = vector.extract_strided_slice %265 {offsets = [0, 384], sizes = [8, 128], strides = [1, 1]} : vector<8x512xf32> to vector<8x128xf32>
    %281 = arith.negf %280 : vector<8x128xf32>
    %282 = math.exp %281 : vector<8x128xf32>
    %cst_84 = arith.constant 1.000000e+00 : f32
    %283 = vector.broadcast %cst_84 : f32 to vector<8x128xf32>
    %284 = arith.addf %283, %282 : vector<8x128xf32>
    %285 = arith.divf %283, %284 : vector<8x128xf32>
    %286 = arith.mulf %277, %255 : vector<8x128xf32>
    %287 = arith.mulf %271, %279 : vector<8x128xf32>
    %288 = arith.addf %286, %287 : vector<8x128xf32>
    %289 = math.tanh %288 : vector<8x128xf32>
    %290 = arith.mulf %285, %289 : vector<8x128xf32>
    %291 = arith.index_cast %261 : i32 to index
    %c0_85 = arith.constant 0 : index
    %292 = vector.load %arg22[%291, %c0_85] : memref<64x128xf32, #tpu.memory_space<vmem>>, vector<8x128xf32>
    tpu.vector_store %arg22[%291, %c0_85], %290 {strides = array<i32>} : memref<64x128xf32, #tpu.memory_space<vmem>>, vector<8x128xf32>,
    %c8_i32_86 = arith.constant 8 : i32
    %c0_87 = arith.constant 0 : index
    %c0_88 = arith.constant 0 : index
    %293 = vector.load %arg22[%c0_87, %c0_88] : memref<64x128xf32, #tpu.memory_space<vmem>>, vector<64x128xf32>
    %c1 = arith.constant 1 : index
    %c0_89 = arith.constant 0 : index
    %c0_90 = arith.constant 0 : index
    %294 = vector.load %arg8[%c1, %c0_89, %c0_90] : memref<2x128x512xf32, #tpu.memory_space<vmem>>, vector<1x128x512xf32>
    %295 = vector.shape_cast %294 : vector<1x128x512xf32> to vector<128x512xf32>
    %cst_91 = arith.constant dense<0.000000e+00> : vector<64x512xf32>
    %296 = tpu.matmul %293, %295, %cst_91 {dimension_numbers = #tpu.dot_dimension_numbers<[1], [0], [0], [1], [0, 0, 1, 1], [], []>} : vector<64x128xf32>, vector<128x512xf32>, vector<64x512xf32> -> vector<64x512xf32>
    %c1_92 = arith.constant 1 : index
    %c0_93 = arith.constant 0 : index
    %c0_94 = arith.constant 0 : index
    %297 = vector.load %arg10[%c1_92, %c0_93, %c0_94] : memref<2x1x512xf32, #tpu.memory_space<vmem>>, vector<1x1x512xf32>
    %298 = vector.shape_cast %297 : vector<1x1x512xf32> to vector<1x512xf32>
    %299 = vector.broadcast %298 : vector<1x512xf32> to vector<64x512xf32>
    %300 = arith.addf %296, %299 : vector<64x512xf32>
    %c0_95 = arith.constant 0 : index
    %c0_96 = arith.constant 0 : index
    %301 = vector.load %arg23[%c0_95, %c0_96] : memref<64x512xf32, #tpu.memory_space<vmem>>, vector<64x512xf32>
    tpu.vector_store %arg23[%c0_95, %c0_96], %300 {strides = array<i32>} : memref<64x512xf32, #tpu.memory_space<vmem>>, vector<64x512xf32>,
    %c1_97 = arith.constant 1 : index
    %c0_98 = arith.constant 0 : index
    %c0_99 = arith.constant 0 : index
    %302 = vector.load %arg9[%c1_97, %c0_98, %c0_99] : memref<2x128x512xf32, #tpu.memory_space<vmem>>, vector<1x128x512xf32>
    %303 = vector.shape_cast %302 : vector<1x128x512xf32> to vector<128x512xf32>
    %c1_100 = arith.constant 1 : index
    %c0_101 = arith.constant 0 : index
    %c0_102 = arith.constant 0 : index
    %304 = vector.load %arg6[%c1_100, %c0_101, %c0_102] : memref<2x8x128xf32, #tpu.memory_space<vmem>>, vector<1x8x128xf32>
    %305 = vector.shape_cast %304 : vector<1x8x128xf32> to vector<8x128xf32>
    %c1_103 = arith.constant 1 : index
    %c0_104 = arith.constant 0 : index
    %c0_105 = arith.constant 0 : index
    %306 = vector.load %arg7[%c1_103, %c0_104, %c0_105] : memref<2x8x128xf32, #tpu.memory_space<vmem>>, vector<1x8x128xf32>
    %307 = vector.shape_cast %306 : vector<1x8x128xf32> to vector<8x128xf32>
    %c0_i32_106 = arith.constant 0 : i32
    %c8_i32_107 = arith.constant 8 : i32
    %308 = arith.muli %c0_i32_106, %c8_i32_107 : i32
    %309 = tpu.assume_multiple %308, 8 : i32
    %310 = arith.index_cast %309 : i32 to index
    %c0_108 = arith.constant 0 : index
    %311 = vector.load %arg23[%310, %c0_108] : memref<64x512xf32, #tpu.memory_space<vmem>>, vector<8x512xf32>
    %cst_109 = arith.constant dense<0.000000e+00> : vector<8x512xf32>
    %312 = tpu.matmul %305, %303, %cst_109 {dimension_numbers = #tpu.dot_dimension_numbers<[1], [0], [0], [1], [0, 0, 1, 1], [], []>} : vector<8x128xf32>, vector<128x512xf32>, vector<8x512xf32> -> vector<8x512xf32>
    %313 = arith.addf %311, %312 : vector<8x512xf32>
    %314 = vector.extract_strided_slice %313 {offsets = [0, 0], sizes = [8, 128], strides = [1, 1]} : vector<8x512xf32> to vector<8x128xf32>
    %315 = arith.negf %314 : vector<8x128xf32>
    %316 = math.exp %315 : vector<8x128xf32>
    %cst_110 = arith.constant 1.000000e+00 : f32
    %317 = vector.broadcast %cst_110 : f32 to vector<8x128xf32>
    %318 = arith.addf %317, %316 : vector<8x128xf32>
    %319 = arith.divf %317, %318 : vector<8x128xf32>
    %320 = vector.extract_strided_slice %313 {offsets = [0, 128], sizes = [8, 128], strides = [1, 1]} : vector<8x512xf32> to vector<8x128xf32>
    %321 = arith.negf %320 : vector<8x128xf32>
    %322 = math.exp %321 : vector<8x128xf32>
    %cst_111 = arith.constant 1.000000e+00 : f32
    %323 = vector.broadcast %cst_111 : f32 to vector<8x128xf32>
    %324 = arith.addf %323, %322 : vector<8x128xf32>
    %325 = arith.divf %323, %324 : vector<8x128xf32>
    %326 = vector.extract_strided_slice %313 {offsets = [0, 256], sizes = [8, 128], strides = [1, 1]} : vector<8x512xf32> to vector<8x128xf32>
    %327 = math.tanh %326 : vector<8x128xf32>
    %328 = vector.extract_strided_slice %313 {offsets = [0, 384], sizes = [8, 128], strides = [1, 1]} : vector<8x512xf32> to vector<8x128xf32>
    %329 = arith.negf %328 : vector<8x128xf32>
    %330 = math.exp %329 : vector<8x128xf32>
    %cst_112 = arith.constant 1.000000e+00 : f32
    %331 = vector.broadcast %cst_112 : f32 to vector<8x128xf32>
    %332 = arith.addf %331, %330 : vector<8x128xf32>
    %333 = arith.divf %331, %332 : vector<8x128xf32>
    %334 = arith.mulf %325, %307 : vector<8x128xf32>
    %335 = arith.mulf %319, %327 : vector<8x128xf32>
    %336 = arith.addf %334, %335 : vector<8x128xf32>
    %337 = math.tanh %336 : vector<8x128xf32>
    %338 = arith.mulf %333, %337 : vector<8x128xf32>
    %c1_i32_113 = arith.constant 1 : i32
    %c8_i32_114 = arith.constant 8 : i32
    %339 = arith.muli %c1_i32_113, %c8_i32_114 : i32
    %340 = tpu.assume_multiple %339, 8 : i32
    %341 = arith.index_cast %340 : i32 to index
    %c0_115 = arith.constant 0 : index
    %342 = vector.load %arg23[%341, %c0_115] : memref<64x512xf32, #tpu.memory_space<vmem>>, vector<8x512xf32>
    %cst_116 = arith.constant dense<0.000000e+00> : vector<8x512xf32>
    %343 = tpu.matmul %338, %303, %cst_116 {dimension_numbers = #tpu.dot_dimension_numbers<[1], [0], [0], [1], [0, 0, 1, 1], [], []>} : vector<8x128xf32>, vector<128x512xf32>, vector<8x512xf32> -> vector<8x512xf32>
    %344 = arith.addf %342, %343 : vector<8x512xf32>
    %345 = vector.extract_strided_slice %344 {offsets = [0, 0], sizes = [8, 128], strides = [1, 1]} : vector<8x512xf32> to vector<8x128xf32>
    %346 = arith.negf %345 : vector<8x128xf32>
    %347 = math.exp %346 : vector<8x128xf32>
    %cst_117 = arith.constant 1.000000e+00 : f32
    %348 = vector.broadcast %cst_117 : f32 to vector<8x128xf32>
    %349 = arith.addf %348, %347 : vector<8x128xf32>
    %350 = arith.divf %348, %349 : vector<8x128xf32>
    %351 = vector.extract_strided_slice %344 {offsets = [0, 128], sizes = [8, 128], strides = [1, 1]} : vector<8x512xf32> to vector<8x128xf32>
    %352 = arith.negf %351 : vector<8x128xf32>
    %353 = math.exp %352 : vector<8x128xf32>
    %cst_118 = arith.constant 1.000000e+00 : f32
    %354 = vector.broadcast %cst_118 : f32 to vector<8x128xf32>
    %355 = arith.addf %354, %353 : vector<8x128xf32>
    %356 = arith.divf %354, %355 : vector<8x128xf32>
    %357 = vector.extract_strided_slice %344 {offsets = [0, 256], sizes = [8, 128], strides = [1, 1]} : vector<8x512xf32> to vector<8x128xf32>
    %358 = math.tanh %357 : vector<8x128xf32>
    %359 = vector.extract_strided_slice %344 {offsets = [0, 384], sizes = [8, 128], strides = [1, 1]} : vector<8x512xf32> to vector<8x128xf32>
    %360 = arith.negf %359 : vector<8x128xf32>
    %361 = math.exp %360 : vector<8x128xf32>
    %cst_119 = arith.constant 1.000000e+00 : f32
    %362 = vector.broadcast %cst_119 : f32 to vector<8x128xf32>
    %363 = arith.addf %362, %361 : vector<8x128xf32>
    %364 = arith.divf %362, %363 : vector<8x128xf32>
    %365 = arith.mulf %356, %336 : vector<8x128xf32>
    %366 = arith.mulf %350, %358 : vector<8x128xf32>
    %367 = arith.addf %365, %366 : vector<8x128xf32>
    %368 = math.tanh %367 : vector<8x128xf32>
    %369 = arith.mulf %364, %368 : vector<8x128xf32>
    %c2_i32_120 = arith.constant 2 : i32
    %c8_i32_121 = arith.constant 8 : i32
    %370 = arith.muli %c2_i32_120, %c8_i32_121 : i32
    %371 = tpu.assume_multiple %370, 8 : i32
    %372 = arith.index_cast %371 : i32 to index
    %c0_122 = arith.constant 0 : index
    %373 = vector.load %arg23[%372, %c0_122] : memref<64x512xf32, #tpu.memory_space<vmem>>, vector<8x512xf32>
    %cst_123 = arith.constant dense<0.000000e+00> : vector<8x512xf32>
    %374 = tpu.matmul %369, %303, %cst_123 {dimension_numbers = #tpu.dot_dimension_numbers<[1], [0], [0], [1], [0, 0, 1, 1], [], []>} : vector<8x128xf32>, vector<128x512xf32>, vector<8x512xf32> -> vector<8x512xf32>
    %375 = arith.addf %373, %374 : vector<8x512xf32>
    %376 = vector.extract_strided_slice %375 {offsets = [0, 0], sizes = [8, 128], strides = [1, 1]} : vector<8x512xf32> to vector<8x128xf32>
    %377 = arith.negf %376 : vector<8x128xf32>
    %378 = math.exp %377 : vector<8x128xf32>
    %cst_124 = arith.constant 1.000000e+00 : f32
    %379 = vector.broadcast %cst_124 : f32 to vector<8x128xf32>
    %380 = arith.addf %379, %378 : vector<8x128xf32>
    %381 = arith.divf %379, %380 : vector<8x128xf32>
    %382 = vector.extract_strided_slice %375 {offsets = [0, 128], sizes = [8, 128], strides = [1, 1]} : vector<8x512xf32> to vector<8x128xf32>
    %383 = arith.negf %382 : vector<8x128xf32>
    %384 = math.exp %383 : vector<8x128xf32>
    %cst_125 = arith.constant 1.000000e+00 : f32
    %385 = vector.broadcast %cst_125 : f32 to vector<8x128xf32>
    %386 = arith.addf %385, %384 : vector<8x128xf32>
    %387 = arith.divf %385, %386 : vector<8x128xf32>
    %388 = vector.extract_strided_slice %375 {offsets = [0, 256], sizes = [8, 128], strides = [1, 1]} : vector<8x512xf32> to vector<8x128xf32>
    %389 = math.tanh %388 : vector<8x128xf32>
    %390 = vector.extract_strided_slice %375 {offsets = [0, 384], sizes = [8, 128], strides = [1, 1]} : vector<8x512xf32> to vector<8x128xf32>
    %391 = arith.negf %390 : vector<8x128xf32>
    %392 = math.exp %391 : vector<8x128xf32>
    %cst_126 = arith.constant 1.000000e+00 : f32
    %393 = vector.broadcast %cst_126 : f32 to vector<8x128xf32>
    %394 = arith.addf %393, %392 : vector<8x128xf32>
    %395 = arith.divf %393, %394 : vector<8x128xf32>
    %396 = arith.mulf %387, %367 : vector<8x128xf32>
    %397 = arith.mulf %381, %389 : vector<8x128xf32>
    %398 = arith.addf %396, %397 : vector<8x128xf32>
    %399 = math.tanh %398 : vector<8x128xf32>
    %400 = arith.mulf %395, %399 : vector<8x128xf32>
    %c3_i32_127 = arith.constant 3 : i32
    %c8_i32_128 = arith.constant 8 : i32
    %401 = arith.muli %c3_i32_127, %c8_i32_128 : i32
    %402 = tpu.assume_multiple %401, 8 : i32
    %403 = arith.index_cast %402 : i32 to index
    %c0_129 = arith.constant 0 : index
    %404 = vector.load %arg23[%403, %c0_129] : memref<64x512xf32, #tpu.memory_space<vmem>>, vector<8x512xf32>
    %cst_130 = arith.constant dense<0.000000e+00> : vector<8x512xf32>
    %405 = tpu.matmul %400, %303, %cst_130 {dimension_numbers = #tpu.dot_dimension_numbers<[1], [0], [0], [1], [0, 0, 1, 1], [], []>} : vector<8x128xf32>, vector<128x512xf32>, vector<8x512xf32> -> vector<8x512xf32>
    %406 = arith.addf %404, %405 : vector<8x512xf32>
    %407 = vector.extract_strided_slice %406 {offsets = [0, 0], sizes = [8, 128], strides = [1, 1]} : vector<8x512xf32> to vector<8x128xf32>
    %408 = arith.negf %407 : vector<8x128xf32>
    %409 = math.exp %408 : vector<8x128xf32>
    %cst_131 = arith.constant 1.000000e+00 : f32
    %410 = vector.broadcast %cst_131 : f32 to vector<8x128xf32>
    %411 = arith.addf %410, %409 : vector<8x128xf32>
    %412 = arith.divf %410, %411 : vector<8x128xf32>
    %413 = vector.extract_strided_slice %406 {offsets = [0, 128], sizes = [8, 128], strides = [1, 1]} : vector<8x512xf32> to vector<8x128xf32>
    %414 = arith.negf %413 : vector<8x128xf32>
    %415 = math.exp %414 : vector<8x128xf32>
    %cst_132 = arith.constant 1.000000e+00 : f32
    %416 = vector.broadcast %cst_132 : f32 to vector<8x128xf32>
    %417 = arith.addf %416, %415 : vector<8x128xf32>
    %418 = arith.divf %416, %417 : vector<8x128xf32>
    %419 = vector.extract_strided_slice %406 {offsets = [0, 256], sizes = [8, 128], strides = [1, 1]} : vector<8x512xf32> to vector<8x128xf32>
    %420 = math.tanh %419 : vector<8x128xf32>
    %421 = vector.extract_strided_slice %406 {offsets = [0, 384], sizes = [8, 128], strides = [1, 1]} : vector<8x512xf32> to vector<8x128xf32>
    %422 = arith.negf %421 : vector<8x128xf32>
    %423 = math.exp %422 : vector<8x128xf32>
    %cst_133 = arith.constant 1.000000e+00 : f32
    %424 = vector.broadcast %cst_133 : f32 to vector<8x128xf32>
    %425 = arith.addf %424, %423 : vector<8x128xf32>
    %426 = arith.divf %424, %425 : vector<8x128xf32>
    %427 = arith.mulf %418, %398 : vector<8x128xf32>
    %428 = arith.mulf %412, %420 : vector<8x128xf32>
    %429 = arith.addf %427, %428 : vector<8x128xf32>
    %430 = math.tanh %429 : vector<8x128xf32>
    %431 = arith.mulf %426, %430 : vector<8x128xf32>
    %c4_i32_134 = arith.constant 4 : i32
    %c8_i32_135 = arith.constant 8 : i32
    %432 = arith.muli %c4_i32_134, %c8_i32_135 : i32
    %433 = tpu.assume_multiple %432, 8 : i32
    %434 = arith.index_cast %433 : i32 to index
    %c0_136 = arith.constant 0 : index
    %435 = vector.load %arg23[%434, %c0_136] : memref<64x512xf32, #tpu.memory_space<vmem>>, vector<8x512xf32>
    %cst_137 = arith.constant dense<0.000000e+00> : vector<8x512xf32>
    %436 = tpu.matmul %431, %303, %cst_137 {dimension_numbers = #tpu.dot_dimension_numbers<[1], [0], [0], [1], [0, 0, 1, 1], [], []>} : vector<8x128xf32>, vector<128x512xf32>, vector<8x512xf32> -> vector<8x512xf32>
    %437 = arith.addf %435, %436 : vector<8x512xf32>
    %438 = vector.extract_strided_slice %437 {offsets = [0, 0], sizes = [8, 128], strides = [1, 1]} : vector<8x512xf32> to vector<8x128xf32>
    %439 = arith.negf %438 : vector<8x128xf32>
    %440 = math.exp %439 : vector<8x128xf32>
    %cst_138 = arith.constant 1.000000e+00 : f32
    %441 = vector.broadcast %cst_138 : f32 to vector<8x128xf32>
    %442 = arith.addf %441, %440 : vector<8x128xf32>
    %443 = arith.divf %441, %442 : vector<8x128xf32>
    %444 = vector.extract_strided_slice %437 {offsets = [0, 128], sizes = [8, 128], strides = [1, 1]} : vector<8x512xf32> to vector<8x128xf32>
    %445 = arith.negf %444 : vector<8x128xf32>
    %446 = math.exp %445 : vector<8x128xf32>
    %cst_139 = arith.constant 1.000000e+00 : f32
    %447 = vector.broadcast %cst_139 : f32 to vector<8x128xf32>
    %448 = arith.addf %447, %446 : vector<8x128xf32>
    %449 = arith.divf %447, %448 : vector<8x128xf32>
    %450 = vector.extract_strided_slice %437 {offsets = [0, 256], sizes = [8, 128], strides = [1, 1]} : vector<8x512xf32> to vector<8x128xf32>
    %451 = math.tanh %450 : vector<8x128xf32>
    %452 = vector.extract_strided_slice %437 {offsets = [0, 384], sizes = [8, 128], strides = [1, 1]} : vector<8x512xf32> to vector<8x128xf32>
    %453 = arith.negf %452 : vector<8x128xf32>
    %454 = math.exp %453 : vector<8x128xf32>
    %cst_140 = arith.constant 1.000000e+00 : f32
    %455 = vector.broadcast %cst_140 : f32 to vector<8x128xf32>
    %456 = arith.addf %455, %454 : vector<8x128xf32>
    %457 = arith.divf %455, %456 : vector<8x128xf32>
    %458 = arith.mulf %449, %429 : vector<8x128xf32>
    %459 = arith.mulf %443, %451 : vector<8x128xf32>
    %460 = arith.addf %458, %459 : vector<8x128xf32>
    %461 = math.tanh %460 : vector<8x128xf32>
    %462 = arith.mulf %457, %461 : vector<8x128xf32>
    %c5_i32_141 = arith.constant 5 : i32
    %c8_i32_142 = arith.constant 8 : i32
    %463 = arith.muli %c5_i32_141, %c8_i32_142 : i32
    %464 = tpu.assume_multiple %463, 8 : i32
    %465 = arith.index_cast %464 : i32 to index
    %c0_143 = arith.constant 0 : index
    %466 = vector.load %arg23[%465, %c0_143] : memref<64x512xf32, #tpu.memory_space<vmem>>, vector<8x512xf32>
    %cst_144 = arith.constant dense<0.000000e+00> : vector<8x512xf32>
    %467 = tpu.matmul %462, %303, %cst_144 {dimension_numbers = #tpu.dot_dimension_numbers<[1], [0], [0], [1], [0, 0, 1, 1], [], []>} : vector<8x128xf32>, vector<128x512xf32>, vector<8x512xf32> -> vector<8x512xf32>
    %468 = arith.addf %466, %467 : vector<8x512xf32>
    %469 = vector.extract_strided_slice %468 {offsets = [0, 0], sizes = [8, 128], strides = [1, 1]} : vector<8x512xf32> to vector<8x128xf32>
    %470 = arith.negf %469 : vector<8x128xf32>
    %471 = math.exp %470 : vector<8x128xf32>
    %cst_145 = arith.constant 1.000000e+00 : f32
    %472 = vector.broadcast %cst_145 : f32 to vector<8x128xf32>
    %473 = arith.addf %472, %471 : vector<8x128xf32>
    %474 = arith.divf %472, %473 : vector<8x128xf32>
    %475 = vector.extract_strided_slice %468 {offsets = [0, 128], sizes = [8, 128], strides = [1, 1]} : vector<8x512xf32> to vector<8x128xf32>
    %476 = arith.negf %475 : vector<8x128xf32>
    %477 = math.exp %476 : vector<8x128xf32>
    %cst_146 = arith.constant 1.000000e+00 : f32
    %478 = vector.broadcast %cst_146 : f32 to vector<8x128xf32>
    %479 = arith.addf %478, %477 : vector<8x128xf32>
    %480 = arith.divf %478, %479 : vector<8x128xf32>
    %481 = vector.extract_strided_slice %468 {offsets = [0, 256], sizes = [8, 128], strides = [1, 1]} : vector<8x512xf32> to vector<8x128xf32>
    %482 = math.tanh %481 : vector<8x128xf32>
    %483 = vector.extract_strided_slice %468 {offsets = [0, 384], sizes = [8, 128], strides = [1, 1]} : vector<8x512xf32> to vector<8x128xf32>
    %484 = arith.negf %483 : vector<8x128xf32>
    %485 = math.exp %484 : vector<8x128xf32>
    %cst_147 = arith.constant 1.000000e+00 : f32
    %486 = vector.broadcast %cst_147 : f32 to vector<8x128xf32>
    %487 = arith.addf %486, %485 : vector<8x128xf32>
    %488 = arith.divf %486, %487 : vector<8x128xf32>
    %489 = arith.mulf %480, %460 : vector<8x128xf32>
    %490 = arith.mulf %474, %482 : vector<8x128xf32>
    %491 = arith.addf %489, %490 : vector<8x128xf32>
    %492 = math.tanh %491 : vector<8x128xf32>
    %493 = arith.mulf %488, %492 : vector<8x128xf32>
    %c6_i32_148 = arith.constant 6 : i32
    %c8_i32_149 = arith.constant 8 : i32
    %494 = arith.muli %c6_i32_148, %c8_i32_149 : i32
    %495 = tpu.assume_multiple %494, 8 : i32
    %496 = arith.index_cast %495 : i32 to index
    %c0_150 = arith.constant 0 : index
    %497 = vector.load %arg23[%496, %c0_150] : memref<64x512xf32, #tpu.memory_space<vmem>>, vector<8x512xf32>
    %cst_151 = arith.constant dense<0.000000e+00> : vector<8x512xf32>
    %498 = tpu.matmul %493, %303, %cst_151 {dimension_numbers = #tpu.dot_dimension_numbers<[1], [0], [0], [1], [0, 0, 1, 1], [], []>} : vector<8x128xf32>, vector<128x512xf32>, vector<8x512xf32> -> vector<8x512xf32>
    %499 = arith.addf %497, %498 : vector<8x512xf32>
    %500 = vector.extract_strided_slice %499 {offsets = [0, 0], sizes = [8, 128], strides = [1, 1]} : vector<8x512xf32> to vector<8x128xf32>
    %501 = arith.negf %500 : vector<8x128xf32>
    %502 = math.exp %501 : vector<8x128xf32>
    %cst_152 = arith.constant 1.000000e+00 : f32
    %503 = vector.broadcast %cst_152 : f32 to vector<8x128xf32>
    %504 = arith.addf %503, %502 : vector<8x128xf32>
    %505 = arith.divf %503, %504 : vector<8x128xf32>
    %506 = vector.extract_strided_slice %499 {offsets = [0, 128], sizes = [8, 128], strides = [1, 1]} : vector<8x512xf32> to vector<8x128xf32>
    %507 = arith.negf %506 : vector<8x128xf32>
    %508 = math.exp %507 : vector<8x128xf32>
    %cst_153 = arith.constant 1.000000e+00 : f32
    %509 = vector.broadcast %cst_153 : f32 to vector<8x128xf32>
    %510 = arith.addf %509, %508 : vector<8x128xf32>
    %511 = arith.divf %509, %510 : vector<8x128xf32>
    %512 = vector.extract_strided_slice %499 {offsets = [0, 256], sizes = [8, 128], strides = [1, 1]} : vector<8x512xf32> to vector<8x128xf32>
    %513 = math.tanh %512 : vector<8x128xf32>
    %514 = vector.extract_strided_slice %499 {offsets = [0, 384], sizes = [8, 128], strides = [1, 1]} : vector<8x512xf32> to vector<8x128xf32>
    %515 = arith.negf %514 : vector<8x128xf32>
    %516 = math.exp %515 : vector<8x128xf32>
    %cst_154 = arith.constant 1.000000e+00 : f32
    %517 = vector.broadcast %cst_154 : f32 to vector<8x128xf32>
    %518 = arith.addf %517, %516 : vector<8x128xf32>
    %519 = arith.divf %517, %518 : vector<8x128xf32>
    %520 = arith.mulf %511, %491 : vector<8x128xf32>
    %521 = arith.mulf %505, %513 : vector<8x128xf32>
    %522 = arith.addf %520, %521 : vector<8x128xf32>
    %523 = math.tanh %522 : vector<8x128xf32>
    %524 = arith.mulf %519, %523 : vector<8x128xf32>
    %c7_i32_155 = arith.constant 7 : i32
    %c8_i32_156 = arith.constant 8 : i32
    %525 = arith.muli %c7_i32_155, %c8_i32_156 : i32
    %526 = tpu.assume_multiple %525, 8 : i32
    %527 = arith.index_cast %526 : i32 to index
    %c0_157 = arith.constant 0 : index
    %528 = vector.load %arg23[%527, %c0_157] : memref<64x512xf32, #tpu.memory_space<vmem>>, vector<8x512xf32>
    %cst_158 = arith.constant dense<0.000000e+00> : vector<8x512xf32>
    %529 = tpu.matmul %524, %303, %cst_158 {dimension_numbers = #tpu.dot_dimension_numbers<[1], [0], [0], [1], [0, 0, 1, 1], [], []>} : vector<8x128xf32>, vector<128x512xf32>, vector<8x512xf32> -> vector<8x512xf32>
    %530 = arith.addf %528, %529 : vector<8x512xf32>
    %531 = vector.extract_strided_slice %530 {offsets = [0, 0], sizes = [8, 128], strides = [1, 1]} : vector<8x512xf32> to vector<8x128xf32>
    %532 = arith.negf %531 : vector<8x128xf32>
    %533 = math.exp %532 : vector<8x128xf32>
    %cst_159 = arith.constant 1.000000e+00 : f32
    %534 = vector.broadcast %cst_159 : f32 to vector<8x128xf32>
    %535 = arith.addf %534, %533 : vector<8x128xf32>
    %536 = arith.divf %534, %535 : vector<8x128xf32>
    %537 = vector.extract_strided_slice %530 {offsets = [0, 128], sizes = [8, 128], strides = [1, 1]} : vector<8x512xf32> to vector<8x128xf32>
    %538 = arith.negf %537 : vector<8x128xf32>
    %539 = math.exp %538 : vector<8x128xf32>
    %cst_160 = arith.constant 1.000000e+00 : f32
    %540 = vector.broadcast %cst_160 : f32 to vector<8x128xf32>
    %541 = arith.addf %540, %539 : vector<8x128xf32>
    %542 = arith.divf %540, %541 : vector<8x128xf32>
    %543 = vector.extract_strided_slice %530 {offsets = [0, 256], sizes = [8, 128], strides = [1, 1]} : vector<8x512xf32> to vector<8x128xf32>
    %544 = math.tanh %543 : vector<8x128xf32>
    %545 = vector.extract_strided_slice %530 {offsets = [0, 384], sizes = [8, 128], strides = [1, 1]} : vector<8x512xf32> to vector<8x128xf32>
    %546 = arith.negf %545 : vector<8x128xf32>
    %547 = math.exp %546 : vector<8x128xf32>
    %cst_161 = arith.constant 1.000000e+00 : f32
    %548 = vector.broadcast %cst_161 : f32 to vector<8x128xf32>
    %549 = arith.addf %548, %547 : vector<8x128xf32>
    %550 = arith.divf %548, %549 : vector<8x128xf32>
    %551 = arith.mulf %542, %522 : vector<8x128xf32>
    %552 = arith.mulf %536, %544 : vector<8x128xf32>
    %553 = arith.addf %551, %552 : vector<8x128xf32>
    %554 = math.tanh %553 : vector<8x128xf32>
    %555 = arith.mulf %550, %554 : vector<8x128xf32>
    %c8_i32_162 = arith.constant 8 : i32
    %c0_163 = arith.constant 0 : index
    %c0_164 = arith.constant 0 : index
    %556 = vector.load %arg11[%c0_163, %c0_164] : memref<128x128xf32, #tpu.memory_space<vmem>>, vector<128x128xf32>
    %cst_165 = arith.constant dense<0.000000e+00> : vector<8x128xf32>
    %557 = tpu.matmul %555, %556, %cst_165 {dimension_numbers = #tpu.dot_dimension_numbers<[1], [0], [0], [1], [0, 0, 1, 1], [], []>} : vector<8x128xf32>, vector<128x128xf32>, vector<8x128xf32> -> vector<8x128xf32>
    %c0_166 = arith.constant 0 : index
    %c0_167 = arith.constant 0 : index
    %558 = vector.load %arg12[%c0_166, %c0_167] : memref<1x128xf32, #tpu.memory_space<vmem>>, vector<1x128xf32>
    %559 = vector.broadcast %558 : vector<1x128xf32> to vector<8x128xf32>
    %560 = arith.addf %557, %559 : vector<8x128xf32>
    %cst_168 = arith.constant 0.000000e+00 : f32
    %561 = vector.broadcast %cst_168 : f32 to vector<8x128xf32>
    %562 = arith.maximumf %560, %561 : vector<8x128xf32>
    %563 = arith.addf %13, %562 : vector<8x128xf32>
    %c0_169 = arith.constant 0 : index
    %c0_170 = arith.constant 0 : index
    %564 = vector.load %arg13[%c0_169, %c0_170] : memref<128x128xf32, #tpu.memory_space<vmem>>, vector<128x128xf32>
    %cst_171 = arith.constant dense<0.000000e+00> : vector<8x128xf32>
    %565 = tpu.matmul %563, %564, %cst_171 {dimension_numbers = #tpu.dot_dimension_numbers<[1], [0], [0], [1], [0, 0, 1, 1], [], []>} : vector<8x128xf32>, vector<128x128xf32>, vector<8x128xf32> -> vector<8x128xf32>
    %c0_172 = arith.constant 0 : index
    %c0_173 = arith.constant 0 : index
    %566 = vector.load %arg14[%c0_172, %c0_173] : memref<1x128xf32, #tpu.memory_space<vmem>>, vector<1x128xf32>
    %567 = vector.broadcast %566 : vector<1x128xf32> to vector<8x128xf32>
    %568 = arith.addf %565, %567 : vector<8x128xf32>
    %569 = math.tanh %568 : vector<8x128xf32>
    %c0_174 = arith.constant 0 : index
    %c0_175 = arith.constant 0 : index
    %570 = vector.load %arg15[%c0_174, %c0_175] : memref<128x64xf32, #tpu.memory_space<vmem>>, vector<128x64xf32>
    %cst_176 = arith.constant dense<0.000000e+00> : vector<8x64xf32>
    %571 = tpu.matmul %569, %570, %cst_176 {dimension_numbers = #tpu.dot_dimension_numbers<[1], [0], [0], [1], [0, 0, 1, 1], [], []>} : vector<8x128xf32>, vector<128x64xf32>, vector<8x64xf32> -> vector<8x64xf32>
    %c0_177 = arith.constant 0 : index
    %c0_178 = arith.constant 0 : index
    %572 = vector.load %arg16[%c0_177, %c0_178] : memref<1x64xf32, #tpu.memory_space<vmem>>, vector<1x64xf32>
    %573 = vector.broadcast %572 : vector<1x64xf32> to vector<8x64xf32>
    %574 = arith.addf %571, %573 : vector<8x64xf32>
    %cst_179 = arith.constant 0.000000e+00 : f32
    %575 = vector.broadcast %cst_179 : f32 to vector<8x64xf32>
    %576 = arith.maximumf %574, %575 : vector<8x64xf32>
    %c0_180 = arith.constant 0 : index
    %c0_181 = arith.constant 0 : index
    %577 = vector.load %arg17[%c0_180, %c0_181] : memref<64x32xf32, #tpu.memory_space<vmem>>, vector<64x32xf32>
    %cst_182 = arith.constant dense<0.000000e+00> : vector<8x32xf32>
    %578 = tpu.matmul %576, %577, %cst_182 {dimension_numbers = #tpu.dot_dimension_numbers<[1], [0], [0], [1], [0, 0, 1, 1], [], []>} : vector<8x64xf32>, vector<64x32xf32>, vector<8x32xf32> -> vector<8x32xf32>
    %c0_183 = arith.constant 0 : index
    %c0_184 = arith.constant 0 : index
    %579 = vector.load %arg18[%c0_183, %c0_184] : memref<1x32xf32, #tpu.memory_space<vmem>>, vector<1x32xf32>
    %580 = vector.broadcast %579 : vector<1x32xf32> to vector<8x32xf32>
    %581 = arith.addf %578, %580 : vector<8x32xf32>
    %cst_185 = arith.constant 0.000000e+00 : f32
    %582 = vector.broadcast %cst_185 : f32 to vector<8x32xf32>
    %583 = arith.maximumf %581, %582 : vector<8x32xf32>
    %c0_186 = arith.constant 0 : index
    %c0_187 = arith.constant 0 : index
    %584 = vector.load %arg19[%c0_186, %c0_187] : memref<32x128xf32, #tpu.memory_space<vmem>>, vector<32x128xf32>
    %cst_188 = arith.constant dense<0.000000e+00> : vector<8x128xf32>
    %585 = tpu.matmul %583, %584, %cst_188 {dimension_numbers = #tpu.dot_dimension_numbers<[1], [0], [0], [1], [0, 0, 1, 1], [], []>} : vector<8x32xf32>, vector<32x128xf32>, vector<8x128xf32> -> vector<8x128xf32>
    %c0_189 = arith.constant 0 : index
    %c0_190 = arith.constant 0 : index
    %586 = vector.load %arg20[%c0_189, %c0_190] : memref<1x128xf32, #tpu.memory_space<vmem>>, vector<1x128xf32>
    %587 = vector.broadcast %586 : vector<1x128xf32> to vector<8x128xf32>
    %588 = arith.addf %585, %587 : vector<8x128xf32>
    %c0_191 = arith.constant 0 : index
    %c0_192 = arith.constant 0 : index
    %589 = vector.load %arg21[%c0_191, %c0_192] : memref<8x128xf32, #tpu.memory_space<vmem>>, vector<8x128xf32>
    tpu.vector_store %arg21[%c0_191, %c0_192], %588 {strides = array<i32>} : memref<8x128xf32, #tpu.memory_space<vmem>>, vector<8x128xf32>,
    return
  }
}

</mosaic_0001>

<bundles_post_ra>
// kernel: multimodal_forward.1
= control target key start
LH: loop header
LB: loop body
LE: loop exit
PB: predicated region body
PF: predicated region fallthrough
CT: control target
= control target key end

     0   :  { %s9744_s0 = inlined_call_operand.vmem [shape: f32[8,768], index: 0, kind: input, shape index: {}]   ;;  %s9745_s1 = inlined_call_operand.hbm [shape: f32[768,512], index: 1, kind: input, shape index: {}]   ;;  %s9746_s2 = inlined_call_operand.hbm [shape: f32[1,512], index: 2, kind: input, shape index: {}]   ;;  %s9747_s3 = inlined_call_operand.hbm [shape: f32[512,128], index: 3, kind: input, shape index: {}]   ;;  %s9748_s4 = inlined_call_operand.hbm [shape: f32[1,128], index: 4, kind: input, shape index: {}]   ;;  %s9749_s5 = inlined_call_operand.vmem [shape: f32[64,128], index: 5, kind: input, shape index: {}]   ;;  %s9750_s6 = inlined_call_operand.hbm [shape: f32[2,8,128], index: 6, kind: input, shape index: {}]   ;;  %s9751_s7 = inlined_call_operand.hbm [shape: f32[2,8,128], index: 7, kind: input, shape index: {}]   ;;  %s9752_s8 = inlined_call_operand.hbm [shape: f32[2,128,512], index: 8, kind: input, shape index: {}]   ;;  %s9753_s9 = inlined_call_operand.hbm [shape: f32[2,128,512], index: 9, kind: input, shape index: {}]   ;;  %s9754_s10 = inlined_call_operand.hbm [shape: f32[2,1,512], index: 10, kind: input, shape index: {}]   ;;  %s9755_s11 = inlined_call_operand.hbm [shape: f32[128,128], index: 11, kind: input, shape index: {}]   ;;  %s9756_s12 = inlined_call_operand.hbm [shape: f32[1,128], index: 12, kind: input, shape index: {}]   ;;  %s9757_s13 = inlined_call_operand.hbm [shape: f32[128,128], index: 13, kind: input, shape index: {}]   ;;  %s9758_s14 = inlined_call_operand.hbm [shape: f32[1,128], index: 14, kind: input, shape index: {}]   ;;  %s9759_s15 = inlined_call_operand.vmem [shape: f32[128,64], index: 15, kind: input, shape index: {}]   ;;  %s9760_s16 = inlined_call_operand.hbm [shape: f32[1,64], index: 16, kind: input, shape index: {}]   ;;  %s9761_s17 = inlined_call_operand.vmem [shape: f32[64,32], index: 17, kind: input, shape index: {}]   ;;  %s9762_s18 = inlined_call_operand.hbm [shape: f32[1,32], index: 18, kind: input, shape index: {}]   ;;  %s9763_s19 = inlined_call_operand.hbm [shape: f32[32,128], index: 19, kind: input, shape index: {}]   ;;  %s9764_s20 = inlined_call_operand.hbm [shape: f32[1,128], index: 20, kind: input, shape index: {}]   ;;  %s9765_s21 = inlined_call_operand.vmem [shape: f32[8,128], index: 21, kind: output, shape index: {}]  }
   0x1   :  { %9772 = sst [smem:[#allocation39_spill]] %s9744_s0 }
   0x2   :  { %9773 = sst [smem:[#allocation40_spill]] %s9745_s1 }
   0x3   :  { %9774 = sst [smem:[#allocation41_spill]] %s9746_s2 }
   0x4   :  { %9775 = sst [smem:[#allocation42_spill]] %s9747_s3 }
   0x5   :  { %9776 = sst [smem:[#allocation43_spill]] %s9748_s4 }
   0x6   :  { %9777 = sst [smem:[#allocation44_spill]] %s9749_s5 }
   0x7   :  { %9778 = sst [smem:[#allocation45_spill]] %s9765_s21 }
   0x8   :  { %26 = vsyncpa [#allocation5], 0 }
   0x9   :  { %27 = vsyncpa [#allocation7], 0 }
   0xa   :  { %28 = vsyncpa [#allocation10], 0 }
   0xb   :  { %29 = vsyncpa [#allocation13], 0 }
   0xc   :  { %30 = vsyncpa [#allocation16], 0 }
   0xd   :  { %31 = vsyncpa [#allocation19], 0 }
   0xe   :  { %32 = vsyncpa [#allocation22], 0 }
   0xf   :  { %33 = vsyncpa [#allocation25], 0 }
  0x10   :  { %34 = vsyncpa [#allocation28], 0  ;;  %s8315_s2 = smov [#allocation6]   ;;  %s8316_s26 = smov [#allocation9]  }
  0x11   :  { %s55_s25 = sshll.u32 %s8315_s2, 4  ;;  %s77_s27 = sshll.u32 %s8316_s26, 4  ;;  %s56_s25 = int_to_ptr.vmem [resolvable:$true] %s55_s25  ;;  %s78_s27 = int_to_ptr.vmem [resolvable:$true] %s77_s27 }
  0x12   :  { %s9779_s29 = sld [smem:[#allocation41_spill]] }
  0x18   :  { %s7923_s0 = scalar_lea.hbm %s9779_s29, 64 }
  0x19   :  { %p7924_p0 = scmp.ne.s32.totalorder %s9779_s29, %s7923_s0  ;;  %p7927_p1 = scmp.lt.u32.totalorder %s7923_s0, %s9779_s29 }
  0x1b   :  { %p7929_p2 = pnand %p7927_p1, %p7924_p0 }
  0x1d   :  { %7932 = shalt.err (!%p7929_p2)
}
  0x1e   :  { %s7933_s23 = scalar_lea.vmem %s56_s25, 64  ;;  %p7938_p4 = scmp.lt.s32.totalorder %s56_s25, %s56_s25 }
  0x1f   :  { %p7934_p3 = scmp.ne.s32.totalorder %s56_s25, %s7933_s23  ;;  %p7939_p5 = scmp.lt.s32.totalorder %s7933_s23, %s7933_s23 }
  0x21   :  { %p7940_p6 = por %p7939_p5, %p7938_p4 }
  0x23   :  { %p7941_p7 = pnand %p7940_p6, %p7934_p3 }
  0x25   :  { %7944 = shalt.err (!%p7941_p7)
}
  0x26   :  { %58 = dma.hbm_to_vmem [thread:$0]  %s9779_s29, 64, %s56_s25, [#allocation7]  }
  0x27   :  { %s9780_s3 = sld [smem:[#allocation43_spill]] }
  0x2d   :  { %s7945_s28 = scalar_lea.hbm %s9780_s3, 16 }
  0x2e   :  { %p7946_p8 = scmp.ne.s32.totalorder %s9780_s3, %s7945_s28  ;;  %p7949_p9 = scmp.lt.u32.totalorder %s7945_s28, %s9780_s3 }
  0x30   :  { %p7951_p10 = pnand %p7949_p9, %p7946_p8 }
  0x32   :  { %7954 = shalt.err (!%p7951_p10)
}
  0x33   :  { %s7955_s22 = scalar_lea.vmem %s78_s27, 16  ;;  %s7959_s23 = scalar_lea.vmem %s78_s27, 32 }
  0x34   :  { %p7956_p11 = scmp.ne.s32.totalorder %s78_s27, %s7955_s22  ;;  %p7960_p12 = scmp.lt.s32.totalorder %s78_s27, %s78_s27 }
  0x35   :  { %p7961_p13 = scmp.lt.s32.totalorder %s7959_s23, %s7955_s22 }
  0x37   :  { %p7962_p0 = por %p7961_p13, %p7960_p12 }
  0x39   :  { %p7963_p1 = pnand %p7962_p0, %p7956_p11 }
  0x3b   :  { %7966 = shalt.err (!%p7963_p1)
}
  0x3c   :  { %80 = dma.hbm_to_vmem [thread:$0]  %s9780_s3, 16, %s78_s27, [#allocation10]  }
  0x3d   :  { %s8317_s1 = smov [#allocation12]   ;;  %s7967_s28 = scalar_lea.hbm %s9751_s7, 256 }
  0x3e   :  { %s100_s24 = sshll.u32 %s8317_s1, 4  ;;  %p7968_p2 = scmp.ne.s32.totalorder %s9751_s7, %s7967_s28  ;;  %s101_s24 = int_to_ptr.vmem [resolvable:$true] %s100_s24 }
  0x3f   :  { %p7971_p3 = scmp.lt.u32.totalorder %s7967_s28, %s9751_s7 }
  0x41   :  { %p7973_p4 = pnand %p7971_p3, %p7968_p2 }
  0x43   :  { %7976 = shalt.err (!%p7973_p4)
}
  0x44   :  { %s7977_s22 = scalar_lea.vmem %s101_s24, 256  ;;  %p7982_p6 = scmp.lt.s32.totalorder %s101_s24, %s101_s24 }
  0x45   :  { %p7978_p5 = scmp.ne.s32.totalorder %s101_s24, %s7977_s22  ;;  %p7983_p7 = scmp.lt.s32.totalorder %s7977_s22, %s7977_s22 }
  0x47   :  { %p7984_p8 = por %p7983_p7, %p7982_p6 }
  0x49   :  { %p7985_p9 = pnand %p7984_p8, %p7978_p5 }
  0x4b   :  { %7988 = shalt.err (!%p7985_p9)
}
  0x4c   :  { %s8318_s27 = smov 128   ;;  %s8319_s3 = smov 8  }
  0x4d   :  { %106 = dma.hbm_to_vmem [thread:$0]  %s9751_s7, 256, %s101_s24, [#allocation13], %s8318_s27, %s8318_s27, %s8319_s3  }
  0x4e   :  { %s8320_s29 = smov [#allocation15]   ;;  %s8321_s2 = smov [#allocation18]  }
  0x4f   :  { %s124_s1 = sshll.u32 %s8320_s29, 4  ;;  %s148_s26 = sshll.u32 %s8321_s2, 4  ;;  %s125_s1 = int_to_ptr.vmem [resolvable:$true] %s124_s1  ;;  %s149_s26 = int_to_ptr.vmem [resolvable:$true] %s148_s26 }
  0x50   :  { %s7989_s30 = scalar_lea.hbm %s9753_s9, 16384 }
  0x51   :  { %p7990_p10 = scmp.ne.s32.totalorder %s9753_s9, %s7989_s30  ;;  %p7993_p11 = scmp.lt.u32.totalorder %s7989_s30, %s9753_s9 }
  0x53   :  { %p7995_p12 = pnand %p7993_p11, %p7990_p10 }
  0x55   :  { %7998 = shalt.err (!%p7995_p12)
}
  0x56   :  { %s7999_s7 = scalar_lea.vmem %s125_s1, 16384  ;;  %p8004_p0 = scmp.lt.s32.totalorder %s125_s1, %s125_s1 }
  0x57   :  { %p8000_p13 = scmp.ne.s32.totalorder %s125_s1, %s7999_s7  ;;  %p8005_p1 = scmp.lt.s32.totalorder %s7999_s7, %s7999_s7 }
  0x59   :  { %p8006_p2 = por %p8005_p1, %p8004_p0 }
  0x5b   :  { %p8007_p3 = pnand %p8006_p2, %p8000_p13 }
  0x5d   :  { %8010 = shalt.err (!%p8007_p3)
}
  0x5e   :  { %s8322_s24 = smov 512   ;;  %s8323_s23 = smov 32  }
  0x5f   :  { %130 = dma.hbm_to_vmem [thread:$0]  %s9753_s9, 16384, %s125_s1, [#allocation16], %s8322_s24, %s8322_s24, %s8323_s23  }
  0x60   :  { %s8011_s28 = scalar_lea.hbm %s9755_s11, 2048 }
  0x61   :  { %p8012_p4 = scmp.ne.s32.totalorder %s9755_s11, %s8011_s28  ;;  %p8015_p5 = scmp.lt.u32.totalorder %s8011_s28, %s9755_s11 }
  0x63   :  { %p8017_p6 = pnand %p8015_p5, %p8012_p4 }
  0x65   :  { %8020 = shalt.err (!%p8017_p6)
}
  0x66   :  { %s8021_s22 = scalar_lea.vmem %s149_s26, 2048  ;;  %p8026_p8 = scmp.lt.s32.totalorder %s149_s26, %s149_s26 }
  0x67   :  { %p8022_p7 = scmp.ne.s32.totalorder %s149_s26, %s8021_s22  ;;  %p8027_p9 = scmp.lt.s32.totalorder %s8021_s22, %s8021_s22 }
  0x69   :  { %p8028_p10 = por %p8027_p9, %p8026_p8 }
  0x6b   :  { %p8029_p11 = pnand %p8028_p10, %p8022_p7 }
  0x6d   :  { %8032 = shalt.err (!%p8029_p11)
}
  0x6e   :  { %154 = dma.hbm_to_vmem [thread:$0]  %s9755_s11, 2048, %s149_s26, [#allocation19], %s8318_s27, %s8318_s27, %s8319_s3  }
  0x6f   :  { %s8324_s7 = smov [#allocation21]   ;;  %s8325_s29 = smov [#allocation24]  }
  0x70   :  { %s170_s25 = sshll.u32 %s8324_s7, 4  ;;  %s195_s21 = sshll.u32 %s8325_s29, 4  ;;  %s171_s25 = int_to_ptr.vmem [resolvable:$true] %s170_s25  ;;  %s196_s21 = int_to_ptr.vmem [resolvable:$true] %s195_s21 }
  0x71   :  { %s8033_s4 = scalar_lea.hbm %s9757_s13, 2048 }
  0x72   :  { %p8034_p12 = scmp.ne.s32.totalorder %s9757_s13, %s8033_s4  ;;  %p8037_p13 = scmp.lt.u32.totalorder %s8033_s4, %s9757_s13 }
  0x74   :  { %p8039_p0 = pnand %p8037_p13, %p8034_p12 }
  0x76   :  { %8042 = shalt.err (!%p8039_p0)
}
  0x77   :  { %s8043_s11 = scalar_lea.vmem %s171_s25, 2048  ;;  %p8048_p2 = scmp.lt.s32.totalorder %s171_s25, %s171_s25 }
  0x78   :  { %p8044_p1 = scmp.ne.s32.totalorder %s171_s25, %s8043_s11  ;;  %p8049_p3 = scmp.lt.s32.totalorder %s8043_s11, %s8043_s11 }
  0x7a   :  { %p8050_p4 = por %p8049_p3, %p8048_p2 }
  0x7c   :  { %p8051_p5 = pnand %p8050_p4, %p8044_p1 }
  0x7e   :  { %8054 = shalt.err (!%p8051_p5)
}
  0x7f   :  { %176 = dma.hbm_to_vmem [thread:$0]  %s9757_s13, 2048, %s171_s25, [#allocation22], %s8318_s27, %s8318_s27, %s8319_s3  }
  0x80   :  { %s8055_s29 = scalar_lea.hbm %s9760_s16, 16 }
  0x81   :  { %p8056_p6 = scmp.ne.s32.totalorder %s9760_s16, %s8055_s29  ;;  %p8059_p7 = scmp.lt.u32.totalorder %s8055_s29, %s9760_s16 }
  0x83   :  { %p8061_p8 = pnand %p8059_p7, %p8056_p6 }
  0x85   :  { %8064 = shalt.err (!%p8061_p8)
}
  0x86   :  { %s8065_s0 = scalar_lea.vmem %s196_s21, 16  ;;  %s8069_s5 = scalar_lea.vmem %s196_s21, 32 }
  0x87   :  { %p8066_p9 = scmp.ne.s32.totalorder %s196_s21, %s8065_s0  ;;  %p8070_p10 = scmp.lt.s32.totalorder %s196_s21, %s196_s21 }
  0x88   :  { %p8071_p11 = scmp.lt.s32.totalorder %s8069_s5, %s8065_s0 }
  0x8a   :  { %p8072_p12 = por %p8071_p11, %p8070_p10 }
  0x8c   :  { %p8073_p13 = pnand %p8072_p12, %p8066_p9 }
  0x8e   :  { %8076 = shalt.err (!%p8073_p13)
}
  0x8f   :  { %198 = dma.hbm_to_vmem [thread:$0]  %s9760_s16, 16, %s196_s21, [#allocation25]  }
  0x90   :  { %s8326_s22 = smov [#allocation27]   ;;  %s8327_s26 = smov [#allocation4]  }
  0x91   :  { %s216_s11 = sshll.u32 %s8326_s22, 4  ;;  %s42_s9 = sshll.u32 %s8327_s26, 4  ;;  %s217_s11 = int_to_ptr.vmem [resolvable:$true] %s216_s11  ;;  %s43_s9 = int_to_ptr.vmem [resolvable:$true] %s42_s9 }
  0x92   :  { %s8077_s29 = scalar_lea.hbm %s9763_s19, 512 }
  0x93   :  { %p8078_p0 = scmp.ne.s32.totalorder %s9763_s19, %s8077_s29  ;;  %p8081_p1 = scmp.lt.u32.totalorder %s8077_s29, %s9763_s19 }
  0x95   :  { %p8083_p2 = pnand %p8081_p1, %p8078_p0 }
  0x97   :  { %8086 = shalt.err (!%p8083_p2)
}
  0x98   :  { %s8087_s16 = scalar_lea.vmem %s217_s11, 512  ;;  %p8092_p4 = scmp.lt.s32.totalorder %s217_s11, %s217_s11 }
  0x99   :  { %p8088_p3 = scmp.ne.s32.totalorder %s217_s11, %s8087_s16  ;;  %p8093_p5 = scmp.lt.s32.totalorder %s8087_s16, %s8087_s16 }
  0x9b   :  { %p8094_p6 = por %p8093_p5, %p8092_p4 }
  0x9d   :  { %p8095_p7 = pnand %p8094_p6, %p8088_p3 }
  0x9f   :  { %8098 = shalt.err (!%p8095_p7)
}
  0xa0   :  { %222 = dma.hbm_to_vmem [thread:$0]  %s9763_s19, 512, %s217_s11, [#allocation28], %s8318_s27, %s8318_s27, %s8319_s3  }
  0xa1   :  { %s9781_s25 = sld [smem:[#allocation40_spill]] }
  0xa7   :  { %s8099_s22 = scalar_lea.hbm %s9781_s25, 49152 }
  0xa8   :  { %p8100_p8 = scmp.ne.s32.totalorder %s9781_s25, %s8099_s22  ;;  %p8103_p9 = scmp.lt.u32.totalorder %s8099_s22, %s9781_s25 }
  0xaa   :  { %p8105_p10 = pnand %p8103_p9, %p8100_p8 }
  0xac   :  { %8108 = shalt.err (!%p8105_p10)
}
  0xad   :  { %s8109_s2 = scalar_lea.vmem %s43_s9, 49152  ;;  %p8114_p12 = scmp.lt.s32.totalorder %s43_s9, %s43_s9 }
  0xae   :  { %p8110_p11 = scmp.ne.s32.totalorder %s43_s9, %s8109_s2  ;;  %p8115_p13 = scmp.lt.s32.totalorder %s8109_s2, %s8109_s2 }
  0xb0   :  { %p8116_p0 = por %p8115_p13, %p8114_p12 }
  0xb2   :  { %p8117_p1 = pnand %p8116_p0, %p8110_p11 }
  0xb4   :  { %8120 = shalt.err (!%p8117_p1)
}
  0xb5   :  { %48 = dma.hbm_to_vmem [thread:$0]  %s9781_s25, 49152, %s43_s9, [#allocation5], %s8322_s24, %s8322_s24, %s8323_s23  }
  0xb6   :  { %s8328_s28 = smov [#allocation8]   ;;  %s8329_s30 = smov [#allocation11]  }
  0xb7   :  { %s64_s4 = sshll.u32 %s8328_s28, 4  ;;  %s88_s16 = sshll.u32 %s8329_s30, 4  ;;  %s65_s4 = int_to_ptr.vmem [resolvable:$true] %s64_s4  ;;  %s89_s16 = int_to_ptr.vmem [resolvable:$true] %s88_s16 }
  0xb8   :  { %s9782_s5 = sld [smem:[#allocation42_spill]] }
  0xbe   :  { %s8121_s13 = scalar_lea.hbm %s9782_s5, 8192 }
  0xbf   :  { %p8122_p2 = scmp.ne.s32.totalorder %s9782_s5, %s8121_s13  ;;  %p8125_p3 = scmp.lt.u32.totalorder %s8121_s13, %s9782_s5 }
  0xc1   :  { %p8127_p4 = pnand %p8125_p3, %p8122_p2 }
  0xc3   :  { %8130 = shalt.err (!%p8127_p4)
}
  0xc4   :  { %s8131_s9 = scalar_lea.vmem %s65_s4, 8192  ;;  %p8136_p6 = scmp.lt.s32.totalorder %s65_s4, %s65_s4 }
  0xc5   :  { %p8132_p5 = scmp.ne.s32.totalorder %s65_s4, %s8131_s9  ;;  %p8137_p7 = scmp.lt.s32.totalorder %s8131_s9, %s8131_s9 }
  0xc7   :  { %p8138_p8 = por %p8137_p7, %p8136_p6 }
  0xc9   :  { %p8139_p9 = pnand %p8138_p8, %p8132_p5 }
  0xcb   :  { %8142 = shalt.err (!%p8139_p9)
}
  0xcc   :  { %70 = dma.hbm_to_vmem [thread:$0]  %s9782_s5, 8192, %s65_s4, [#allocation7], %s8318_s27, %s8318_s27, %s8319_s3  }
  0xcd   :  { %s8143_s11 = scalar_lea.hbm %s9750_s6, 256 }
  0xce   :  { %p8144_p10 = scmp.ne.s32.totalorder %s9750_s6, %s8143_s11  ;;  %p8147_p11 = scmp.lt.u32.totalorder %s8143_s11, %s9750_s6 }
  0xd0   :  { %p8149_p12 = pnand %p8147_p11, %p8144_p10 }
  0xd2   :  { %8152 = shalt.err (!%p8149_p12)
}
  0xd3   :  { %s8153_s13 = scalar_lea.vmem %s89_s16, 256  ;;  %p8158_p0 = scmp.lt.s32.totalorder %s89_s16, %s89_s16 }
  0xd4   :  { %p8154_p13 = scmp.ne.s32.totalorder %s89_s16, %s8153_s13  ;;  %p8159_p1 = scmp.lt.s32.totalorder %s8153_s13, %s8153_s13 }
  0xd6   :  { %p8160_p2 = por %p8159_p1, %p8158_p0 }
  0xd8   :  { %p8161_p3 = pnand %p8160_p2, %p8154_p13 }
  0xda   :  { %8164 = shalt.err (!%p8161_p3)
}
  0xdb   :  { %94 = dma.hbm_to_vmem [thread:$0]  %s9750_s6, 256, %s89_s16, [#allocation10], %s8318_s27, %s8318_s27, %s8319_s3  }
  0xdc   :  { %s8330_s22 = smov [#allocation14]   ;;  %s8331_s1 = smov [#allocation17]  }
  0xdd   :  { %s112_s26 = sshll.u32 %s8330_s22, 4  ;;  %s136_s7 = sshll.u32 %s8331_s1, 4  ;;  %s113_s26 = int_to_ptr.vmem [resolvable:$true] %s112_s26  ;;  %s137_s7 = int_to_ptr.vmem [resolvable:$true] %s136_s7 }
  0xde   :  { %s8165_s29 = scalar_lea.hbm %s9752_s8, 16384 }
  0xdf   :  { %p8166_p4 = scmp.ne.s32.totalorder %s9752_s8, %s8165_s29  ;;  %p8169_p5 = scmp.lt.u32.totalorder %s8165_s29, %s9752_s8 }
  0xe1   :  { %p8171_p6 = pnand %p8169_p5, %p8166_p4 }
  0xe3   :  { %8174 = shalt.err (!%p8171_p6)
}
  0xe4   :  { %s8175_s6 = scalar_lea.vmem %s113_s26, 16384  ;;  %p8180_p8 = scmp.lt.s32.totalorder %s113_s26, %s113_s26 }
  0xe5   :  { %p8176_p7 = scmp.ne.s32.totalorder %s113_s26, %s8175_s6  ;;  %p8181_p9 = scmp.lt.s32.totalorder %s8175_s6, %s8175_s6 }
  0xe7   :  { %p8182_p10 = por %p8181_p9, %p8180_p8 }
  0xe9   :  { %p8183_p11 = pnand %p8182_p10, %p8176_p7 }
  0xeb   :  { %8186 = shalt.err (!%p8183_p11)
}
  0xec   :  { %118 = dma.hbm_to_vmem [thread:$0]  %s9752_s8, 16384, %s113_s26, [#allocation13], %s8322_s24, %s8322_s24, %s8323_s23  }
  0xed   :  { %s8187_s21 = scalar_lea.hbm %s9754_s10, 128 }
  0xee   :  { %p8188_p12 = scmp.ne.s32.totalorder %s9754_s10, %s8187_s21  ;;  %p8191_p13 = scmp.lt.u32.totalorder %s8187_s21, %s9754_s10 }
  0xf0   :  { %p8193_p0 = pnand %p8191_p13, %p8188_p12 }
  0xf2   :  { %8196 = shalt.err (!%p8193_p0)
}
  0xf3   :  { %s8197_s22 = scalar_lea.vmem %s137_s7, 128  ;;  %p8202_p2 = scmp.lt.s32.totalorder %s137_s7, %s137_s7 }
  0xf4   :  { %p8198_p1 = scmp.ne.s32.totalorder %s137_s7, %s8197_s22  ;;  %p8203_p3 = scmp.lt.s32.totalorder %s8197_s22, %s8197_s22 }
  0xf6   :  { %p8204_p4 = por %p8203_p3, %p8202_p2 }
  0xf8   :  { %p8205_p5 = pnand %p8204_p4, %p8198_p1 }
  0xfa   :  { %8208 = shalt.err (!%p8205_p5)
}
  0xfb   :  { %s8332_s8 = smov 64   ;;  %s8333_s24 = smov 4  }
  0xfc   :  { %142 = dma.hbm_to_vmem [thread:$0]  %s9754_s10, 128, %s137_s7, [#allocation16], %s8332_s8, %s8332_s8, %s8333_s24  }
  0xfd   :  { %s8334_s1 = smov [#allocation20]   ;;  %s8335_s25 = smov [#allocation23]  }
  0xfe   :  { %s161_s9 = sshll.u32 %s8334_s1, 4  ;;  %s183_s29 = sshll.u32 %s8335_s25, 4  ;;  %s162_s9 = int_to_ptr.vmem [resolvable:$true] %s161_s9  ;;  %s184_s29 = int_to_ptr.vmem [resolvable:$true] %s183_s29 }
  0xff   :  { %s8209_s11 = scalar_lea.hbm %s9756_s12, 16 }
 0x100   :  { %p8210_p6 = scmp.ne.s32.totalorder %s9756_s12, %s8209_s11  ;;  %p8213_p7 = scmp.lt.u32.totalorder %s8209_s11, %s9756_s12 }
 0x102   :  { %p8215_p8 = pnand %p8213_p7, %p8210_p6 }
 0x104   :  { %8218 = shalt.err (!%p8215_p8)
}
 0x105   :  { %s8219_s10 = scalar_lea.vmem %s162_s9, 16  ;;  %s8223_s7 = scalar_lea.vmem %s162_s9, 32 }
 0x106   :  { %p8220_p9 = scmp.ne.s32.totalorder %s162_s9, %s8219_s10  ;;  %p8224_p10 = scmp.lt.s32.totalorder %s162_s9, %s162_s9 }
 0x107   :  { %p8225_p11 = scmp.lt.s32.totalorder %s8223_s7, %s8219_s10 }
 0x109   :  { %p8226_p12 = por %p8225_p11, %p8224_p10 }
 0x10b   :  { %p8227_p13 = pnand %p8226_p12, %p8220_p9 }
 0x10d   :  { %8230 = shalt.err (!%p8227_p13)
}
 0x10e   :  { %164 = dma.hbm_to_vmem [thread:$0]  %s9756_s12, 16, %s162_s9, [#allocation19]  }
 0x10f   :  { %s8231_s13 = scalar_lea.hbm %s9758_s14, 16 }
 0x110   :  { %p8232_p0 = scmp.ne.s32.totalorder %s9758_s14, %s8231_s13  ;;  %p8235_p1 = scmp.lt.u32.totalorder %s8231_s13, %s9758_s14 }
 0x112   :  { %p8237_p2 = pnand %p8235_p1, %p8232_p0 }
 0x114   :  { %8240 = shalt.err (!%p8237_p2)
}
 0x115   :  { %s8241_s24 = scalar_lea.vmem %s184_s29, 16  ;;  %s8245_s23 = scalar_lea.vmem %s184_s29, 32 }
 0x116   :  { %p8242_p3 = scmp.ne.s32.totalorder %s184_s29, %s8241_s24  ;;  %p8246_p4 = scmp.lt.s32.totalorder %s184_s29, %s184_s29 }
 0x117   :  { %p8247_p5 = scmp.lt.s32.totalorder %s8245_s23, %s8241_s24 }
 0x119   :  { %p8248_p6 = por %p8247_p5, %p8246_p4 }
 0x11b   :  { %p8249_p7 = pnand %p8248_p6, %p8242_p3 }
 0x11d   :  { %8252 = shalt.err (!%p8249_p7)
}
 0x11e   :  { %186 = dma.hbm_to_vmem [thread:$0]  %s9758_s14, 16, %s184_s29, [#allocation22]  }
 0x11f   :  { %s8336_s1 = smov [#allocation26]   ;;  %s8337_s25 = smov [#allocation29]  }
 0x120   :  { %s207_s9 = sshll.u32 %s8336_s1, 4  ;;  %s229_s2 = sshll.u32 %s8337_s25, 4  ;;  %s208_s9 = int_to_ptr.vmem [resolvable:$true] %s207_s9  ;;  %s230_s2 = int_to_ptr.vmem [resolvable:$true] %s229_s2 }
 0x121   :  { %s8253_s28 = scalar_lea.hbm %s9762_s18, 16 }
 0x122   :  { %p8254_p8 = scmp.ne.s32.totalorder %s9762_s18, %s8253_s28  ;;  %p8257_p9 = scmp.lt.u32.totalorder %s8253_s28, %s9762_s18 }
 0x124   :  { %p8259_p10 = pnand %p8257_p9, %p8254_p8 }
 0x126   :  { %8262 = shalt.err (!%p8259_p10)
}
 0x127   :  { %s8263_s14 = scalar_lea.vmem %s208_s9, 16  ;;  %s8267_s29 = scalar_lea.vmem %s208_s9, 32 }
 0x128   :  { %p8264_p11 = scmp.ne.s32.totalorder %s208_s9, %s8263_s14  ;;  %p8268_p12 = scmp.lt.s32.totalorder %s208_s9, %s208_s9 }
 0x129   :  { %p8269_p13 = scmp.lt.s32.totalorder %s8267_s29, %s8263_s14 }
 0x12b   :  { %p8270_p0 = por %p8269_p13, %p8268_p12 }
 0x12d   :  { %p8271_p1 = pnand %p8270_p0, %p8264_p11 }
 0x12f   :  { %8274 = shalt.err (!%p8271_p1)
}
 0x130   :  { %210 = dma.hbm_to_vmem [thread:$0]  %s9762_s18, 16, %s208_s9, [#allocation25]  }
 0x131   :  { %s8275_s0 = scalar_lea.hbm %s9764_s20, 16 }
 0x132   :  { %p8276_p2 = scmp.ne.s32.totalorder %s9764_s20, %s8275_s0  ;;  %p8279_p3 = scmp.lt.u32.totalorder %s8275_s0, %s9764_s20 }
 0x134   :  { %p8281_p4 = pnand %p8279_p3, %p8276_p2 }
 0x136   :  { %8284 = shalt.err (!%p8281_p4)
}
 0x137   :  { %s8285_s8 = scalar_lea.vmem %s230_s2, 16  ;;  %s8289_s24 = scalar_lea.vmem %s230_s2, 32 }
 0x138   :  { %p8286_p5 = scmp.ne.s32.totalorder %s230_s2, %s8285_s8  ;;  %p8290_p6 = scmp.lt.s32.totalorder %s230_s2, %s230_s2 }
 0x139   :  { %p8291_p7 = scmp.lt.s32.totalorder %s8289_s24, %s8285_s8 }
 0x13b   :  { %p8292_p8 = por %p8291_p7, %p8290_p6 }
 0x13d   :  { %p8293_p9 = pnand %p8292_p8, %p8286_p5 }
 0x13f   :  { %8296 = shalt.err (!%p8293_p9)
}
 0x140   :  { %232 = dma.hbm_to_vmem [thread:$0]  %s9764_s20, 16, %s230_s2, [#allocation28]  }
 0x141   :  { %8297 = dma.done.wait [#allocation5], 49152  }
 0x142   :  { %8298 = vsyncadd [#allocation5], 4294918144 }
 0x143   :  { %8299 = dma.done.wait [#allocation7], 8256  }
 0x144   :  { %8300 = vsyncadd [#allocation7], 4294959040 }
 0x145   :  { %8301 = dma.done.wait [#allocation10], 272  }
 0x146   :  { %8302 = vsyncadd [#allocation10], 4294967024 }
 0x147   :  { %8303 = dma.done.wait [#allocation13], 16640  }
 0x148   :  { %8304 = vsyncadd [#allocation13], 4294950656 }
 0x149   :  { %8305 = dma.done.wait [#allocation16], 16512  }
 0x14a   :  { %8306 = vsyncadd [#allocation16], 4294950784 }
 0x14b   :  { %8307 = dma.done.wait [#allocation19], 2064  }
 0x14c   :  { %8308 = vsyncadd [#allocation19], 4294965232 }
 0x14d   :  { %8309 = dma.done.wait [#allocation22], 2064  }
 0x14e   :  { %8310 = vsyncadd [#allocation22], 4294965232 }
 0x14f   :  { %8311 = dma.done.wait [#allocation25], 32  }
 0x150   :  { %8312 = vsyncadd [#allocation25], 4294967264 }
 0x151   :  { %8313 = dma.done.wait [#allocation28], 528  }
 0x152   :  { %8314 = vsyncadd [#allocation28], 4294966768  ;;  %v291_v0 = vld [vmem:[#allocation4 + $0x8] sm:$0xff]  ;;  %v293_v2 = vld [vmem:[#allocation4 + $0x18] sm:$0xff]  ;;  %s9783_s26 = sld [smem:[#allocation39_spill]]  ;;  %s9784_s29 = sld [smem:[#allocation44_spill]] }
 0x153   :  { %v295_v1 = vld [vmem:[#allocation4 + $0x28] sm:$0xff]  ;;  %v297_v4 = vld [vmem:[#allocation4 + $0x38] sm:$0xff]  ;;  %v290_v5 = vld [vmem:[#allocation4] sm:$0xff]  ;;  %vm8340_vm0 = vmmov 0   ;;  %vm5300_vm1 = vcmask 523264   ;;  %vm5386_vm2 = vcmask 261120  }
 0x154   :  { %v5807_v3 = vpack.c.bf16 %v295_v1, %v291_v0  ;;  %v294_v6 = vld [vmem:[#allocation4 + $0x20] sm:$0xff]  ;;  %v5999_v7 = vpack.c.bf16 %v297_v4, %v293_v2  ;;  %v292_v9 = vld [vmem:[#allocation4 + $0x10] sm:$0xff]  ;;  %v299_v11 = vld [vmem:[#allocation4 + $0x48] sm:$0xff]  ;;  %s9785_s0 = sld [smem:[#allocation45_spill]] }
 0x155   :  { %v5809_v8 = vpack.c.bf16 %v294_v6, %v290_v5  ;;  %v296_v10 = vld [vmem:[#allocation4 + $0x30] sm:$0xff]  ;;  %v303_v13 = vld [vmem:[#allocation4 + $0x68] sm:$0xff]  ;;  %v301_v14 = vld [vmem:[#allocation4 + $0x58] sm:$0xff] }
 0x156   :  { %5808 = vmatprep.subr.bf16.mxu0 %v5807_v3  ;;  %v6001_v12 = vpack.c.bf16 %v296_v10, %v292_v9  ;;  %v305_v15 = vld [vmem:[#allocation4 + $0x78] sm:$0xff]  ;;  %6000 = vmatprep.subr.bf16.mxu1 %v5999_v7  ;;  %v5811_v16 = vpack.c.bf16 %v303_v13, %v299_v11  ;;  %v298_v18 = vld [vmem:[#allocation4 + $0x40] sm:$0xff]  ;;  %v300_v20 = vld [vmem:[#allocation4 + $0x50] sm:$0xff] }
 0x157   :  { %5810 = vmatpush1.bf16.msra.mxu0 %v5809_v8  ;;  %v6003_v17 = vpack.c.bf16 %v305_v15, %v301_v14  ;;  %v302_v19 = vld [vmem:[#allocation4 + $0x60] sm:$0xff]  ;;  %v304_v22 = vld [vmem:[#allocation4 + $0x70] sm:$0xff]  ;;  %v307_v23 = vld [vmem:[#allocation4 + $0x88] sm:$0xff] }
 0x158   :  { %6002 = vmatpush1.bf16.msra.mxu1 %v6001_v12  ;;  %v5813_v21 = vpack.c.bf16 %v302_v19, %v298_v18  ;;  %v311_v24 = vld [vmem:[#allocation4 + $0xa8] sm:$0xff]  ;;  %5812 = vmatprep.subr.bf16.mxu0 %v5811_v16  ;;  %v6005_v25 = vpack.c.bf16 %v304_v22, %v300_v20  ;;  %v309_v27 = vld [vmem:[#allocation4 + $0x98] sm:$0xff]  ;;  %v306_v29 = vld [vmem:[#allocation4 + $0x80] sm:$0xff] }
 0x159   :  { %6004 = vmatprep.subr.bf16.mxu1 %v6003_v17  ;;  %v5815_v26 = vpack.c.bf16 %v311_v24, %v307_v23  ;;  %v313_v28 = vld [vmem:[#allocation4 + $0xb8] sm:$0xff]  ;;  %v310_v31 = vld [vmem:[#allocation4 + $0xa0] sm:$0xff]  ;;  %v308_v32 = vld [vmem:[#allocation4 + $0x90] sm:$0xff] }
 0x15a   :  { %v6007_v30 = vpack.c.bf16 %v313_v28, %v309_v27  ;;  %v312_v33 = vld [vmem:[#allocation4 + $0xb0] sm:$0xff]  ;;  %v5817_v34 = vpack.c.bf16 %v310_v31, %v306_v29  ;;  %v315_v35 = vld [vmem:[#allocation4 + $0xc8] sm:$0xff]  ;;  %v317_v37 = vld [vmem:[#allocation4 + $0xd8] sm:$0xff] }
 0x15b   :  { %5814 = vmatpush1.bf16.msra.mxu0 %v5813_v21  ;;  %v319_v36 = vld [vmem:[#allocation4 + $0xe8] sm:$0xff]  ;;  %v6009_v38 = vpack.c.bf16 %v312_v33, %v308_v32  ;;  %v321_v40 = vld [vmem:[#allocation4 + $0xf8] sm:$0xff]  ;;  %v314_v41 = vld [vmem:[#allocation4 + $0xc0] sm:$0xff] }
 0x15c   :  { %6006 = vmatpush1.bf16.msra.mxu1 %v6005_v25  ;;  %5816 = vmatprep.subr.bf16.mxu0 %v5815_v26  ;;  %v5819_v39 = vpack.c.bf16 %v319_v36, %v315_v35  ;;  %v318_v42 = vld [vmem:[#allocation4 + $0xe0] sm:$0xff]  ;;  %v6011_v43 = vpack.c.bf16 %v321_v40, %v317_v37  ;;  %v316_v44 = vld [vmem:[#allocation4 + $0xd0] sm:$0xff]  ;;  %v323_v46 = vld [vmem:[#allocation4 + $0x108] sm:$0xff] }
 0x15d   :  { %6008 = vmatprep.subr.bf16.mxu1 %v6007_v30  ;;  %v320_v45 = vld [vmem:[#allocation4 + $0xf0] sm:$0xff]  ;;  %v327_v47 = vld [vmem:[#allocation4 + $0x128] sm:$0xff]  ;;  %v325_v48 = vld [vmem:[#allocation4 + $0x118] sm:$0xff]  ;;  %v5821_v50 = vpack.c.bf16 %v318_v42, %v314_v41 }
 0x15e   :  { %v329_v49 = vld [vmem:[#allocation4 + $0x138] sm:$0xff]  ;;  %v6013_v51 = vpack.c.bf16 %v320_v45, %v316_v44  ;;  %v5823_v52 = vpack.c.bf16 %v327_v47, %v323_v46  ;;  %v322_v53 = vld [vmem:[#allocation4 + $0x100] sm:$0xff]  ;;  %v324_v55 = vld [vmem:[#allocation4 + $0x110] sm:$0xff] }
 0x15f   :  { %5818 = vmatpush1.bf16.msra.mxu0 %v5817_v34  ;;  %v326_v54 = vld [vmem:[#allocation4 + $0x120] sm:$0xff]  ;;  %v6015_v56 = vpack.c.bf16 %v329_v49, %v325_v48  ;;  %v328_v57 = vld [vmem:[#allocation4 + $0x130] sm:$0xff]  ;;  %v331_v58 = vld [vmem:[#allocation4 + $0x148] sm:$0xff] }
 0x160   :  { %6010 = vmatpush1.bf16.msra.mxu1 %v6009_v38  ;;  %5820 = vmatprep.subr.bf16.mxu0 %v5819_v39  ;;  %v335_v59 = vld [vmem:[#allocation4 + $0x168] sm:$0xff]  ;;  %v333_v60 = vld [vmem:[#allocation4 + $0x158] sm:$0xff]  ;;  %v5825_v62 = vpack.c.bf16 %v326_v54, %v322_v53  ;;  %v6017_v63 = vpack.c.bf16 %v328_v57, %v324_v55  ;;  %v330_v1 = vld [vmem:[#allocation4 + $0x140] sm:$0xff] }
 0x161   :  { %6012 = vmatprep.subr.bf16.mxu1 %v6011_v43  ;;  %v337_v61 = vld [vmem:[#allocation4 + $0x178] sm:$0xff]  ;;  %v5827_v0 = vpack.c.bf16 %v335_v59, %v331_v58  ;;  %v334_v2 = vld [vmem:[#allocation4 + $0x160] sm:$0xff]  ;;  %v332_v3 = vld [vmem:[#allocation4 + $0x150] sm:$0xff] }
 0x162   :  { %v6019_v4 = vpack.c.bf16 %v337_v61, %v333_v60  ;;  %v336_v5 = vld [vmem:[#allocation4 + $0x170] sm:$0xff]  ;;  %v339_v6 = vld [vmem:[#allocation4 + $0x188] sm:$0xff]  ;;  %v341_v8 = vld [vmem:[#allocation4 + $0x198] sm:$0xff]  ;;  %v5829_v10 = vpack.c.bf16 %v334_v2, %v330_v1 }
 0x163   :  { %5822 = vmatpush1.bf16.msra.mxu0 %v5821_v50  ;;  %v343_v7 = vld [vmem:[#allocation4 + $0x1a8] sm:$0xff]  ;;  %v345_v9 = vld [vmem:[#allocation4 + $0x1b8] sm:$0xff]  ;;  %v6021_v11 = vpack.c.bf16 %v336_v5, %v332_v3  ;;  %v338_v13 = vld [vmem:[#allocation4 + $0x180] sm:$0xff] }
 0x164   :  { %6014 = vmatpush1.bf16.msra.mxu1 %v6013_v51  ;;  %5824 = vmatprep.subr.bf16.mxu0 %v5823_v52  ;;  %v5831_v12 = vpack.c.bf16 %v343_v7, %v339_v6  ;;  %v342_v14 = vld [vmem:[#allocation4 + $0x1a0] sm:$0xff]  ;;  %v340_v15 = vld [vmem:[#allocation4 + $0x190] sm:$0xff]  ;;  %v6023_v16 = vpack.c.bf16 %v345_v9, %v341_v8  ;;  %v347_v18 = vld [vmem:[#allocation4 + $0x1c8] sm:$0xff] }
 0x165   :  { %6016 = vmatprep.subr.bf16.mxu1 %v6015_v56  ;;  %v344_v17 = vld [vmem:[#allocation4 + $0x1b0] sm:$0xff]  ;;  %v351_v19 = vld [vmem:[#allocation4 + $0x1e8] sm:$0xff]  ;;  %v349_v20 = vld [vmem:[#allocation4 + $0x1d8] sm:$0xff]  ;;  %v5833_v22 = vpack.c.bf16 %v342_v14, %v338_v13 }
 0x166   :  { %v353_v21 = vld [vmem:[#allocation4 + $0x1f8] sm:$0xff]  ;;  %v6025_v23 = vpack.c.bf16 %v344_v17, %v340_v15  ;;  %v5835_v24 = vpack.c.bf16 %v351_v19, %v347_v18  ;;  %v346_v25 = vld [vmem:[#allocation4 + $0x1c0] sm:$0xff]  ;;  %v348_v27 = vld [vmem:[#allocation4 + $0x1d0] sm:$0xff] }
 0x167   :  { %5826 = vmatpush1.bf16.msra.mxu0 %v5825_v62  ;;  %v350_v26 = vld [vmem:[#allocation4 + $0x1e0] sm:$0xff]  ;;  %v6027_v28 = vpack.c.bf16 %v353_v21, %v349_v20  ;;  %v352_v29 = vld [vmem:[#allocation4 + $0x1f0] sm:$0xff]  ;;  %v355_v30 = vld [vmem:[#allocation4 + $0x208] sm:$0xff] }
 0x168   :  { %6018 = vmatpush1.bf16.msra.mxu1 %v6017_v63  ;;  %5828 = vmatprep.subr.bf16.mxu0 %v5827_v0  ;;  %v359_v31 = vld [vmem:[#allocation4 + $0x228] sm:$0xff]  ;;  %v357_v32 = vld [vmem:[#allocation4 + $0x218] sm:$0xff]  ;;  %v5837_v34 = vpack.c.bf16 %v350_v26, %v346_v25  ;;  %v6029_v35 = vpack.c.bf16 %v352_v29, %v348_v27  ;;  %v354_v37 = vld [vmem:[#allocation4 + $0x200] sm:$0xff] }
 0x169   :  { %6020 = vmatprep.subr.bf16.mxu1 %v6019_v4  ;;  %v361_v33 = vld [vmem:[#allocation4 + $0x238] sm:$0xff]  ;;  %v5839_v36 = vpack.c.bf16 %v359_v31, %v355_v30  ;;  %v358_v38 = vld [vmem:[#allocation4 + $0x220] sm:$0xff]  ;;  %v356_v39 = vld [vmem:[#allocation4 + $0x210] sm:$0xff] }
 0x16a   :  { %v6031_v40 = vpack.c.bf16 %v361_v33, %v357_v32  ;;  %v360_v41 = vld [vmem:[#allocation4 + $0x230] sm:$0xff]  ;;  %v363_v42 = vld [vmem:[#allocation4 + $0x248] sm:$0xff]  ;;  %v365_v44 = vld [vmem:[#allocation4 + $0x258] sm:$0xff]  ;;  %v5841_v46 = vpack.c.bf16 %v358_v38, %v354_v37 }
 0x16b   :  { %5830 = vmatpush1.bf16.msra.mxu0 %v5829_v10  ;;  %v367_v43 = vld [vmem:[#allocation4 + $0x268] sm:$0xff]  ;;  %v369_v45 = vld [vmem:[#allocation4 + $0x278] sm:$0xff]  ;;  %v6033_v47 = vpack.c.bf16 %v360_v41, %v356_v39  ;;  %v362_v49 = vld [vmem:[#allocation4 + $0x240] sm:$0xff] }
 0x16c   :  { %6022 = vmatpush1.bf16.msra.mxu1 %v6021_v11  ;;  %5832 = vmatprep.subr.bf16.mxu0 %v5831_v12  ;;  %v5843_v48 = vpack.c.bf16 %v367_v43, %v363_v42  ;;  %v366_v50 = vld [vmem:[#allocation4 + $0x260] sm:$0xff]  ;;  %v364_v51 = vld [vmem:[#allocation4 + $0x250] sm:$0xff]  ;;  %v6035_v52 = vpack.c.bf16 %v369_v45, %v365_v44  ;;  %v371_v54 = vld [vmem:[#allocation4 + $0x288] sm:$0xff] }
 0x16d   :  { %6024 = vmatprep.subr.bf16.mxu1 %v6023_v16  ;;  %v368_v53 = vld [vmem:[#allocation4 + $0x270] sm:$0xff]  ;;  %v375_v55 = vld [vmem:[#allocation4 + $0x2a8] sm:$0xff]  ;;  %v373_v56 = vld [vmem:[#allocation4 + $0x298] sm:$0xff]  ;;  %v5845_v58 = vpack.c.bf16 %v366_v50, %v362_v49 }
 0x16e   :  { %v377_v57 = vld [vmem:[#allocation4 + $0x2b8] sm:$0xff]  ;;  %v6037_v59 = vpack.c.bf16 %v368_v53, %v364_v51  ;;  %v5847_v60 = vpack.c.bf16 %v375_v55, %v371_v54  ;;  %v370_v61 = vld [vmem:[#allocation4 + $0x280] sm:$0xff]  ;;  %v372_v63 = vld [vmem:[#allocation4 + $0x290] sm:$0xff] }
 0x16f   :  { %5834 = vmatpush1.bf16.msra.mxu0 %v5833_v22  ;;  %v374_v62 = vld [vmem:[#allocation4 + $0x2a0] sm:$0xff]  ;;  %v6039_v0 = vpack.c.bf16 %v377_v57, %v373_v56  ;;  %v376_v1 = vld [vmem:[#allocation4 + $0x2b0] sm:$0xff]  ;;  %v379_v2 = vld [vmem:[#allocation4 + $0x2c8] sm:$0xff] }
 0x170   :  { %6026 = vmatpush1.bf16.msra.mxu1 %v6025_v23  ;;  %5836 = vmatprep.subr.bf16.mxu0 %v5835_v24  ;;  %v383_v3 = vld [vmem:[#allocation4 + $0x2e8] sm:$0xff]  ;;  %v381_v4 = vld [vmem:[#allocation4 + $0x2d8] sm:$0xff]  ;;  %v5849_v6 = vpack.c.bf16 %v374_v62, %v370_v61  ;;  %v378_v7 = vld [vmem:[#allocation4 + $0x2c0] sm:$0xff]  ;;  %v6041_v8 = vpack.c.bf16 %v376_v1, %v372_v63 }
 0x171   :  { %6028 = vmatprep.subr.bf16.mxu1 %v6027_v28  ;;  %v385_v5 = vld [vmem:[#allocation4 + $0x2f8] sm:$0xff]  ;;  %v5851_v9 = vpack.c.bf16 %v383_v3, %v379_v2  ;;  %v382_v10 = vld [vmem:[#allocation4 + $0x2e0] sm:$0xff]  ;;  %v380_v11 = vld [vmem:[#allocation4 + $0x2d0] sm:$0xff] }
 0x172   :  { %v384_v12 = vld [vmem:[#allocation4 + $0x2f0] sm:$0xff]  ;;  %v6043_v13 = vpack.c.bf16 %v385_v5, %v381_v4  ;;  %v387_v14 = vld [vmem:[#allocation4 + $0x308] sm:$0xff]  ;;  %v389_v17 = vld [vmem:[#allocation4 + $0x318] sm:$0xff]  ;;  %v5853_v19 = vpack.c.bf16 %v382_v10, %v378_v7 }
 0x173   :  { %5838 = vmatpush1.bf16.msra.mxu0 %v5837_v34  ;;  %v391_v15 = vld [vmem:[#allocation4 + $0x328] sm:$0xff]  ;;  %v393_v18 = vld [vmem:[#allocation4 + $0x338] sm:$0xff]  ;;  %v6045_v20 = vpack.c.bf16 %v384_v12, %v380_v11  ;;  %v386_v22 = vld [vmem:[#allocation4 + $0x300] sm:$0xff] }
 0x174   :  { %6030 = vmatpush1.bf16.msra.mxu1 %v6029_v35  ;;  %5840 = vmatprep.subr.bf16.mxu0 %v5839_v36  ;;  %v285_v16 = vld [vmem:[%s9783_s26 + $0x8] sm:$0xff]  ;;  %v5855_v21 = vpack.c.bf16 %v391_v15, %v387_v14  ;;  %v390_v23 = vld [vmem:[#allocation4 + $0x320] sm:$0xff]  ;;  %v388_v24 = vld [vmem:[#allocation4 + $0x310] sm:$0xff]  ;;  %v6047_v25 = vpack.c.bf16 %v393_v18, %v389_v17 }
 0x175   :  { %6032 = vmatprep.subr.bf16.mxu1 %v6031_v40  ;;  %760 = vmatprep.mubr.f32.mxu0 %v285_v16  ;;  %v392_v26 = vld [vmem:[#allocation4 + $0x330] sm:$0xff]  ;;  %v395_v27 = vld [vmem:[#allocation4 + $0x348] sm:$0xff]  ;;  %v397_v29 = vld [vmem:[#allocation4 + $0x358] sm:$0xff]  ;;  %v5857_v31 = vpack.c.bf16 %v390_v23, %v386_v22 }
 0x176   :  { %973 = vmatprep.mubr.f32.mxu1 %v285_v16  ;;  %v399_v28 = vld [vmem:[#allocation4 + $0x368] sm:$0xff]  ;;  %v401_v30 = vld [vmem:[#allocation4 + $0x378] sm:$0xff]  ;;  %v6049_v32 = vpack.c.bf16 %v392_v26, %v388_v24  ;;  %v394_v34 = vld [vmem:[#allocation4 + $0x340] sm:$0xff] }
 0x177   :  { %5842 = vmatpush1.bf16.msra.mxu0 %v5841_v46  ;;  %v5859_v33 = vpack.c.bf16 %v399_v28, %v395_v27  ;;  %v398_v35 = vld [vmem:[#allocation4 + $0x360] sm:$0xff]  ;;  %v396_v36 = vld [vmem:[#allocation4 + $0x350] sm:$0xff]  ;;  %v6051_v37 = vpack.c.bf16 %v401_v30, %v397_v29  ;;  %v403_v39 = vld [vmem:[#allocation4 + $0x388] sm:$0xff] }
 0x178   :  { %6034 = vmatpush1.bf16.msra.mxu1 %v6033_v47  ;;  %5844 = vmatprep.subr.bf16.mxu0 %v5843_v48  ;;  %v400_v38 = vld [vmem:[#allocation4 + $0x370] sm:$0xff]  ;;  %v407_v40 = vld [vmem:[#allocation4 + $0x3a8] sm:$0xff]  ;;  %v405_v41 = vld [vmem:[#allocation4 + $0x398] sm:$0xff]  ;;  %v5861_v43 = vpack.c.bf16 %v398_v35, %v394_v34 }
 0x179   :  { %6036 = vmatprep.subr.bf16.mxu1 %v6035_v52  ;;  %v409_v42 = vld [vmem:[#allocation4 + $0x3b8] sm:$0xff]  ;;  %v6053_v44 = vpack.c.bf16 %v400_v38, %v396_v36  ;;  %v5863_v45 = vpack.c.bf16 %v407_v40, %v403_v39  ;;  %v402_v46 = vld [vmem:[#allocation4 + $0x380] sm:$0xff]  ;;  %v404_v48 = vld [vmem:[#allocation4 + $0x390] sm:$0xff] }
 0x17a   :  { %v406_v47 = vld [vmem:[#allocation4 + $0x3a0] sm:$0xff]  ;;  %v6055_v49 = vpack.c.bf16 %v409_v42, %v405_v41  ;;  %v408_v50 = vld [vmem:[#allocation4 + $0x3b0] sm:$0xff]  ;;  %v411_v51 = vld [vmem:[#allocation4 + $0x3c8] sm:$0xff] }
 0x17b   :  { %5846 = vmatpush1.bf16.msra.mxu0 %v5845_v58  ;;  %v415_v52 = vld [vmem:[#allocation4 + $0x3e8] sm:$0xff]  ;;  %v413_v53 = vld [vmem:[#allocation4 + $0x3d8] sm:$0xff]  ;;  %v5865_v55 = vpack.c.bf16 %v406_v47, %v402_v46  ;;  %v6057_v56 = vpack.c.bf16 %v408_v50, %v404_v48  ;;  %v410_v58 = vld [vmem:[#allocation4 + $0x3c0] sm:$0xff] }
 0x17c   :  { %6038 = vmatpush1.bf16.msra.mxu1 %v6037_v59  ;;  %5848 = vmatprep.subr.bf16.mxu0 %v5847_v60  ;;  %v417_v54 = vld [vmem:[#allocation4 + $0x3f8] sm:$0xff]  ;;  %v5867_v57 = vpack.c.bf16 %v415_v52, %v411_v51  ;;  %v414_v59 = vld [vmem:[#allocation4 + $0x3e0] sm:$0xff]  ;;  %v412_v60 = vld [vmem:[#allocation4 + $0x3d0] sm:$0xff] }
 0x17d   :  { %6040 = vmatprep.subr.bf16.mxu1 %v6039_v0  ;;  %v6059_v61 = vpack.c.bf16 %v417_v54, %v413_v53  ;;  %v416_v62 = vld [vmem:[#allocation4 + $0x3f0] sm:$0xff]  ;;  %v419_v63 = vld [vmem:[#allocation4 + $0x408] sm:$0xff]  ;;  %v421_v1 = vld [vmem:[#allocation4 + $0x418] sm:$0xff]  ;;  %v5869_v3 = vpack.c.bf16 %v414_v59, %v410_v58 }
 0x17e   :  { %v423_v0 = vld [vmem:[#allocation4 + $0x428] sm:$0xff]  ;;  %v425_v2 = vld [vmem:[#allocation4 + $0x438] sm:$0xff]  ;;  %v6061_v4 = vpack.c.bf16 %v416_v62, %v412_v60  ;;  %v422_v7 = vld [vmem:[#allocation4 + $0x420] sm:$0xff] }
 0x17f   :  { %5850 = vmatpush1.bf16.msra.mxu0 %v5849_v6  ;;  %v5871_v5 = vpack.c.bf16 %v423_v0, %v419_v63  ;;  %v418_v6 = vld [vmem:[#allocation4 + $0x400] sm:$0xff]  ;;  %v424_v10 = vld [vmem:[#allocation4 + $0x430] sm:$0xff]  ;;  %v427_v11 = vld [vmem:[#allocation4 + $0x448] sm:$0xff] }
 0x180   :  { %6042 = vmatpush1.bf16.msra.mxu1 %v6041_v8  ;;  %5852 = vmatprep.subr.bf16.mxu0 %v5851_v9  ;;  %v420_v8 = vld [vmem:[#allocation4 + $0x410] sm:$0xff]  ;;  %v6063_v9 = vpack.c.bf16 %v425_v2, %v421_v1  ;;  %v431_v12 = vld [vmem:[#allocation4 + $0x468] sm:$0xff]  ;;  %v433_v14 = vld [vmem:[#allocation4 + $0x478] sm:$0xff]  ;;  %v5873_v16 = vpack.c.bf16 %v422_v7, %v418_v6 }
 0x181   :  { %6044 = vmatprep.subr.bf16.mxu1 %v6043_v13  ;;  %v429_v13 = vld [vmem:[#allocation4 + $0x458] sm:$0xff]  ;;  %v284_v15 = vld [vmem:[%s9783_s26] sm:$0xff]  ;;  %v6065_v17 = vpack.c.bf16 %v424_v10, %v420_v8  ;;  %v5875_v18 = vpack.c.bf16 %v431_v12, %v427_v11  ;;  %v432_v23 = vld [vmem:[#allocation4 + $0x470] sm:$0xff] }
 0x182   :  { %v6067_v22 = vpack.c.bf16 %v433_v14, %v429_v13  ;;  %v435_v24 = vld [vmem:[#allocation4 + $0x488] sm:$0xff]  ;;  %v437_v26 = vld [vmem:[#allocation4 + $0x498] sm:$0xff]  ;;  %v440_v35 = vld [vmem:[#allocation4 + $0x4b0] sm:$0xff] }
 0x183   :  { %5854 = vmatpush1.bf16.msra.mxu0 %v5853_v19  ;;  %v426_v19 = vld [vmem:[#allocation4 + $0x440] sm:$0xff]  ;;  %v441_v27 = vld [vmem:[#allocation4 + $0x4b8] sm:$0xff]  ;;  %v443_v36 = vld [vmem:[#allocation4 + $0x4c8] sm:$0xff] }
 0x184   :  { %6046 = vmatpush1.bf16.msra.mxu1 %v6045_v20  ;;  %5856 = vmatprep.subr.bf16.mxu0 %v5855_v21  ;;  %v430_v20 = vld [vmem:[#allocation4 + $0x460] sm:$0xff]  ;;  %v428_v21 = vld [vmem:[#allocation4 + $0x450] sm:$0xff]  ;;  %v6071_v34 = vpack.c.bf16 %v441_v27, %v437_v26  ;;  %v445_v38 = vld [vmem:[#allocation4 + $0x4d8] sm:$0xff] }
 0x185   :  { %6048 = vmatprep.subr.bf16.mxu1 %v6047_v25  ;;  %v439_v25 = vld [vmem:[#allocation4 + $0x4a8] sm:$0xff]  ;;  %v5877_v28 = vpack.c.bf16 %v430_v20, %v426_v19  ;;  %v6069_v29 = vpack.c.bf16 %v432_v23, %v428_v21  ;;  %v449_v39 = vld [vmem:[#allocation4 + $0x4f8] sm:$0xff]  ;;  %v448_v47 = vld [vmem:[#allocation4 + $0x4f0] sm:$0xff] }
 0x186   :  { %v5879_v30 = vpack.c.bf16 %v439_v25, %v435_v24  ;;  %v6075_v46 = vpack.c.bf16 %v449_v39, %v445_v38  ;;  %v451_v48 = vld [vmem:[#allocation4 + $0x508] sm:$0xff]  ;;  %v453_v50 = vld [vmem:[#allocation4 + $0x518] sm:$0xff]  ;;  %v456_v59 = vld [vmem:[#allocation4 + $0x530] sm:$0xff] }
 0x187   :  { %5858 = vmatpush1.bf16.msra.mxu0 %v5857_v31  ;;  %v434_v31 = vld [vmem:[#allocation4 + $0x480] sm:$0xff]  ;;  %v457_v51 = vld [vmem:[#allocation4 + $0x538] sm:$0xff]  ;;  %v459_v60 = vld [vmem:[#allocation4 + $0x548] sm:$0xff] }
 0x188   :  { %6050 = vmatpush1.bf16.msra.mxu1 %v6049_v32  ;;  %5860 = vmatprep.subr.bf16.mxu0 %v5859_v33  ;;  %v438_v32 = vld [vmem:[#allocation4 + $0x4a0] sm:$0xff]  ;;  %v436_v33 = vld [vmem:[#allocation4 + $0x490] sm:$0xff]  ;;  %v6079_v58 = vpack.c.bf16 %v457_v51, %v453_v50  ;;  %v461_v62 = vld [vmem:[#allocation4 + $0x558] sm:$0xff] }
 0x189   :  { %6052 = vmatprep.subr.bf16.mxu1 %v6051_v37  ;;  %v447_v37 = vld [vmem:[#allocation4 + $0x4e8] sm:$0xff]  ;;  %v5881_v40 = vpack.c.bf16 %v438_v32, %v434_v31  ;;  %v6073_v41 = vpack.c.bf16 %v440_v35, %v436_v33  ;;  %v465_v63 = vld [vmem:[#allocation4 + $0x578] sm:$0xff]  ;;  %v464_v7 = vld [vmem:[#allocation4 + $0x570] sm:$0xff] }
 0x18a   :  { %v5883_v42 = vpack.c.bf16 %v447_v37, %v443_v36  ;;  %v6083_v6 = vpack.c.bf16 %v465_v63, %v461_v62  ;;  %v467_v8 = vld [vmem:[#allocation4 + $0x588] sm:$0xff]  ;;  %v469_v10 = vld [vmem:[#allocation4 + $0x598] sm:$0xff]  ;;  %v466_v13 = vld [vmem:[#allocation4 + $0x580] sm:$0xff] }
 0x18b   :  { %5862 = vmatpush1.bf16.msra.mxu0 %v5861_v43  ;;  %v442_v43 = vld [vmem:[#allocation4 + $0x4c0] sm:$0xff]  ;;  %v473_v11 = vld [vmem:[#allocation4 + $0x5b8] sm:$0xff]  ;;  %v475_v20 = vld [vmem:[#allocation4 + $0x5c8] sm:$0xff] }
 0x18c   :  { %6054 = vmatpush1.bf16.msra.mxu1 %v6053_v44  ;;  %5864 = vmatprep.subr.bf16.mxu0 %v5863_v45  ;;  %v446_v44 = vld [vmem:[#allocation4 + $0x4e0] sm:$0xff]  ;;  %v444_v45 = vld [vmem:[#allocation4 + $0x4d0] sm:$0xff]  ;;  %v6087_v19 = vpack.c.bf16 %v473_v11, %v469_v10  ;;  %v479_v21 = vld [vmem:[#allocation4 + $0x5e8] sm:$0xff] }
 0x18d   :  { %6056 = vmatprep.subr.bf16.mxu1 %v6055_v49  ;;  %v455_v49 = vld [vmem:[#allocation4 + $0x528] sm:$0xff]  ;;  %v5885_v52 = vpack.c.bf16 %v446_v44, %v442_v43  ;;  %v6077_v53 = vpack.c.bf16 %v448_v47, %v444_v45  ;;  %v477_v23 = vld [vmem:[#allocation4 + $0x5d8] sm:$0xff]  ;;  %v5899_v27 = vpack.c.bf16 %v479_v21, %v475_v20  ;;  %v480_v32 = vld [vmem:[#allocation4 + $0x5f0] sm:$0xff] }
 0x18e   :  { %v5887_v54 = vpack.c.bf16 %v455_v49, %v451_v48  ;;  %v481_v24 = vld [vmem:[#allocation4 + $0x5f8] sm:$0xff]  ;;  %v483_v33 = vld [vmem:[#allocation4 + $0x608] sm:$0xff]  ;;  %v488_v44 = vld [vmem:[#allocation4 + $0x630] sm:$0xff] }
 0x18f   :  { %5866 = vmatpush1.bf16.msra.mxu0 %v5865_v55  ;;  %v450_v55 = vld [vmem:[#allocation4 + $0x500] sm:$0xff]  ;;  %v6091_v31 = vpack.c.bf16 %v481_v24, %v477_v23  ;;  %v485_v35 = vld [vmem:[#allocation4 + $0x618] sm:$0xff]  ;;  %v491_v45 = vld [vmem:[#allocation4 + $0x648] sm:$0xff] }
 0x190   :  { %6058 = vmatpush1.bf16.msra.mxu1 %v6057_v56  ;;  %5868 = vmatprep.subr.bf16.mxu0 %v5867_v57  ;;  %v454_v56 = vld [vmem:[#allocation4 + $0x520] sm:$0xff]  ;;  %v452_v57 = vld [vmem:[#allocation4 + $0x510] sm:$0xff]  ;;  %v489_v36 = vld [vmem:[#allocation4 + $0x638] sm:$0xff] }
 0x191   :  { %6060 = vmatprep.subr.bf16.mxu1 %v6059_v61  ;;  %v463_v61 = vld [vmem:[#allocation4 + $0x568] sm:$0xff]  ;;  %v5889_v0 = vpack.c.bf16 %v454_v56, %v450_v55  ;;  %v6081_v1 = vpack.c.bf16 %v456_v59, %v452_v57  ;;  %v6095_v43 = vpack.c.bf16 %v489_v36, %v485_v35  ;;  %v493_v47 = vld [vmem:[#allocation4 + $0x658] sm:$0xff]  ;;  %v496_v56 = vld [vmem:[#allocation4 + $0x670] sm:$0xff] }
 0x192   :  { %v5891_v2 = vpack.c.bf16 %v463_v61, %v459_v60  ;;  %v497_v48 = vld [vmem:[#allocation4 + $0x678] sm:$0xff]  ;;  %v499_v57 = vld [vmem:[#allocation4 + $0x688] sm:$0xff]  ;;  %v514_v24 = vld [vmem:[#allocation4 + $0x700] sm:$0xff] }
 0x193   :  { %5870 = vmatpush1.bf16.msra.mxu0 %v5869_v3  ;;  %v458_v3 = vld [vmem:[#allocation4 + $0x540] sm:$0xff]  ;;  %v6099_v55 = vpack.c.bf16 %v497_v48, %v493_v47  ;;  %v501_v59 = vld [vmem:[#allocation4 + $0x698] sm:$0xff] }
 0x194   :  { %6062 = vmatpush1.bf16.msra.mxu1 %v6061_v4  ;;  %5872 = vmatprep.subr.bf16.mxu0 %v5871_v5  ;;  %v462_v4 = vld [vmem:[#allocation4 + $0x560] sm:$0xff]  ;;  %v460_v5 = vld [vmem:[#allocation4 + $0x550] sm:$0xff]  ;;  %v505_v60 = vld [vmem:[#allocation4 + $0x6b8] sm:$0xff] }
 0x195   :  { %6064 = vmatprep.subr.bf16.mxu1 %v6063_v9  ;;  %v471_v9 = vld [vmem:[#allocation4 + $0x5a8] sm:$0xff]  ;;  %v5893_v12 = vpack.c.bf16 %v462_v4, %v458_v3  ;;  %v6085_v14 = vpack.c.bf16 %v464_v7, %v460_v5  ;;  %v6103_v3 = vpack.c.bf16 %v505_v60, %v501_v59  ;;  %v504_v4 = vld [vmem:[#allocation4 + $0x6b0] sm:$0xff]  ;;  %v509_v7 = vld [vmem:[#allocation4 + $0x6d8] sm:$0xff] }
 0x196   :  { %761 = vmatmul.mubr.f32.vlgmr.msra.gmra.mrb[0].mxu0 %v284_v15  ;;  %v507_v5 = vld [vmem:[#allocation4 + $0x6c8] sm:$0xff]  ;;  %v521_v20 = vld [vmem:[#allocation4 + $0x738] sm:$0xff]  ;;  %v522_v36 = vld [vmem:[#allocation4 + $0x740] sm:$0xff] }
 0x197   :  { %5874 = vmatpush1.bf16.msra.mxu0 %v5873_v16  ;;  %974 = vmatmul.mubr.f32.vlgmr.msra.gmra.mrb[0].mxu1 %v284_v15  ;;  %v5895_v15 = vpack.c.bf16 %v471_v9, %v467_v8  ;;  %v470_v16 = vld [vmem:[#allocation4 + $0x5a0] sm:$0xff]  ;;  %v513_v8 = vld [vmem:[#allocation4 + $0x6f8] sm:$0xff] }
 0x198   :  { %6066 = vmatpush1.bf16.msra.mxu1 %v6065_v17  ;;  %5876 = vmatprep.subr.bf16.mxu0 %v5875_v18  ;;  %v468_v17 = vld [vmem:[#allocation4 + $0x590] sm:$0xff]  ;;  %v5897_v25 = vpack.c.bf16 %v470_v16, %v466_v13  ;;  %v510_v13 = vld [vmem:[#allocation4 + $0x6e0] sm:$0xff] }
 0x199   :  { %6068 = vmatprep.subr.bf16.mxu1 %v6067_v22  ;;  %v472_v18 = vld [vmem:[#allocation4 + $0x5b0] sm:$0xff]  ;;  %v287_v22 = vld [vmem:[%s9783_s26 + $0x18] sm:$0xff]  ;;  %v530_v48 = vld [vmem:[#allocation4 + $0x780] sm:$0xff] }
 0x19a   :  { %831 = vmatprep.mubr.f32.mxu0 %v287_v22  ;;  %1044 = vmatprep.mubr.f32.mxu1 %v287_v22  ;;  %v6089_v26 = vpack.c.bf16 %v472_v18, %v468_v17  ;;  %v512_v16 = vld [vmem:[#allocation4 + $0x6f0] sm:$0xff]  ;;  %v515_v17 = vld [vmem:[#allocation4 + $0x708] sm:$0xff]  ;;  %v538_v60 = vld [vmem:[#allocation4 + $0x7c0] sm:$0xff] }
 0x19b   :  { %5878 = vmatpush1.bf16.msra.mxu0 %v5877_v28  ;;  %v474_v28 = vld [vmem:[#allocation4 + $0x5c0] sm:$0xff]  ;;  %v519_v18 = vld [vmem:[#allocation4 + $0x728] sm:$0xff] }
 0x19c   :  { %6070 = vmatpush1.bf16.msra.mxu1 %v6069_v29  ;;  %5880 = vmatprep.subr.bf16.mxu0 %v5879_v30  ;;  %v478_v29 = vld [vmem:[#allocation4 + $0x5e0] sm:$0xff]  ;;  %v476_v30 = vld [vmem:[#allocation4 + $0x5d0] sm:$0xff]  ;;  %v5919_v23 = vpack.c.bf16 %v519_v18, %v515_v17 }
 0x19d   :  { %6072 = vmatprep.subr.bf16.mxu1 %v6071_v34  ;;  %v487_v34 = vld [vmem:[#allocation4 + $0x628] sm:$0xff]  ;;  %v5901_v37 = vpack.c.bf16 %v478_v29, %v474_v28  ;;  %v6093_v38 = vpack.c.bf16 %v480_v32, %v476_v30  ;;  %v520_v28 = vld [vmem:[#allocation4 + $0x730] sm:$0xff]  ;;  %v529_v32 = vld [vmem:[#allocation4 + $0x778] sm:$0xff] }
 0x19e   :  { %v5903_v39 = vpack.c.bf16 %v487_v34, %v483_v33  ;;  %v523_v29 = vld [vmem:[#allocation4 + $0x748] sm:$0xff]  ;;  %v286_v17 = vld [vmem:[%s9783_s26 + $0x10] sm:$0xff] }
 0x19f   :  { %5882 = vmatpush1.bf16.msra.mxu0 %v5881_v40  ;;  %v482_v40 = vld [vmem:[#allocation4 + $0x600] sm:$0xff]  ;;  %v527_v30 = vld [vmem:[#allocation4 + $0x768] sm:$0xff] }
 0x1a0   :  { %6074 = vmatpush1.bf16.msra.mxu1 %v6073_v41  ;;  %5884 = vmatprep.subr.bf16.mxu0 %v5883_v42  ;;  %v486_v41 = vld [vmem:[#allocation4 + $0x620] sm:$0xff]  ;;  %v484_v42 = vld [vmem:[#allocation4 + $0x610] sm:$0xff]  ;;  %v5923_v35 = vpack.c.bf16 %v527_v30, %v523_v29  ;;  %v569_v29 = vld [vmem:[#allocation4 + $0x8b8] sm:$0xff] }
 0x1a1   :  { %6076 = vmatprep.subr.bf16.mxu1 %v6075_v46  ;;  %v495_v46 = vld [vmem:[#allocation4 + $0x668] sm:$0xff]  ;;  %v5905_v49 = vpack.c.bf16 %v486_v41, %v482_v40  ;;  %v6097_v50 = vpack.c.bf16 %v488_v44, %v484_v42  ;;  %v528_v40 = vld [vmem:[#allocation4 + $0x770] sm:$0xff]  ;;  %v537_v44 = vld [vmem:[#allocation4 + $0x7b8] sm:$0xff] }
 0x1a2   :  { %v5907_v51 = vpack.c.bf16 %v495_v46, %v491_v45  ;;  %v531_v41 = vld [vmem:[#allocation4 + $0x788] sm:$0xff] }
 0x1a3   :  { %5886 = vmatpush1.bf16.msra.mxu0 %v5885_v52  ;;  %v490_v52 = vld [vmem:[#allocation4 + $0x640] sm:$0xff]  ;;  %v535_v42 = vld [vmem:[#allocation4 + $0x7a8] sm:$0xff] }
 0x1a4   :  { %6078 = vmatpush1.bf16.msra.mxu1 %v6077_v53  ;;  %5888 = vmatprep.subr.bf16.mxu0 %v5887_v54  ;;  %v494_v53 = vld [vmem:[#allocation4 + $0x660] sm:$0xff]  ;;  %v492_v54 = vld [vmem:[#allocation4 + $0x650] sm:$0xff]  ;;  %v5927_v47 = vpack.c.bf16 %v535_v42, %v531_v41  ;;  %v289_v30 = vld [vmem:[%s9783_s26 + $0x28] sm:$0xff] }
 0x1a5   :  { %6080 = vmatprep.subr.bf16.mxu1 %v6079_v58  ;;  %v503_v58 = vld [vmem:[#allocation4 + $0x6a8] sm:$0xff]  ;;  %v5909_v61 = vpack.c.bf16 %v494_v53, %v490_v52  ;;  %v6101_v62 = vpack.c.bf16 %v496_v56, %v492_v54  ;;  %v536_v52 = vld [vmem:[#allocation4 + $0x7b0] sm:$0xff]  ;;  %v545_v56 = vld [vmem:[#allocation4 + $0x7f8] sm:$0xff] }
 0x1a6   :  { %v5911_v63 = vpack.c.bf16 %v503_v58, %v499_v57  ;;  %v539_v53 = vld [vmem:[#allocation4 + $0x7c8] sm:$0xff]  ;;  %v573_v41 = vld [vmem:[#allocation4 + $0x8d8] sm:$0xff] }
 0x1a7   :  { %5890 = vmatpush1.bf16.msra.mxu0 %v5889_v0  ;;  %v498_v0 = vld [vmem:[#allocation4 + $0x680] sm:$0xff]  ;;  %v543_v54 = vld [vmem:[#allocation4 + $0x7e8] sm:$0xff]  ;;  %v577_v42 = vld [vmem:[#allocation4 + $0x8f8] sm:$0xff] }
 0x1a8   :  { %6082 = vmatpush1.bf16.msra.mxu1 %v6081_v1  ;;  %5892 = vmatprep.subr.bf16.mxu0 %v5891_v2  ;;  %v502_v1 = vld [vmem:[#allocation4 + $0x6a0] sm:$0xff]  ;;  %v500_v2 = vld [vmem:[#allocation4 + $0x690] sm:$0xff]  ;;  %v5931_v59 = vpack.c.bf16 %v543_v54, %v539_v53  ;;  %v581_v53 = vld [vmem:[#allocation4 + $0x918] sm:$0xff] }
 0x1a9   :  { %6084 = vmatprep.subr.bf16.mxu1 %v6083_v6  ;;  %v511_v6 = vld [vmem:[#allocation4 + $0x6e8] sm:$0xff]  ;;  %v5913_v9 = vpack.c.bf16 %v502_v1, %v498_v0  ;;  %v6105_v10 = vpack.c.bf16 %v504_v4, %v500_v2  ;;  %v544_v0 = vld [vmem:[#allocation4 + $0x7f0] sm:$0xff]  ;;  %v553_v4 = vld [vmem:[#allocation4 + $0x838] sm:$0xff] }
 0x1aa   :  { %v5915_v11 = vpack.c.bf16 %v511_v6, %v507_v5  ;;  %v547_v1 = vld [vmem:[#allocation4 + $0x808] sm:$0xff]  ;;  %v585_v54 = vld [vmem:[#allocation4 + $0x938] sm:$0xff] }
 0x1ab   :  { %5894 = vmatpush1.bf16.msra.mxu0 %v5893_v12  ;;  %v506_v12 = vld [vmem:[#allocation4 + $0x6c0] sm:$0xff]  ;;  %v551_v2 = vld [vmem:[#allocation4 + $0x828] sm:$0xff] }
 0x1ac   :  { %6086 = vmatpush1.bf16.msra.mxu1 %v6085_v14  ;;  %5896 = vmatprep.subr.bf16.mxu0 %v5895_v15  ;;  %v508_v14 = vld [vmem:[#allocation4 + $0x6d0] sm:$0xff]  ;;  %v6107_v15 = vpack.c.bf16 %v513_v8, %v509_v7  ;;  %v5917_v21 = vpack.c.bf16 %v510_v13, %v506_v12  ;;  %v5935_v7 = vpack.c.bf16 %v551_v2, %v547_v1  ;;  %v546_v8 = vld [vmem:[#allocation4 + $0x800] sm:$0xff]  ;;  %v555_v13 = vld [vmem:[#allocation4 + $0x848] sm:$0xff] }
 0x1ad   :  { %6088 = vmatprep.subr.bf16.mxu1 %v6087_v19  ;;  %v517_v19 = vld [vmem:[#allocation4 + $0x718] sm:$0xff]  ;;  %v6109_v22 = vpack.c.bf16 %v512_v16, %v508_v14  ;;  %v552_v12 = vld [vmem:[#allocation4 + $0x830] sm:$0xff]  ;;  %v559_v14 = vld [vmem:[#allocation4 + $0x868] sm:$0xff] }
 0x1ae   :  { %v561_v16 = vld [vmem:[#allocation4 + $0x878] sm:$0xff] }
 0x1af   :  { %5898 = vmatpush1.bf16.msra.mxu0 %v5897_v25  ;;  %v518_v25 = vld [vmem:[#allocation4 + $0x720] sm:$0xff]  ;;  %v589_v1 = vld [vmem:[#allocation4 + $0x958] sm:$0xff] }
 0x1b0   :  { %6090 = vmatpush1.bf16.msra.mxu1 %v6089_v26  ;;  %5900 = vmatprep.subr.bf16.mxu0 %v5899_v27  ;;  %v516_v26 = vld [vmem:[#allocation4 + $0x710] sm:$0xff]  ;;  %v6111_v27 = vpack.c.bf16 %v521_v20, %v517_v19  ;;  %v5921_v33 = vpack.c.bf16 %v518_v25, %v514_v24  ;;  %v5939_v20 = vpack.c.bf16 %v559_v14, %v555_v13  ;;  %v593_v2 = vld [vmem:[#allocation4 + $0x978] sm:$0xff] }
 0x1b1   :  { %6092 = vmatprep.subr.bf16.mxu1 %v6091_v31  ;;  %v525_v31 = vld [vmem:[#allocation4 + $0x758] sm:$0xff]  ;;  %v6113_v34 = vpack.c.bf16 %v520_v28, %v516_v26  ;;  %v560_v25 = vld [vmem:[#allocation4 + $0x870] sm:$0xff]  ;;  %v563_v26 = vld [vmem:[#allocation4 + $0x888] sm:$0xff] }
 0x1b2   :  { %v565_v28 = vld [vmem:[#allocation4 + $0x898] sm:$0xff] }
 0x1b3   :  { %5902 = vmatpush1.bf16.msra.mxu0 %v5901_v37  ;;  %v526_v37 = vld [vmem:[#allocation4 + $0x760] sm:$0xff]  ;;  %v597_v13 = vld [vmem:[#allocation4 + $0x998] sm:$0xff] }
 0x1b4   :  { %6094 = vmatpush1.bf16.msra.mxu1 %v6093_v38  ;;  %5904 = vmatprep.subr.bf16.mxu0 %v5903_v39  ;;  %v524_v38 = vld [vmem:[#allocation4 + $0x750] sm:$0xff]  ;;  %v6115_v39 = vpack.c.bf16 %v529_v32, %v525_v31  ;;  %v5925_v45 = vpack.c.bf16 %v526_v37, %v522_v36  ;;  %v6135_v37 = vpack.c.bf16 %v569_v29, %v565_v28  ;;  %v601_v14 = vld [vmem:[#allocation4 + $0x9b8] sm:$0xff] }
 0x1b5   :  { %6096 = vmatprep.subr.bf16.mxu1 %v6095_v43  ;;  %v533_v43 = vld [vmem:[#allocation4 + $0x798] sm:$0xff]  ;;  %v6117_v46 = vpack.c.bf16 %v528_v40, %v524_v38  ;;  %v564_v36 = vld [vmem:[#allocation4 + $0x890] sm:$0xff]  ;;  %v575_v40 = vld [vmem:[#allocation4 + $0x8e8] sm:$0xff] }
 0x1b6   :  { %v568_v38 = vld [vmem:[#allocation4 + $0x8b0] sm:$0xff] }
 0x1b7   :  { %5906 = vmatpush1.bf16.msra.mxu0 %v5905_v49  ;;  %v534_v49 = vld [vmem:[#allocation4 + $0x7a0] sm:$0xff] }
 0x1b8   :  { %6098 = vmatpush1.bf16.msra.mxu1 %v6097_v50  ;;  %5908 = vmatprep.subr.bf16.mxu0 %v5907_v51  ;;  %v532_v50 = vld [vmem:[#allocation4 + $0x790] sm:$0xff]  ;;  %v6119_v51 = vpack.c.bf16 %v537_v44, %v533_v43  ;;  %v5929_v57 = vpack.c.bf16 %v534_v49, %v530_v48  ;;  %v6137_v44 = vpack.c.bf16 %v568_v38, %v564_v36  ;;  %v615_v36 = vld [vmem:[#allocation4 + $0xa28] sm:$0xff]  ;;  %v617_v38 = vld [vmem:[#allocation4 + $0xa38] sm:$0xff] }
 0x1b9   :  { %6100 = vmatprep.subr.bf16.mxu1 %v6099_v55  ;;  %v541_v55 = vld [vmem:[#allocation4 + $0x7d8] sm:$0xff]  ;;  %v6121_v58 = vpack.c.bf16 %v536_v52, %v532_v50  ;;  %v572_v48 = vld [vmem:[#allocation4 + $0x8d0] sm:$0xff]  ;;  %v6139_v49 = vpack.c.bf16 %v577_v42, %v573_v41  ;;  %v583_v52 = vld [vmem:[#allocation4 + $0x928] sm:$0xff] }
 0x1ba   :  { %v576_v50 = vld [vmem:[#allocation4 + $0x8f0] sm:$0xff]  ;;  %v610_v42 = vld [vmem:[#allocation4 + $0xa00] sm:$0xff] }
 0x1bb   :  { %5910 = vmatpush1.bf16.msra.mxu0 %v5909_v61  ;;  %v542_v61 = vld [vmem:[#allocation4 + $0x7e0] sm:$0xff] }
 0x1bc   :  { %6102 = vmatpush1.bf16.msra.mxu1 %v6101_v62  ;;  %5912 = vmatprep.subr.bf16.mxu0 %v5911_v63  ;;  %v540_v62 = vld [vmem:[#allocation4 + $0x7d0] sm:$0xff]  ;;  %v6123_v63 = vpack.c.bf16 %v545_v56, %v541_v55  ;;  %v5933_v5 = vpack.c.bf16 %v542_v61, %v538_v60  ;;  %v6141_v56 = vpack.c.bf16 %v576_v50, %v572_v48  ;;  %v623_v48 = vld [vmem:[#allocation4 + $0xa68] sm:$0xff]  ;;  %v625_v50 = vld [vmem:[#allocation4 + $0xa78] sm:$0xff] }
 0x1bd   :  { %6104 = vmatprep.subr.bf16.mxu1 %v6103_v3  ;;  %v549_v3 = vld [vmem:[#allocation4 + $0x818] sm:$0xff]  ;;  %v6125_v6 = vpack.c.bf16 %v544_v0, %v540_v62  ;;  %v580_v60 = vld [vmem:[#allocation4 + $0x910] sm:$0xff]  ;;  %v6143_v61 = vpack.c.bf16 %v585_v54, %v581_v53  ;;  %v591_v0 = vld [vmem:[#allocation4 + $0x968] sm:$0xff] }
 0x1be   :  { %v584_v62 = vld [vmem:[#allocation4 + $0x930] sm:$0xff]  ;;  %v618_v54 = vld [vmem:[#allocation4 + $0xa40] sm:$0xff] }
 0x1bf   :  { %5914 = vmatpush1.bf16.msra.mxu0 %v5913_v9  ;;  %v550_v9 = vld [vmem:[#allocation4 + $0x820] sm:$0xff] }
 0x1c0   :  { %6106 = vmatpush1.bf16.msra.mxu1 %v6105_v10  ;;  %5916 = vmatprep.subr.bf16.mxu0 %v5915_v11  ;;  %v548_v10 = vld [vmem:[#allocation4 + $0x810] sm:$0xff]  ;;  %v6127_v11 = vpack.c.bf16 %v553_v4, %v549_v3  ;;  %v5937_v18 = vpack.c.bf16 %v550_v9, %v546_v8  ;;  %v6145_v4 = vpack.c.bf16 %v584_v62, %v580_v60  ;;  %v631_v60 = vld [vmem:[#allocation4 + $0xaa8] sm:$0xff]  ;;  %v633_v62 = vld [vmem:[#allocation4 + $0xab8] sm:$0xff] }
 0x1c1   :  { %6108 = vmatprep.subr.bf16.mxu1 %v6107_v15  ;;  %v557_v15 = vld [vmem:[#allocation4 + $0x858] sm:$0xff]  ;;  %v6129_v19 = vpack.c.bf16 %v552_v12, %v548_v10  ;;  %v588_v8 = vld [vmem:[#allocation4 + $0x950] sm:$0xff]  ;;  %v6147_v9 = vpack.c.bf16 %v593_v2, %v589_v1  ;;  %v599_v12 = vld [vmem:[#allocation4 + $0x9a8] sm:$0xff] }
 0x1c2   :  { %v6131_v24 = vpack.c.bf16 %v561_v16, %v557_v15  ;;  %v592_v10 = vld [vmem:[#allocation4 + $0x970] sm:$0xff]  ;;  %v626_v2 = vld [vmem:[#allocation4 + $0xa80] sm:$0xff] }
 0x1c3   :  { %5918 = vmatpush1.bf16.msra.mxu0 %v5917_v21  ;;  %v554_v21 = vld [vmem:[#allocation4 + $0x840] sm:$0xff]  ;;  %v6149_v16 = vpack.c.bf16 %v592_v10, %v588_v8  ;;  %v639_v8 = vld [vmem:[#allocation4 + $0xae8] sm:$0xff]  ;;  %v641_v10 = vld [vmem:[#allocation4 + $0xaf8] sm:$0xff] }
 0x1c4   :  { %6110 = vmatpush1.bf16.msra.mxu1 %v6109_v22  ;;  %5920 = vmatprep.subr.bf16.mxu0 %v5919_v23  ;;  %v558_v22 = vld [vmem:[#allocation4 + $0x860] sm:$0xff]  ;;  %v556_v23 = vld [vmem:[#allocation4 + $0x850] sm:$0xff] }
 0x1c5   :  { %6112 = vmatprep.subr.bf16.mxu1 %v6111_v27  ;;  %v567_v27 = vld [vmem:[#allocation4 + $0x8a8] sm:$0xff]  ;;  %v5941_v31 = vpack.c.bf16 %v558_v22, %v554_v21  ;;  %v6133_v32 = vpack.c.bf16 %v560_v25, %v556_v23  ;;  %v6151_v21 = vpack.c.bf16 %v601_v14, %v597_v13  ;;  %v600_v22 = vld [vmem:[#allocation4 + $0x9b0] sm:$0xff]  ;;  %v605_v25 = vld [vmem:[#allocation4 + $0x9d8] sm:$0xff] }
 0x1c6   :  { %v603_v23 = vld [vmem:[#allocation4 + $0x9c8] sm:$0xff]  ;;  %v634_v14 = vld [vmem:[#allocation4 + $0xac0] sm:$0xff] }
 0x1c7   :  { %5922 = vmatpush1.bf16.msra.mxu0 %v5921_v33  ;;  %v5943_v33 = vpack.c.bf16 %v567_v27, %v563_v26  ;;  %v609_v26 = vld [vmem:[#allocation4 + $0x9f8] sm:$0xff] }
 0x1c8   :  { %6114 = vmatpush1.bf16.msra.mxu1 %v6113_v34  ;;  %5924 = vmatprep.subr.bf16.mxu0 %v5923_v35  ;;  %v562_v34 = vld [vmem:[#allocation4 + $0x880] sm:$0xff] }
 0x1c9   :  { %6116 = vmatprep.subr.bf16.mxu1 %v6115_v39  ;;  %v566_v35 = vld [vmem:[#allocation4 + $0x8a0] sm:$0xff]  ;;  %v571_v39 = vld [vmem:[#allocation4 + $0x8c8] sm:$0xff] }
 0x1ca   :  { %v5945_v43 = vpack.c.bf16 %v566_v35, %v562_v34  ;;  %v608_v34 = vld [vmem:[#allocation4 + $0x9f0] sm:$0xff]  ;;  %v611_v35 = vld [vmem:[#allocation4 + $0xa08] sm:$0xff] }
 0x1cb   :  { %5926 = vmatpush1.bf16.msra.mxu0 %v5925_v45  ;;  %v5947_v45 = vpack.c.bf16 %v575_v40, %v571_v39  ;;  %v5967_v41 = vpack.c.bf16 %v615_v36, %v611_v35 }
 0x1cc   :  { %6118 = vmatpush1.bf16.msra.mxu1 %v6117_v46  ;;  %5928 = vmatprep.subr.bf16.mxu0 %v5927_v47  ;;  %v570_v46 = vld [vmem:[#allocation4 + $0x8c0] sm:$0xff] }
 0x1cd   :  { %6120 = vmatprep.subr.bf16.mxu1 %v6119_v51  ;;  %v574_v47 = vld [vmem:[#allocation4 + $0x8e0] sm:$0xff]  ;;  %v579_v51 = vld [vmem:[#allocation4 + $0x908] sm:$0xff] }
 0x1ce   :  { %v5949_v55 = vpack.c.bf16 %v574_v47, %v570_v46  ;;  %v616_v46 = vld [vmem:[#allocation4 + $0xa30] sm:$0xff]  ;;  %v619_v47 = vld [vmem:[#allocation4 + $0xa48] sm:$0xff] }
 0x1cf   :  { %5930 = vmatpush1.bf16.msra.mxu0 %v5929_v57  ;;  %v5951_v57 = vpack.c.bf16 %v583_v52, %v579_v51  ;;  %v5971_v53 = vpack.c.bf16 %v623_v48, %v619_v47 }
 0x1d0   :  { %6122 = vmatpush1.bf16.msra.mxu1 %v6121_v58  ;;  %5932 = vmatprep.subr.bf16.mxu0 %v5931_v59  ;;  %v578_v58 = vld [vmem:[#allocation4 + $0x900] sm:$0xff] }
 0x1d1   :  { %6124 = vmatprep.subr.bf16.mxu1 %v6123_v63  ;;  %v582_v59 = vld [vmem:[#allocation4 + $0x920] sm:$0xff]  ;;  %v587_v63 = vld [vmem:[#allocation4 + $0x948] sm:$0xff] }
 0x1d2   :  { %v5953_v3 = vpack.c.bf16 %v582_v59, %v578_v58  ;;  %v624_v58 = vld [vmem:[#allocation4 + $0xa70] sm:$0xff]  ;;  %v627_v59 = vld [vmem:[#allocation4 + $0xa88] sm:$0xff] }
 0x1d3   :  { %5934 = vmatpush1.bf16.msra.mxu0 %v5933_v5  ;;  %v5955_v5 = vpack.c.bf16 %v591_v0, %v587_v63  ;;  %v5975_v1 = vpack.c.bf16 %v631_v60, %v627_v59 }
 0x1d4   :  { %6126 = vmatpush1.bf16.msra.mxu1 %v6125_v6  ;;  %5936 = vmatprep.subr.bf16.mxu0 %v5935_v7  ;;  %v586_v6 = vld [vmem:[#allocation4 + $0x940] sm:$0xff] }
 0x1d5   :  { %6128 = vmatprep.subr.bf16.mxu1 %v6127_v11  ;;  %v590_v7 = vld [vmem:[#allocation4 + $0x960] sm:$0xff]  ;;  %v595_v11 = vld [vmem:[#allocation4 + $0x988] sm:$0xff] }
 0x1d6   :  { %832 = vmatmul.mubr.f32.vlgmr.msra.gmra.mrb[0].mxu0 %v286_v17  ;;  %v5957_v15 = vpack.c.bf16 %v590_v7, %v586_v6  ;;  %v632_v6 = vld [vmem:[#allocation4 + $0xab0] sm:$0xff]  ;;  %v635_v7 = vld [vmem:[#allocation4 + $0xac8] sm:$0xff] }
 0x1d7   :  { %5938 = vmatpush1.bf16.msra.mxu0 %v5937_v18  ;;  %1045 = vmatmul.mubr.f32.vlgmr.msra.gmra.mrb[0].mxu1 %v286_v17  ;;  %v5959_v17 = vpack.c.bf16 %v599_v12, %v595_v11  ;;  %v594_v18 = vld [vmem:[#allocation4 + $0x980] sm:$0xff]  ;;  %v5979_v13 = vpack.c.bf16 %v639_v8, %v635_v7 }
 0x1d8   :  { %6130 = vmatpush1.bf16.msra.mxu1 %v6129_v19  ;;  %5940 = vmatprep.subr.bf16.mxu0 %v5939_v20  ;;  %v598_v19 = vld [vmem:[#allocation4 + $0x9a0] sm:$0xff]  ;;  %v596_v20 = vld [vmem:[#allocation4 + $0x990] sm:$0xff] }
 0x1d9   :  { %6132 = vmatprep.subr.bf16.mxu1 %v6131_v24  ;;  %902 = vmatprep.mubr.f32.mxu0 %v289_v30  ;;  %v607_v24 = vld [vmem:[#allocation4 + $0x9e8] sm:$0xff]  ;;  %v5961_v27 = vpack.c.bf16 %v598_v19, %v594_v18  ;;  %v6153_v28 = vpack.c.bf16 %v600_v22, %v596_v20  ;;  %v640_v18 = vld [vmem:[#allocation4 + $0xaf0] sm:$0xff]  ;;  %v649_v22 = vld [vmem:[#allocation4 + $0xb38] sm:$0xff] }
 0x1da   :  { %1115 = vmatprep.mubr.f32.mxu1 %v289_v30  ;;  %v5963_v29 = vpack.c.bf16 %v607_v24, %v603_v23  ;;  %v602_v30 = vld [vmem:[#allocation4 + $0x9c0] sm:$0xff]  ;;  %v643_v19 = vld [vmem:[#allocation4 + $0xb08] sm:$0xff] }
 0x1db   :  { %5942 = vmatpush1.bf16.msra.mxu0 %v5941_v31  ;;  %v606_v31 = vld [vmem:[#allocation4 + $0x9e0] sm:$0xff]  ;;  %v647_v20 = vld [vmem:[#allocation4 + $0xb28] sm:$0xff] }
 0x1dc   :  { %6134 = vmatpush1.bf16.msra.mxu1 %v6133_v32  ;;  %5944 = vmatprep.subr.bf16.mxu0 %v5943_v33  ;;  %v604_v32 = vld [vmem:[#allocation4 + $0x9d0] sm:$0xff]  ;;  %v6155_v33 = vpack.c.bf16 %v609_v26, %v605_v25  ;;  %v5965_v39 = vpack.c.bf16 %v606_v31, %v602_v30  ;;  %v5983_v25 = vpack.c.bf16 %v647_v20, %v643_v19  ;;  %v642_v26 = vld [vmem:[#allocation4 + $0xb00] sm:$0xff]  ;;  %v651_v31 = vld [vmem:[#allocation4 + $0xb48] sm:$0xff] }
 0x1dd   :  { %6136 = vmatprep.subr.bf16.mxu1 %v6135_v37  ;;  %v613_v37 = vld [vmem:[#allocation4 + $0xa18] sm:$0xff]  ;;  %v6157_v40 = vpack.c.bf16 %v608_v34, %v604_v32  ;;  %v648_v30 = vld [vmem:[#allocation4 + $0xb30] sm:$0xff]  ;;  %v655_v32 = vld [vmem:[#allocation4 + $0xb68] sm:$0xff] }
 0x1de   :  { %v657_v34 = vld [vmem:[#allocation4 + $0xb78] sm:$0xff]  ;;  %v288_v19 = vld [vmem:[%s9783_s26 + $0x20] sm:$0xff] }
 0x1df   :  { %5946 = vmatpush1.bf16.msra.mxu0 %v5945_v43  ;;  %v614_v43 = vld [vmem:[#allocation4 + $0xa20] sm:$0xff] }
 0x1e0   :  { %6138 = vmatpush1.bf16.msra.mxu1 %v6137_v44  ;;  %5948 = vmatprep.subr.bf16.mxu0 %v5947_v45  ;;  %v612_v44 = vld [vmem:[#allocation4 + $0xa10] sm:$0xff]  ;;  %v6159_v45 = vpack.c.bf16 %v617_v38, %v613_v37  ;;  %v5969_v51 = vpack.c.bf16 %v614_v43, %v610_v42  ;;  %v5987_v37 = vpack.c.bf16 %v655_v32, %v651_v31  ;;  %v650_v38 = vld [vmem:[#allocation4 + $0xb40] sm:$0xff]  ;;  %v659_v43 = vld [vmem:[#allocation4 + $0xb88] sm:$0xff] }
 0x1e1   :  { %6140 = vmatprep.subr.bf16.mxu1 %v6139_v49  ;;  %v621_v49 = vld [vmem:[#allocation4 + $0xa58] sm:$0xff]  ;;  %v6161_v52 = vpack.c.bf16 %v616_v46, %v612_v44  ;;  %v656_v42 = vld [vmem:[#allocation4 + $0xb70] sm:$0xff]  ;;  %v663_v44 = vld [vmem:[#allocation4 + $0xba8] sm:$0xff] }
 0x1e2   :  { %v665_v46 = vld [vmem:[#allocation4 + $0xbb8] sm:$0xff]  ;;  %v1179_v31 = vld [vmem:[#allocation8 + $0x1a8] sm:$0xff] }
 0x1e3   :  { %5950 = vmatpush1.bf16.msra.mxu0 %v5949_v55  ;;  %v622_v55 = vld [vmem:[#allocation4 + $0xa60] sm:$0xff] }
 0x1e4   :  { %6142 = vmatpush1.bf16.msra.mxu1 %v6141_v56  ;;  %5952 = vmatprep.subr.bf16.mxu0 %v5951_v57  ;;  %v620_v56 = vld [vmem:[#allocation4 + $0xa50] sm:$0xff]  ;;  %v6163_v57 = vpack.c.bf16 %v625_v50, %v621_v49  ;;  %v5973_v63 = vpack.c.bf16 %v622_v55, %v618_v54  ;;  %v5991_v49 = vpack.c.bf16 %v663_v44, %v659_v43  ;;  %v658_v50 = vld [vmem:[#allocation4 + $0xb80] sm:$0xff]  ;;  %v667_v55 = vld [vmem:[#allocation4 + $0xbc8] sm:$0xff] }
 0x1e5   :  { %6144 = vmatprep.subr.bf16.mxu1 %v6143_v61  ;;  %v629_v61 = vld [vmem:[#allocation4 + $0xa98] sm:$0xff]  ;;  %v6165_v0 = vpack.c.bf16 %v624_v58, %v620_v56  ;;  %v664_v54 = vld [vmem:[#allocation4 + $0xbb0] sm:$0xff]  ;;  %v671_v56 = vld [vmem:[#allocation4 + $0xbe8] sm:$0xff] }
 0x1e6   :  { %v673_v58 = vld [vmem:[#allocation4 + $0xbf8] sm:$0xff] }
 0x1e7   :  { %5954 = vmatpush1.bf16.msra.mxu0 %v5953_v3  ;;  %v630_v3 = vld [vmem:[#allocation4 + $0xaa0] sm:$0xff] }
 0x1e8   :  { %6146 = vmatpush1.bf16.msra.mxu1 %v6145_v4  ;;  %5956 = vmatprep.subr.bf16.mxu0 %v5955_v5  ;;  %v628_v4 = vld [vmem:[#allocation4 + $0xa90] sm:$0xff]  ;;  %v6167_v5 = vpack.c.bf16 %v633_v62, %v629_v61  ;;  %v5977_v11 = vpack.c.bf16 %v630_v3, %v626_v2  ;;  %v5995_v61 = vpack.c.bf16 %v671_v56, %v667_v55  ;;  %v666_v62 = vld [vmem:[#allocation4 + $0xbc0] sm:$0xff] }
 0x1e9   :  { %6148 = vmatprep.subr.bf16.mxu1 %v6147_v9  ;;  %v637_v9 = vld [vmem:[#allocation4 + $0xad8] sm:$0xff]  ;;  %v6169_v12 = vpack.c.bf16 %v632_v6, %v628_v4  ;;  %v672_v2 = vld [vmem:[#allocation4 + $0xbf0] sm:$0xff]  ;;  %v1142_v3 = vld [vmem:[#allocation8 + $0x80] sm:$0xff] }
 0x1ea   :  { %v1143_v4 = vld [vmem:[#allocation8 + $0x88] sm:$0xff]  ;;  %v1181_v43 = vld [vmem:[#allocation8 + $0x1b8] sm:$0xff] }
 0x1eb   :  { %5958 = vmatpush1.bf16.msra.mxu0 %v5957_v15  ;;  %v638_v15 = vld [vmem:[#allocation4 + $0xae0] sm:$0xff]  ;;  %v1175_v6 = vld [vmem:[#allocation8 + $0x188] sm:$0xff] }
 0x1ec   :  { %6150 = vmatpush1.bf16.msra.mxu1 %v6149_v16  ;;  %5960 = vmatprep.subr.bf16.mxu0 %v5959_v17  ;;  %v636_v16 = vld [vmem:[#allocation4 + $0xad0] sm:$0xff]  ;;  %v6171_v17 = vpack.c.bf16 %v641_v10, %v637_v9  ;;  %v5981_v23 = vpack.c.bf16 %v638_v15, %v634_v14  ;;  %v6191_v9 = vpack.c.bf16 %v1143_v4, %v1142_v3  ;;  %v1126_v10 = vld [vmem:[#allocation8] sm:$0xff]  ;;  %v1185_v3 = vld [vmem:[#allocation8 + $0x1d8] sm:$0xff] }
 0x1ed   :  { %6152 = vmatprep.subr.bf16.mxu1 %v6151_v21  ;;  %v645_v21 = vld [vmem:[#allocation4 + $0xb18] sm:$0xff]  ;;  %v6173_v24 = vpack.c.bf16 %v640_v18, %v636_v16  ;;  %v1159_v14 = vld [vmem:[#allocation8 + $0x108] sm:$0xff] }
 0x1ee   :  { %v1144_v15 = vld [vmem:[#allocation8 + $0x90] sm:$0xff]  ;;  %v1145_v16 = vld [vmem:[#allocation8 + $0x98] sm:$0xff]  ;;  %v1183_v55 = vld [vmem:[#allocation8 + $0x1c8] sm:$0xff] }
 0x1ef   :  { %5962 = vmatpush1.bf16.msra.mxu0 %v5961_v27  ;;  %v646_v27 = vld [vmem:[#allocation4 + $0xb20] sm:$0xff] }
 0x1f0   :  { %6154 = vmatpush1.bf16.msra.mxu1 %v6153_v28  ;;  %5964 = vmatprep.subr.bf16.mxu0 %v5963_v29  ;;  %v644_v28 = vld [vmem:[#allocation4 + $0xb10] sm:$0xff]  ;;  %v6175_v29 = vpack.c.bf16 %v649_v22, %v645_v21  ;;  %v5985_v35 = vpack.c.bf16 %v646_v27, %v642_v26  ;;  %v1177_v18 = vld [vmem:[#allocation8 + $0x198] sm:$0xff]  ;;  %v6195_v22 = vpack.c.bf16 %v1145_v16, %v1144_v15 }
 0x1f1   :  { %6156 = vmatprep.subr.bf16.mxu1 %v6155_v33  ;;  %v653_v33 = vld [vmem:[#allocation4 + $0xb58] sm:$0xff]  ;;  %v6177_v36 = vpack.c.bf16 %v648_v30, %v644_v28  ;;  %v1146_v28 = vld [vmem:[#allocation8 + $0xa0] sm:$0xff]  ;;  %v1187_v15 = vld [vmem:[#allocation8 + $0x1e8] sm:$0xff] }
 0x1f2   :  { %v1161_v27 = vld [vmem:[#allocation8 + $0x118] sm:$0xff]  ;;  %v1178_v30 = vld [vmem:[#allocation8 + $0x1a0] sm:$0xff] }
 0x1f3   :  { %5966 = vmatpush1.bf16.msra.mxu0 %v5965_v39  ;;  %v654_v39 = vld [vmem:[#allocation4 + $0xb60] sm:$0xff] }
 0x1f4   :  { %6158 = vmatpush1.bf16.msra.mxu1 %v6157_v40  ;;  %5968 = vmatprep.subr.bf16.mxu0 %v5967_v41  ;;  %v652_v40 = vld [vmem:[#allocation4 + $0xb50] sm:$0xff]  ;;  %v6179_v41 = vpack.c.bf16 %v657_v34, %v653_v33  ;;  %v5989_v47 = vpack.c.bf16 %v654_v39, %v650_v38  ;;  %v6231_v38 = vpack.c.bf16 %v1179_v31, %v1178_v30  ;;  %v1189_v30 = vld [vmem:[#allocation8 + $0x1f8] sm:$0xff] }
 0x1f5   :  { %6160 = vmatprep.subr.bf16.mxu1 %v6159_v45  ;;  %v661_v45 = vld [vmem:[#allocation4 + $0xb98] sm:$0xff]  ;;  %v6181_v48 = vpack.c.bf16 %v656_v42, %v652_v40  ;;  %v1163_v39 = vld [vmem:[#allocation8 + $0x128] sm:$0xff] }
 0x1f6   :  { %v1148_v40 = vld [vmem:[#allocation8 + $0xb0] sm:$0xff] }
 0x1f7   :  { %5970 = vmatpush1.bf16.msra.mxu0 %v5969_v51  ;;  %v662_v51 = vld [vmem:[#allocation4 + $0xba0] sm:$0xff]  ;;  %v1180_v42 = vld [vmem:[#allocation8 + $0x1b0] sm:$0xff] }
 0x1f8   :  { %6162 = vmatpush1.bf16.msra.mxu1 %v6161_v52  ;;  %5972 = vmatprep.subr.bf16.mxu0 %v5971_v53  ;;  %v660_v52 = vld [vmem:[#allocation4 + $0xb90] sm:$0xff]  ;;  %v6183_v53 = vpack.c.bf16 %v665_v46, %v661_v45  ;;  %v5993_v59 = vpack.c.bf16 %v662_v51, %v658_v50  ;;  %v6235_v50 = vpack.c.bf16 %v1181_v43, %v1180_v42  ;;  %v1165_v51 = vld [vmem:[#allocation8 + $0x138] sm:$0xff] }
 0x1f9   :  { %6164 = vmatprep.subr.bf16.mxu1 %v6163_v57  ;;  %v669_v57 = vld [vmem:[#allocation4 + $0xbd8] sm:$0xff]  ;;  %v6185_v60 = vpack.c.bf16 %v664_v54, %v660_v52  ;;  %v1150_v52 = vld [vmem:[#allocation8 + $0xc0] sm:$0xff] }
 0x1fa   :  { %v1182_v54 = vld [vmem:[#allocation8 + $0x1c0] sm:$0xff]  ;;  %v1140_v31 = vld [vmem:[#allocation8 + $0x70] sm:$0xff] }
 0x1fb   :  { %5974 = vmatpush1.bf16.msra.mxu0 %v5973_v63  ;;  %v670_v63 = vld [vmem:[#allocation4 + $0xbe0] sm:$0xff] }
 0x1fc   :  { %6166 = vmatpush1.bf16.msra.mxu1 %v6165_v0  ;;  %5976 = vmatprep.subr.bf16.mxu0 %v5975_v1  ;;  %v668_v0 = vld [vmem:[#allocation4 + $0xbd0] sm:$0xff]  ;;  %v6187_v1 = vpack.c.bf16 %v673_v58, %v669_v57  ;;  %v5997_v7 = vpack.c.bf16 %v670_v63, %v666_v62  ;;  %v6239_v62 = vpack.c.bf16 %v1183_v55, %v1182_v54 }
 0x1fd   :  { %6168 = vmatprep.subr.bf16.mxu1 %v6167_v5  ;;  %v1174_v5 = vld [vmem:[#allocation8 + $0x180] sm:$0xff]  ;;  %v6189_v8 = vpack.c.bf16 %v672_v2, %v668_v0  ;;  %v1167_v63 = vld [vmem:[#allocation8 + $0x148] sm:$0xff]  ;;  %v1152_v0 = vld [vmem:[#allocation8 + $0xd0] sm:$0xff] }
 0x1fe   :  { %v1184_v2 = vld [vmem:[#allocation8 + $0x1d0] sm:$0xff] }
 0x1ff   :  { %5978 = vmatpush1.bf16.msra.mxu0 %v5977_v11  ;;  %v1127_v11 = vld [vmem:[#allocation8 + $0x8] sm:$0xff] }
 0x200   :  { %6170 = vmatpush1.bf16.msra.mxu1 %v6169_v12  ;;  %5980 = vmatprep.subr.bf16.mxu0 %v5979_v13  ;;  %v1158_v12 = vld [vmem:[#allocation8 + $0x100] sm:$0xff]  ;;  %v6223_v13 = vpack.c.bf16 %v1175_v6, %v1174_v5  ;;  %v6193_v20 = vpack.c.bf16 %v1127_v11, %v1126_v10  ;;  %v6243_v10 = vpack.c.bf16 %v1185_v3, %v1184_v2  ;;  %v1169_v11 = vld [vmem:[#allocation8 + $0x158] sm:$0xff]  ;;  %v1355_v2 = vld [vmem:[#allocation14 + $0x48] sm:$0xff] }
 0x201   :  { %6172 = vmatprep.subr.bf16.mxu1 %v6171_v17  ;;  %v1176_v17 = vld [vmem:[#allocation8 + $0x190] sm:$0xff]  ;;  %v6225_v21 = vpack.c.bf16 %v1159_v14, %v1158_v12  ;;  %v1154_v12 = vld [vmem:[#allocation8 + $0xe0] sm:$0xff] }
 0x202   :  { %v6227_v26 = vpack.c.bf16 %v1177_v18, %v1176_v17  ;;  %v1186_v14 = vld [vmem:[#allocation8 + $0x1e0] sm:$0xff]  ;;  %v1359_v3 = vld [vmem:[#allocation14 + $0x68] sm:$0xff] }
 0x203   :  { %5982 = vmatpush1.bf16.msra.mxu0 %v5981_v23  ;;  %v1128_v23 = vld [vmem:[#allocation8 + $0x10] sm:$0xff] }
 0x204   :  { %6174 = vmatpush1.bf16.msra.mxu1 %v6173_v24  ;;  %5984 = vmatprep.subr.bf16.mxu0 %v5983_v25  ;;  %v1129_v24 = vld [vmem:[#allocation8 + $0x18] sm:$0xff]  ;;  %v1160_v25 = vld [vmem:[#allocation8 + $0x110] sm:$0xff] }
 0x205   :  { %6176 = vmatprep.subr.bf16.mxu1 %v6175_v29  ;;  %v1147_v29 = vld [vmem:[#allocation8 + $0xa8] sm:$0xff]  ;;  %v6197_v32 = vpack.c.bf16 %v1129_v24, %v1128_v23  ;;  %v6229_v33 = vpack.c.bf16 %v1161_v27, %v1160_v25  ;;  %v1157_v27 = vld [vmem:[#allocation8 + $0xf8] sm:$0xff] }
 0x206   :  { %v6199_v34 = vpack.c.bf16 %v1147_v29, %v1146_v28  ;;  %v1171_v23 = vld [vmem:[#allocation8 + $0x168] sm:$0xff]  ;;  %v1188_v28 = vld [vmem:[#allocation8 + $0x1f0] sm:$0xff] }
 0x207   :  { %5986 = vmatpush1.bf16.msra.mxu0 %v5985_v35  ;;  %v1130_v35 = vld [vmem:[#allocation8 + $0x20] sm:$0xff] }
 0x208   :  { %6178 = vmatpush1.bf16.msra.mxu1 %v6177_v36  ;;  %5988 = vmatprep.subr.bf16.mxu0 %v5987_v37  ;;  %v1131_v36 = vld [vmem:[#allocation8 + $0x28] sm:$0xff]  ;;  %v1162_v37 = vld [vmem:[#allocation8 + $0x120] sm:$0xff] }
 0x209   :  { %6180 = vmatprep.subr.bf16.mxu1 %v6179_v41  ;;  %v1149_v41 = vld [vmem:[#allocation8 + $0xb8] sm:$0xff]  ;;  %v6201_v44 = vpack.c.bf16 %v1131_v36, %v1130_v35  ;;  %v6233_v45 = vpack.c.bf16 %v1163_v39, %v1162_v37  ;;  %v1172_v35 = vld [vmem:[#allocation8 + $0x170] sm:$0xff] }
 0x20a   :  { %v6203_v46 = vpack.c.bf16 %v1149_v41, %v1148_v40  ;;  %v1173_v36 = vld [vmem:[#allocation8 + $0x178] sm:$0xff]  ;;  %v1351_v39 = vld [vmem:[#allocation14 + $0x28] sm:$0xff] }
 0x20b   :  { %5990 = vmatpush1.bf16.msra.mxu0 %v5989_v47  ;;  %v1132_v47 = vld [vmem:[#allocation8 + $0x30] sm:$0xff]  ;;  %v6253_v37 = vpack.c.bf16 %v1173_v36, %v1172_v35  ;;  %v1349_v40 = vld [vmem:[#allocation14 + $0x18] sm:$0xff] }
 0x20c   :  { %6182 = vmatpush1.bf16.msra.mxu1 %v6181_v48  ;;  %5992 = vmatprep.subr.bf16.mxu0 %v5991_v49  ;;  %v1133_v48 = vld [vmem:[#allocation8 + $0x38] sm:$0xff]  ;;  %v1164_v49 = vld [vmem:[#allocation8 + $0x130] sm:$0xff] }
 0x20d   :  { %6184 = vmatprep.subr.bf16.mxu1 %v6183_v53  ;;  %v1151_v53 = vld [vmem:[#allocation8 + $0xc8] sm:$0xff]  ;;  %v6205_v56 = vpack.c.bf16 %v1133_v48, %v1132_v47  ;;  %v6237_v57 = vpack.c.bf16 %v1165_v51, %v1164_v49  ;;  %v1353_v41 = vld [vmem:[#allocation14 + $0x38] sm:$0xff] }
 0x20e   :  { %v6207_v58 = vpack.c.bf16 %v1151_v53, %v1150_v52  ;;  %v6287_v43 = vpack.c.bf16 %v1353_v41, %v1349_v40  ;;  %v674_v47 = vld [vmem:[#allocation6] sm:$0xf]  ;;  %v1374_v40 = vld [vmem:[#allocation14 + $0xe0] sm:$0xff]  ;;  %v1372_v41 = vld [vmem:[#allocation14 + $0xd0] sm:$0xff] }
 0x20f   :  { %5994 = vmatpush1.bf16.msra.mxu0 %v5993_v59  ;;  %v1134_v59 = vld [vmem:[#allocation8 + $0x40] sm:$0xff] }
 0x210   :  { %6186 = vmatpush1.bf16.msra.mxu1 %v6185_v60  ;;  %5996 = vmatprep.subr.bf16.mxu0 %v5995_v61  ;;  %v1135_v60 = vld [vmem:[#allocation8 + $0x48] sm:$0xff]  ;;  %v1166_v61 = vld [vmem:[#allocation8 + $0x140] sm:$0xff] }
 0x211   :  { %6188 = vmatprep.subr.bf16.mxu1 %v6187_v1  ;;  %v1153_v1 = vld [vmem:[#allocation8 + $0xd8] sm:$0xff]  ;;  %v6209_v4 = vpack.c.bf16 %v1135_v60, %v1134_v59  ;;  %v6241_v5 = vpack.c.bf16 %v1167_v63, %v1166_v61  ;;  %v1346_v59 = vld [vmem:[#allocation14] sm:$0xff] }
 0x212   :  { %v6211_v6 = vpack.c.bf16 %v1153_v1, %v1152_v0  ;;  %v1350_v60 = vld [vmem:[#allocation14 + $0x20] sm:$0xff]  ;;  %v1348_v61 = vld [vmem:[#allocation14 + $0x10] sm:$0xff]  ;;  %v1377_v35 = vld [vmem:[#allocation14 + $0xf8] sm:$0xff] }
 0x213   :  { %5998 = vmatpush1.bf16.msra.mxu0 %v5997_v7  ;;  %v1136_v7 = vld [vmem:[#allocation8 + $0x50] sm:$0xff] }
 0x214   :  { %6190 = vmatpush1.bf16.msra.mxu1 %v6189_v8  ;;  %6192 = vmatprep.subr.bf16.mxu0 %v6191_v9  ;;  %v1137_v8 = vld [vmem:[#allocation8 + $0x58] sm:$0xff]  ;;  %v1168_v9 = vld [vmem:[#allocation8 + $0x150] sm:$0xff] }
 0x215   :  { %6224 = vmatprep.subr.bf16.mxu1 %v6223_v13  ;;  %v1155_v13 = vld [vmem:[#allocation8 + $0xe8] sm:$0xff]  ;;  %v6213_v16 = vpack.c.bf16 %v1137_v8, %v1136_v7  ;;  %v6245_v17 = vpack.c.bf16 %v1169_v11, %v1168_v9  ;;  %v1352_v1 = vld [vmem:[#allocation14 + $0x30] sm:$0xff]  ;;  %v6257_v8 = vpack.c.bf16 %v1350_v60, %v1346_v59 }
 0x216   :  { %903 = vmatmul.mubr.f32.vlgmr.msra.gmra.mrb[0].mxu0 %v288_v19  ;;  %v6215_v18 = vpack.c.bf16 %v1155_v13, %v1154_v12  ;;  %v6289_v11 = vpack.c.bf16 %v1352_v1, %v1348_v61  ;;  %v6259_v12 = vpack.c.bf16 %v1359_v3, %v1355_v2  ;;  %v1354_v13 = vld [vmem:[#allocation14 + $0x40] sm:$0xff]  ;;  %v1384_v59 = vld [vmem:[#allocation14 + $0x130] sm:$0xff]  ;;  %v1387_v60 = vld [vmem:[#allocation14 + $0x148] sm:$0xff] }
 0x217   :  { %1116 = vmatmul.mubr.f32.vlgmr.msra.gmra.mrb[0].mxu1 %v288_v19  ;;  %6194 = vmatpush3.bf16.msra.mxu0 %v6193_v20  ;;  %v1138_v19 = vld [vmem:[#allocation8 + $0x60] sm:$0xff]  ;;  %v1139_v20 = vld [vmem:[#allocation8 + $0x68] sm:$0xff] }
 0x218   :  { %6226 = vmatpush3.bf16.msra.mxu1 %v6225_v21  ;;  %6196 = vmatprep.subr.bf16.mxu0 %v6195_v22  ;;  %v6247_v21 = vpack.c.bf16 %v1187_v15, %v1186_v14  ;;  %v1170_v22 = vld [vmem:[#allocation8 + $0x160] sm:$0xff]  ;;  %v6217_v24 = vpack.c.bf16 %v1139_v20, %v1138_v19  ;;  %v1356_v15 = vld [vmem:[#allocation14 + $0x50] sm:$0xff]  ;;  %v1363_v19 = vld [vmem:[#allocation14 + $0x88] sm:$0xff] }
 0x219   :  { %6228 = vmatprep.subr.bf16.mxu1 %v6227_v26  ;;  %v6249_v25 = vpack.c.bf16 %v1171_v23, %v1170_v22  ;;  %v1156_v26 = vld [vmem:[#allocation8 + $0xf0] sm:$0xff]  ;;  %v1358_v14 = vld [vmem:[#allocation14 + $0x60] sm:$0xff]  ;;  %v1369_v22 = vld [vmem:[#allocation14 + $0xb8] sm:$0xff] }
 0x21a   :  { %v6219_v29 = vpack.c.bf16 %v1157_v27, %v1156_v26  ;;  %v1367_v20 = vld [vmem:[#allocation14 + $0xa8] sm:$0xff]  ;;  %v6261_v23 = vpack.c.bf16 %v1358_v14, %v1354_v13  ;;  %v1362_v26 = vld [vmem:[#allocation14 + $0x80] sm:$0xff] }
 0x21b   :  { %6198 = vmatpush3.bf16.msra.mxu0 %v6197_v32  ;;  %v1141_v32 = vld [vmem:[#allocation8 + $0x78] sm:$0xff]  ;;  %v1366_v27 = vld [vmem:[#allocation14 + $0xa0] sm:$0xff]  ;;  %v1391_v61 = vld [vmem:[#allocation14 + $0x168] sm:$0xff] }
 0x21c   :  { %6230 = vmatpush3.bf16.msra.mxu1 %v6229_v33  ;;  %6200 = vmatprep.subr.bf16.mxu0 %v6199_v34  ;;  %v6251_v33 = vpack.c.bf16 %v1189_v30, %v1188_v28  ;;  %v6221_v34 = vpack.c.bf16 %v1141_v32, %v1140_v31  ;;  %v1364_v28 = vld [vmem:[#allocation14 + $0x90] sm:$0xff]  ;;  %v1371_v31 = vld [vmem:[#allocation14 + $0xc8] sm:$0xff]  ;;  %v6265_v36 = vpack.c.bf16 %v1366_v27, %v1362_v26  ;;  %v1386_v3 = vld [vmem:[#allocation14 + $0x140] sm:$0xff] }
 0x21d   :  { %6232 = vmatprep.subr.bf16.mxu1 %v6231_v38  ;;  %v1347_v38 = vld [vmem:[#allocation14 + $0x8] sm:$0xff]  ;;  %v1368_v30 = vld [vmem:[#allocation14 + $0xb0] sm:$0xff]  ;;  %v6275_v2 = vpack.c.bf16 %v1391_v61, %v1387_v60  ;;  %v1402_v27 = vld [vmem:[#allocation14 + $0x1c0] sm:$0xff] }
 0x21e   :  { %v6255_v42 = vpack.c.bf16 %v1351_v39, %v1347_v38  ;;  %v1375_v32 = vld [vmem:[#allocation14 + $0xe8] sm:$0xff]  ;;  %v1370_v39 = vld [vmem:[#allocation14 + $0xc0] sm:$0xff]  ;;  %v1704_v60 = vld [vmem:[#allocation15 + $0x70] sm:$0xff] }
 0x21f   :  { %6202 = vmatpush3.bf16.msra.mxu0 %v6201_v44  ;;  %v676_v44 = vlaneseq  ;;  %v6267_v38 = vpack.c.bf16 %v1375_v32, %v1371_v31  ;;  %v1408_v31 = vld [vmem:[#allocation14 + $0x1f0] sm:$0xff]  ;;  %v1691_v32 = vld [vmem:[#allocation15 + $0x8] sm:$0xff] }
 0x220   :  { %6234 = vmatpush3.bf16.msra.mxu1 %v6233_v45  ;;  %6204 = vmatprep.subr.bf16.mxu0 %v6203_v46 }
 0x221   :  { %6236 = vmatprep.subr.bf16.mxu1 %v6235_v50  ;;  %v677_v45 = vshrl.u32 %v676_v44, 7  ;;  %v1379_v44 = vld [vmem:[#allocation14 + $0x108] sm:$0xff] }
 0x223   :  { %6206 = vmatpush3.bf16.msra.mxu0 %v6205_v56  ;;  %v8700_v46 = vsub.s32 0, %v677_v45  ;;  %v8702_v48 = vsub.s32 2, %v677_v45  ;;  %v8704_v49 = vsub.s32 1, %v677_v45  ;;  %v8706_v50 = vsub.s32 3, %v677_v45  ;;  %v1383_v45 = vld [vmem:[#allocation14 + $0x128] sm:$0xff] }
 0x224   :  { %6238 = vmatpush3.bf16.msra.mxu1 %v6237_v57  ;;  %6208 = vmatprep.subr.bf16.mxu0 %v6207_v58 }
 0x225   :  { %6240 = vmatprep.subr.bf16.mxu1 %v6239_v62  ;;  %v679_v51 = vrot.slane %v674_v47, %v8700_v46  ;;  %v687_v52 = vrot.slane %v674_v47, %v8702_v48  ;;  %v683_v53 = vrot.slane %v674_v47, %v8704_v49  ;;  %v691_v54 = vrot.slane %v674_v47, %v8706_v50  ;;  %v1381_v47 = vld [vmem:[#allocation14 + $0x118] sm:$0xff] }
 0x227   :  { %6210 = vmatpush3.bf16.msra.mxu0 %v6209_v4 }
 0x228   :  { %6242 = vmatpush3.bf16.msra.mxu1 %v6241_v5  ;;  %6212 = vmatprep.subr.bf16.mxu0 %v6211_v6  ;;  %v1357_v5 = vld [vmem:[#allocation14 + $0x58] sm:$0xff] }
 0x229   :  { %6244 = vmatprep.subr.bf16.mxu1 %v6243_v10  ;;  %v1361_v6 = vld [vmem:[#allocation14 + $0x78] sm:$0xff] }
 0x22b   :  { %6214 = vmatpush3.bf16.msra.mxu0 %v6213_v16 }
 0x22c   :  { %6246 = vmatpush3.bf16.msra.mxu1 %v6245_v17  ;;  %6216 = vmatprep.subr.bf16.mxu0 %v6215_v18  ;;  %v6291_v17 = vpack.c.bf16 %v1361_v6, %v1357_v5  ;;  %v1360_v18 = vld [vmem:[#allocation14 + $0x70] sm:$0xff] }
 0x22d   :  { %6248 = vmatprep.subr.bf16.mxu1 %v6247_v21  ;;  %v1365_v21 = vld [vmem:[#allocation14 + $0x98] sm:$0xff]  ;;  %v1388_v5 = vld [vmem:[#allocation14 + $0x150] sm:$0xff] }
 0x22f   :  { %6218 = vmatpush3.bf16.msra.mxu0 %v6217_v24  ;;  %v6293_v24 = vpack.c.bf16 %v1360_v18, %v1356_v15  ;;  %v1394_v15 = vld [vmem:[#allocation14 + $0x180] sm:$0xff] }
 0x230   :  { %6250 = vmatpush3.bf16.msra.mxu1 %v6249_v25  ;;  %6220 = vmatprep.subr.bf16.mxu0 %v6219_v29  ;;  %v6263_v25 = vpack.c.bf16 %v1367_v20, %v1363_v19  ;;  %v6295_v29 = vpack.c.bf16 %v1369_v22, %v1365_v21  ;;  %v1400_v19 = vld [vmem:[#allocation14 + $0x1b0] sm:$0xff]  ;;  %v1403_v20 = vld [vmem:[#allocation14 + $0x1c8] sm:$0xff]  ;;  %v1405_v22 = vld [vmem:[#allocation14 + $0x1d8] sm:$0xff] }
 0x231   :  { %6252 = vmatprep.subr.bf16.mxu1 %v6251_v33  ;;  %v8338_v33 = vmov 0.0   ;;  %v1407_v21 = vld [vmem:[#allocation14 + $0x1e8] sm:$0xff] }
 0x232   :  { %v6283_v26 = vpack.c.bf16 %v1407_v21, %v1403_v20  ;;  %v1716_v21 = vld [vmem:[#allocation15 + $0xd0] sm:$0xff] }
 0x233   :  { %6222 = vmatpush3.bf16.msra.mxu0 %v6221_v34  ;;  %v1373_v34 = vld [vmem:[#allocation14 + $0xd8] sm:$0xff] }
 0x234   :  { %6254 = vmatpush3.bf16.msra.mxu1 %v6253_v37  ;;  %6256 = vmatprep.subr.bf16.mxu0 %v6255_v42  ;;  %v6297_v37 = vpack.c.bf16 %v1368_v30, %v1364_v28  ;;  %v6299_v42 = vpack.c.bf16 %v1377_v35, %v1373_v34  ;;  %v1406_v28 = vld [vmem:[#allocation14 + $0x1e0] sm:$0xff]  ;;  %v1695_v34 = vld [vmem:[#allocation15 + $0x28] sm:$0xff]  ;;  %v1693_v35 = vld [vmem:[#allocation15 + $0x18] sm:$0xff] }
 0x235   :  { %6288 = vmatprep.subr.bf16.mxu1 %v6287_v43  ;;  %v1376_v43 = vld [vmem:[#allocation14 + $0xf0] sm:$0xff] }
 0x2e9   :  { %v904_v55 = vpop.f32.mrb[0].mxu0 }
 0x2ea   :  { %v7497_v56 = vadd.f32 %v904_v55, %v679_v51  ;;  %v1117_v57 = vpop.f32.mrb[0].mxu1  ;;  %v906_v58 = vpop.f32.mrb[1].mxu0  ;;  %v1385_v51 = vld [vmem:[#allocation14 + $0x138] sm:$0xff]  ;;  %v1378_v55 = vld [vmem:[#allocation14 + $0x100] sm:$0xff] }
 0x2eb   :  { %v7499_v62 = vadd.f32 %v1117_v57, %v687_v52  ;;  %v7498_v63 = vadd.f32 %v906_v58, %v683_v53  ;;  %v1119_v0 = vpop.f32.mrb[1].mxu1  ;;  %v6269_v52 = vpack.c.bf16 %v1374_v40, %v1370_v39  ;;  %v6301_v53 = vpack.c.bf16 %v1376_v43, %v1372_v41  ;;  %v1380_v57 = vld [vmem:[#allocation14 + $0x110] sm:$0xff]  ;;  %v1690_v40 = vld [vmem:[#allocation15] sm:$0xff] }
 0x2ec   :  { %v7500_v4 = vadd.f32 %v1119_v0, %v691_v54  ;;  %v1122_v9 = vmax.f32 %v7497_v56, 0.0  ;;  %v6271_v54 = vpack.c.bf16 %v1383_v45, %v1379_v44  ;;  %v1382_v56 = vld [vmem:[#allocation14 + $0x120] sm:$0xff]  ;;  %v6303_v58 = vpack.c.bf16 %v1385_v51, %v1381_v47  ;;  %v1692_v43 = vld [vmem:[#allocation15 + $0x10] sm:$0xff]  ;;  %v1699_v45 = vld [vmem:[#allocation15 + $0x48] sm:$0xff] }
 0x2ed   :  { %v1123_v7 = vmax.f32 %v7498_v63, 0.0  ;;  %v1124_v16 = vmax.f32 %v7499_v62, 0.0  ;;  %v1389_v62 = vld [vmem:[#allocation14 + $0x158] sm:$0xff]  ;;  %v6273_v0 = vpack.c.bf16 %v1382_v56, %v1378_v55  ;;  %v6305_v1 = vpack.c.bf16 %v1384_v59, %v1380_v57  ;;  %v1694_v41 = vld [vmem:[#allocation15 + $0x20] sm:$0xff]  ;;  %v1696_v44 = vld [vmem:[#allocation15 + $0x30] sm:$0xff] }
 0x2ee   :  { %v1125_v10 = vmax.f32 %v7500_v4, 0.0  ;;  %v1393_v63 = vld [vmem:[#allocation14 + $0x178] sm:$0xff]  ;;  %v1390_v4 = vld [vmem:[#allocation14 + $0x160] sm:$0xff]  ;;  %v8714_v39 = vpack.c.bf16 %v1695_v34, %v1691_v32  ;;  %v1703_v47 = vld [vmem:[#allocation15 + $0x68] sm:$0xff]  ;;  %v8724_v55 = vpack.c.bf16 %v1696_v44, %v1692_v43 }
 0x2ef   :  { %1261 = vmatprep.mubr.f32.mxu0 %v1123_v7  ;;  %v6307_v6 = vpack.c.bf16 %v1393_v63, %v1389_v62  ;;  %v1392_v7 = vld [vmem:[#allocation14 + $0x170] sm:$0xff]  ;;  %v1338_v51 = vld [vmem:[%s9784_s29] sm:$0xff]  ;;  %v1707_v62 = vld [vmem:[#allocation15 + $0x88] sm:$0xff] }
 0x2f0   :  { %1331 = vmatprep.mubr.f32.mxu1 %v1125_v10  ;;  %1262 = vmatmul.mubr.f32.vlgmr.msra.gmra.mrb[2].mxu0 %v1122_v9  ;;  %v1399_v9 = vld [vmem:[#allocation14 + $0x1a8] sm:$0xff]  ;;  %v1397_v10 = vld [vmem:[#allocation14 + $0x198] sm:$0xff]  ;;  %v6309_v13 = vpack.c.bf16 %v1392_v7, %v1388_v5  ;;  %v1698_v56 = vld [vmem:[#allocation15 + $0x40] sm:$0xff] }
 0x2f1   :  { %1332 = vmatmul.mubr.f32.vlgmr.msra.gmra.mrb[2].mxu1 %v1124_v16  ;;  %6258 = vmatpush1.bf16.msra.mxu0 %v6257_v8  ;;  %v1395_v8 = vld [vmem:[#allocation14 + $0x188] sm:$0xff]  ;;  %v1398_v16 = vld [vmem:[#allocation14 + $0x1a0] sm:$0xff]  ;;  %v1700_v59 = vld [vmem:[#allocation15 + $0x50] sm:$0xff] }
 0x2f2   :  { %6290 = vmatpush1.bf16.msra.mxu1 %v6289_v11  ;;  %6260 = vmatprep.subr.bf16.mxu0 %v6259_v12  ;;  %v1401_v11 = vld [vmem:[#allocation14 + $0x1b8] sm:$0xff]  ;;  %v6277_v12 = vpack.c.bf16 %v1390_v4, %v1386_v3  ;;  %v6279_v14 = vpack.c.bf16 %v1399_v9, %v1395_v8  ;;  %v1702_v57 = vld [vmem:[#allocation15 + $0x60] sm:$0xff]  ;;  %v1711_v63 = vld [vmem:[#allocation15 + $0xa8] sm:$0xff]  ;;  %v8739_v4 = vpack.c.bf16 %v1704_v60, %v1700_v59 }
 0x2f3   :  { %6292 = vmatprep.subr.bf16.mxu1 %v6291_v17  ;;  %1496 = vmatprep.mubr.f32.mxu0 %v8338_v33  ;;  %v1396_v17 = vld [vmem:[#allocation14 + $0x190] sm:$0xff]  ;;  %v6311_v18 = vpack.c.bf16 %v1401_v11, %v1397_v10  ;;  %v1713_v3 = vld [vmem:[#allocation15 + $0xb8] sm:$0xff]  ;;  %v1706_v5 = vld [vmem:[#allocation15 + $0x80] sm:$0xff]  ;;  %v8743_v7 = vpack.c.bf16 %v1711_v63, %v1707_v62 }
 0x2f4   :  { %1609 = vmatprep.mubr.f32.mxu1 %v8338_v33  ;;  %v1708_v8 = vld [vmem:[#allocation15 + $0x90] sm:$0xff]  ;;  %v1715_v11 = vld [vmem:[#allocation15 + $0xc8] sm:$0xff]  ;;  %v1726_v32 = vld [vmem:[#allocation15 + $0x120] sm:$0xff] }
 0x2f5   :  { %6262 = vmatpush1.bf16.msra.mxu0 %v6261_v23  ;;  %v1409_v23 = vld [vmem:[#allocation14 + $0x1f8] sm:$0xff]  ;;  %v1712_v9 = vld [vmem:[#allocation15 + $0xb0] sm:$0xff]  ;;  %v1739_v60 = vld [vmem:[#allocation15 + $0x188] sm:$0xff] }
 0x2f6   :  { %6294 = vmatpush1.bf16.msra.mxu1 %v6293_v24  ;;  %6264 = vmatprep.subr.bf16.mxu0 %v6263_v25  ;;  %v6281_v24 = vpack.c.bf16 %v1398_v16, %v1394_v15  ;;  %v6313_v25 = vpack.c.bf16 %v1400_v19, %v1396_v17  ;;  %v6315_v30 = vpack.c.bf16 %v1409_v23, %v1405_v22  ;;  %v1717_v15 = vld [vmem:[#allocation15 + $0xd8] sm:$0xff]  ;;  %v1718_v19 = vld [vmem:[#allocation15 + $0xe0] sm:$0xff]  ;;  %v1720_v22 = vld [vmem:[#allocation15 + $0xf0] sm:$0xff] }
 0x2f7   :  { %6296 = vmatprep.subr.bf16.mxu1 %v6295_v29  ;;  %v1404_v29 = vld [vmem:[#allocation14 + $0x1d0] sm:$0xff]  ;;  %v1721_v16 = vld [vmem:[#allocation15 + $0xf8] sm:$0xff]  ;;  %v8756_v17 = vpack.c.bf16 %v1712_v9, %v1708_v8  ;;  %v1743_v62 = vld [vmem:[#allocation15 + $0x1a8] sm:$0xff] }
 0x2f8   :  { %v8763_v23 = vpack.c.bf16 %v1721_v16, %v1717_v15  ;;  %v1733_v44 = vld [vmem:[#allocation15 + $0x158] sm:$0xff]  ;;  %v1343_v63 = vld [vmem:[%s9784_s29 + $0x28] sm:$0xff]  ;;  %v8811_v9 = vpack.c.bf16 %v1743_v62, %v1739_v60 }
 0x2f9   :  { %6266 = vmatpush1.bf16.msra.mxu0 %v6265_v36  ;;  %v1697_v36 = vld [vmem:[#allocation15 + $0x38] sm:$0xff]  ;;  %v1742_v8 = vld [vmem:[#allocation15 + $0x1a0] sm:$0xff]  ;;  %v1747_v15 = vld [vmem:[#allocation15 + $0x1c8] sm:$0xff] }
 0x2fa   :  { %6298 = vmatpush1.bf16.msra.mxu1 %v6297_v37  ;;  %6268 = vmatprep.subr.bf16.mxu0 %v6267_v38  ;;  %v6285_v37 = vpack.c.bf16 %v1406_v28, %v1402_v27  ;;  %v6317_v38 = vpack.c.bf16 %v1408_v31, %v1404_v29  ;;  %v1725_v28 = vld [vmem:[#allocation15 + $0x118] sm:$0xff]  ;;  %v1722_v31 = vld [vmem:[#allocation15 + $0x100] sm:$0xff]  ;;  %v1751_v16 = vld [vmem:[#allocation15 + $0x1e8] sm:$0xff] }
 0x2fb   :  { %6300 = vmatprep.subr.bf16.mxu1 %v6299_v42  ;;  %v8716_v42 = vpack.c.bf16 %v1697_v36, %v1693_v35  ;;  %v1729_v29 = vld [vmem:[#allocation15 + $0x138] sm:$0xff]  ;;  %v1724_v35 = vld [vmem:[#allocation15 + $0x110] sm:$0xff]  ;;  %v8786_v43 = vpack.c.bf16 %v1726_v32, %v1722_v31 }
 0x2fc   :  { %v1728_v36 = vld [vmem:[#allocation15 + $0x130] sm:$0xff] }
 0x2fd   :  { %6270 = vmatpush1.bf16.msra.mxu0 %v6269_v52  ;;  %v8721_v52 = vpack.c.bf16 %v1694_v41, %v1690_v40  ;;  %v1735_v40 = vld [vmem:[#allocation15 + $0x168] sm:$0xff]  ;;  %v1342_v41 = vld [vmem:[%s9784_s29 + $0x20] sm:$0xff]  ;;  %v1752_v31 = vld [vmem:[#allocation15 + $0x1f0] sm:$0xff] }
 0x2fe   :  { %6302 = vmatpush1.bf16.msra.mxu1 %v6301_v53  ;;  %6272 = vmatprep.subr.bf16.mxu0 %v6271_v54  ;;  %v1701_v53 = vld [vmem:[#allocation15 + $0x58] sm:$0xff] }
 0x2ff   :  { %6304 = vmatprep.subr.bf16.mxu1 %v6303_v58  ;;  %v1705_v54 = vld [vmem:[#allocation15 + $0x78] sm:$0xff]  ;;  %v8727_v58 = vpack.c.bf16 %v1703_v47, %v1699_v45  ;;  %v8790_v47 = vpack.c.bf16 %v1728_v36, %v1724_v35 }
 0x300   :  { %v8729_v61 = vpack.c.bf16 %v1705_v54, %v1701_v53  ;;  %v1737_v45 = vld [vmem:[#allocation15 + $0x178] sm:$0xff]  ;;  %v1734_v53 = vld [vmem:[#allocation15 + $0x160] sm:$0xff] }
 0x301   :  { %6274 = vmatpush1.bf16.msra.mxu0 %v6273_v0  ;;  %v1339_v0 = vld [vmem:[%s9784_s29 + $0x8] sm:$0xff]  ;;  %v8797_v59 = vpack.c.bf16 %v1737_v45, %v1733_v44  ;;  %v1345_v35 = vld [vmem:[%s9784_s29 + $0x38] sm:$0xff]  ;;  %v5481_v45 = vld [vmem:[#allocation9] ss:$0 sm:$0xff] }
 0x302   :  { %6306 = vmatpush1.bf16.msra.mxu1 %v6305_v1  ;;  %6276 = vmatprep.subr.bf16.mxu0 %v6275_v2  ;;  %v8735_v1 = vpack.c.bf16 %v1702_v57, %v1698_v56  ;;  %v1709_v2 = vld [vmem:[#allocation15 + $0x98] sm:$0xff]  ;;  %v1732_v56 = vld [vmem:[#allocation15 + $0x150] sm:$0xff] }
 0x303   :  { %6308 = vmatprep.subr.bf16.mxu1 %v6307_v6  ;;  %v1710_v6 = vld [vmem:[#allocation15 + $0xa0] sm:$0xff]  ;;  %v8746_v10 = vpack.c.bf16 %v1713_v3, %v1709_v2  ;;  %v1736_v57 = vld [vmem:[#allocation15 + $0x170] sm:$0xff]  ;;  %v1741_v2 = vld [vmem:[#allocation15 + $0x198] sm:$0xff] }
 0x304   :  { %v1745_v3 = vld [vmem:[#allocation15 + $0x1b8] sm:$0xff] }
 0x305   :  { %6278 = vmatpush1.bf16.msra.mxu0 %v6277_v12  ;;  %v1719_v12 = vld [vmem:[#allocation15 + $0xe8] sm:$0xff] }
 0x306   :  { %6310 = vmatpush1.bf16.msra.mxu1 %v6309_v13  ;;  %6280 = vmatprep.subr.bf16.mxu0 %v6279_v14  ;;  %v1340_v13 = vld [vmem:[%s9784_s29 + $0x10] sm:$0xff]  ;;  %v8752_v14 = vpack.c.bf16 %v1710_v6, %v1706_v5  ;;  %v8760_v20 = vpack.c.bf16 %v1719_v12, %v1715_v11  ;;  %v8807_v5 = vpack.c.bf16 %v1736_v57, %v1732_v56  ;;  %v1738_v6 = vld [vmem:[#allocation15 + $0x180] sm:$0xff] }
 0x307   :  { %6312 = vmatprep.subr.bf16.mxu1 %v6311_v18  ;;  %v1714_v18 = vld [vmem:[#allocation15 + $0xc0] sm:$0xff]  ;;  %v1740_v11 = vld [vmem:[#allocation15 + $0x190] sm:$0xff] }
 0x308   :  { %v8769_v27 = vpack.c.bf16 %v1718_v19, %v1714_v18  ;;  %v1744_v12 = vld [vmem:[#allocation15 + $0x1b0] sm:$0xff]  ;;  %v8820_v19 = vpack.c.bf16 %v1742_v8, %v1738_v6 }
 0x309   :  { %6282 = vmatpush1.bf16.msra.mxu0 %v6281_v24  ;;  %v1723_v24 = vld [vmem:[#allocation15 + $0x108] sm:$0xff] }
 0x30a   :  { %6314 = vmatpush1.bf16.msra.mxu1 %v6313_v25  ;;  %6284 = vmatprep.subr.bf16.mxu0 %v6283_v26  ;;  %v1727_v25 = vld [vmem:[#allocation15 + $0x128] sm:$0xff]  ;;  %v1341_v26 = vld [vmem:[%s9784_s29 + $0x18] sm:$0xff] }
 0x30b   :  { %6316 = vmatprep.subr.bf16.mxu1 %v6315_v30  ;;  %v8773_v30 = vpack.c.bf16 %v1720_v22, %v1716_v21  ;;  %v8777_v34 = vpack.c.bf16 %v1727_v25, %v1723_v24  ;;  %v1344_v18 = vld [vmem:[%s9784_s29 + $0x30] sm:$0xff]  ;;  %v1749_v21 = vld [vmem:[#allocation15 + $0x1d8] sm:$0xff]  ;;  %v8824_v24 = vpack.c.bf16 %v1744_v12, %v1740_v11  ;;  %v1746_v25 = vld [vmem:[#allocation15 + $0x1c0] sm:$0xff] }
 0x30c   :  { %v1753_v22 = vld [vmem:[#allocation15 + $0x1f8] sm:$0xff] }
 0x30d   :  { %6286 = vmatpush1.bf16.msra.mxu0 %v6285_v37  ;;  %v8780_v37 = vpack.c.bf16 %v1729_v29, %v1725_v28  ;;  %v8828_v28 = vpack.c.bf16 %v1751_v16, %v1747_v15  ;;  %v1748_v29 = vld [vmem:[#allocation15 + $0x1d0] sm:$0xff]  ;;  %v8831_v32 = vpack.c.bf16 %v1753_v22, %v1749_v21 }
 0x30e   :  { %6318 = vmatpush1.bf16.msra.mxu1 %v6317_v38  ;;  %6320 = vmatprep.subr.bf16.mxu0 %v8714_v39  ;;  %v1731_v38 = vld [vmem:[#allocation15 + $0x148] sm:$0xff] }
 0x30f   :  { %6352 = vmatprep.subr.bf16.mxu1 %v8716_v42  ;;  %v8794_v54 = vpack.c.bf16 %v1735_v40, %v1731_v38  ;;  %v8841_v38 = vpack.c.bf16 %v1752_v31, %v1748_v29  ;;  %v1754_v40 = vld [vmem:[#allocation11] sm:$0xff] }
 0x310   :  { %1497 = vmatmul.mubr.f32.vlgmr.msra.gmra.mrb[4].mxu0 %v1338_v51 }
 0x311   :  { %1610 = vmatmul.mubr.f32.vlgmr.msra.gmra.mrb[4].mxu1 %v1338_v51  ;;  %6322 = vmatpush1.bf16.msra.mxu0 %v8721_v52  ;;  %v1730_v51 = vld [vmem:[#allocation15 + $0x140] sm:$0xff] }
 0x312   :  { %6354 = vmatpush1.bf16.msra.mxu1 %v8724_v55  ;;  %1502 = vmatprep.mubr.f32.mxu0 %v8338_v33 }
 0x313   :  { %1615 = vmatprep.mubr.f32.mxu1 %v8338_v33  ;;  %6324 = vmatprep.subr.bf16.mxu0 %v8727_v58 }
 0x314   :  { %1503 = vmatmul.mubr.f32.gmra.mrb[6].mxu0 %v1339_v0  ;;  %6356 = vmatprep.subr.bf16.mxu1 %v8729_v61 }
 0x315   :  { %1616 = vmatmul.mubr.f32.gmra.mrb[6].mxu1 %v1339_v0  ;;  %6326 = vmatpush1.bf16.msra.mxu0 %v8735_v1  ;;  %v8803_v0 = vpack.c.bf16 %v1734_v53, %v1730_v51 }
 0x316   :  { %6358 = vmatpush1.bf16.msra.mxu1 %v8739_v4  ;;  %1508 = vmatprep.mubr.f32.mxu0 %v8338_v33 }
 0x317   :  { %1621 = vmatprep.mubr.f32.mxu1 %v8338_v33  ;;  %6328 = vmatprep.subr.bf16.mxu0 %v8743_v7 }
 0x318   :  { %1509 = vmatmul.mubr.f32.gmra.mrb[8].mxu0 %v1340_v13  ;;  %6360 = vmatprep.subr.bf16.mxu1 %v8746_v10 }
 0x319   :  { %1622 = vmatmul.mubr.f32.gmra.mrb[8].mxu1 %v1340_v13  ;;  %6330 = vmatpush1.bf16.msra.mxu0 %v8752_v14  ;;  %v8814_v13 = vpack.c.bf16 %v1745_v3, %v1741_v2 }
 0x31a   :  { %6362 = vmatpush1.bf16.msra.mxu1 %v8756_v17  ;;  %1514 = vmatprep.mubr.f32.mxu0 %v8338_v33 }
 0x31b   :  { %1627 = vmatprep.mubr.f32.mxu1 %v8338_v33  ;;  %6332 = vmatprep.subr.bf16.mxu0 %v8760_v20 }
 0x31c   :  { %1515 = vmatmul.mubr.f32.gmra.mrb[10].mxu0 %v1341_v26  ;;  %6364 = vmatprep.subr.bf16.mxu1 %v8763_v23 }
 0x31d   :  { %1628 = vmatmul.mubr.f32.gmra.mrb[10].mxu1 %v1341_v26  ;;  %6334 = vmatpush1.bf16.msra.mxu0 %v8769_v27  ;;  %v1750_v26 = vld [vmem:[#allocation15 + $0x1e0] sm:$0xff] }
 0x31e   :  { %6366 = vmatpush1.bf16.msra.mxu1 %v8773_v30  ;;  %1520 = vmatprep.mubr.f32.mxu0 %v8338_v33  ;;  %v8837_v36 = vpack.c.bf16 %v1750_v26, %v1746_v25 }
 0x31f   :  { %1633 = vmatprep.mubr.f32.mxu1 %v8338_v33  ;;  %6336 = vmatprep.subr.bf16.mxu0 %v8777_v34 }
 0x320   :  { %1521 = vmatmul.mubr.f32.gmra.mrb[12].mxu0 %v1342_v41  ;;  %6368 = vmatprep.subr.bf16.mxu1 %v8780_v37 }
 0x321   :  { %1634 = vmatmul.mubr.f32.gmra.mrb[12].mxu1 %v1342_v41  ;;  %6338 = vmatpush1.bf16.msra.mxu0 %v8786_v43 }
 0x322   :  { %6370 = vmatpush1.bf16.msra.mxu1 %v8790_v47  ;;  %1526 = vmatprep.mubr.f32.mxu0 %v8338_v33 }
 0x323   :  { %1639 = vmatprep.mubr.f32.mxu1 %v8338_v33  ;;  %6340 = vmatprep.subr.bf16.mxu0 %v8794_v54 }
 0x324   :  { %1527 = vmatmul.mubr.f32.gmra.mrb[14].mxu0 %v1343_v63  ;;  %6372 = vmatprep.subr.bf16.mxu1 %v8797_v59 }
 0x325   :  { %1640 = vmatmul.mubr.f32.gmra.mrb[14].mxu1 %v1343_v63  ;;  %6342 = vmatpush1.bf16.msra.mxu0 %v8803_v0  ;;  %v1410_v63 = vld [vmem:[#allocation17] sm:$0xf] }
 0x326   :  { %6374 = vmatpush1.bf16.msra.mxu1 %v8807_v5  ;;  %1532 = vmatprep.mubr.f32.mxu0 %v8338_v33  ;;  %v8889_v2 = vrot.slane %v1410_v63, %v8700_v46  ;;  %v8892_v3 = vrot.slane %v1410_v63, %v8704_v49  ;;  %v8897_v21 = vrot.slane %v1410_v63, %v8706_v50 }
 0x327   :  { %1645 = vmatprep.mubr.f32.mxu1 %v8338_v33  ;;  %6344 = vmatprep.subr.bf16.mxu0 %v8811_v9  ;;  %v8901_v26 = vrot.slane %v1410_v63, %v8702_v48 }
 0x328   :  { %1533 = vmatmul.mubr.f32.gmra.mrb[16].mxu0 %v1344_v18  ;;  %6376 = vmatprep.subr.bf16.mxu1 %v8814_v13 }
 0x329   :  { %1646 = vmatmul.mubr.f32.gmra.mrb[16].mxu1 %v1344_v18  ;;  %6346 = vmatpush1.bf16.msra.mxu0 %v8820_v19 }
 0x32a   :  { %6378 = vmatpush1.bf16.msra.mxu1 %v8824_v24  ;;  %1538 = vmatprep.mubr.f32.mxu0 %v8338_v33 }
 0x32b   :  { %1651 = vmatprep.mubr.f32.mxu1 %v8338_v33  ;;  %6348 = vmatprep.subr.bf16.mxu0 %v8828_v28 }
 0x32c   :  { %1539 = vmatmul.mubr.f32.gmra.mrb[18].mxu0 %v1345_v35  ;;  %6380 = vmatprep.subr.bf16.mxu1 %v8831_v32 }
 0x32d   :  { %1652 = vmatmul.mubr.f32.gmra.mrb[18].mxu1 %v1345_v35  ;;  %6350 = vmatpush1.bf16.msra.mxu0 %v8837_v36 }
 0x32e   :  { %6382 = vmatpush1.bf16.msra.mxu1 %v8841_v38  ;;  %1827 = vmatprep.mubr.f32.mxu0 %v8338_v33 }
 0x32f   :  { %1898 = vmatprep.mubr.f32.mxu1 %v8338_v33  ;;  %6384 = vmatprep.subr.bf16.mxu0 %v8714_v39 }
 0x330   :  { %1828 = vmatmul.mubr.f32.vlgmr.msra.gmra.mrb[4].mxu0 %v1754_v40  ;;  %6416 = vmatprep.subr.bf16.mxu1 %v8716_v42 }
 0x331   :  { %1899 = vmatmul.mubr.f32.vlgmr.msra.gmra.mrb[4].mxu1 %v1754_v40  ;;  %6386 = vmatpush1.bf16.msra.mxu0 %v8721_v52 }
 0x332   :  { %6418 = vmatpush1.bf16.msra.mxu1 %v8724_v55  ;;  %6388 = vmatprep.subr.bf16.mxu0 %v8727_v58 }
 0x333   :  { %6420 = vmatprep.subr.bf16.mxu1 %v8729_v61  ;;  %2005 = vmatprep.mubr.f32.mxu0 %v8338_v33 }
 0x334   :  { %2076 = vmatprep.mubr.f32.mxu1 %v8338_v33 }
 0x335   :  { %6390 = vmatpush1.bf16.msra.mxu0 %v8735_v1 }
 0x336   :  { %6422 = vmatpush1.bf16.msra.mxu1 %v8739_v4  ;;  %6392 = vmatprep.subr.bf16.mxu0 %v8743_v7 }
 0x337   :  { %6424 = vmatprep.subr.bf16.mxu1 %v8746_v10 }
 0x339   :  { %6394 = vmatpush1.bf16.msra.mxu0 %v8752_v14 }
 0x33a   :  { %6426 = vmatpush1.bf16.msra.mxu1 %v8756_v17  ;;  %6396 = vmatprep.subr.bf16.mxu0 %v8760_v20 }
 0x33b   :  { %6428 = vmatprep.subr.bf16.mxu1 %v8763_v23 }
 0x33d   :  { %6398 = vmatpush1.bf16.msra.mxu0 %v8769_v27 }
 0x33e   :  { %6430 = vmatpush1.bf16.msra.mxu1 %v8773_v30  ;;  %6400 = vmatprep.subr.bf16.mxu0 %v8777_v34 }
 0x33f   :  { %6432 = vmatprep.subr.bf16.mxu1 %v8780_v37 }
 0x341   :  { %6402 = vmatpush1.bf16.msra.mxu0 %v8786_v43 }
 0x342   :  { %6434 = vmatpush1.bf16.msra.mxu1 %v8790_v47  ;;  %6404 = vmatprep.subr.bf16.mxu0 %v8794_v54 }
 0x343   :  { %6436 = vmatprep.subr.bf16.mxu1 %v8797_v59 }
 0x345   :  { %6406 = vmatpush1.bf16.msra.mxu0 %v8803_v0 }
 0x346   :  { %6438 = vmatpush1.bf16.msra.mxu1 %v8807_v5  ;;  %6408 = vmatprep.subr.bf16.mxu0 %v8811_v9 }
 0x347   :  { %6440 = vmatprep.subr.bf16.mxu1 %v8814_v13 }
 0x349   :  { %6410 = vmatpush1.bf16.msra.mxu0 %v8820_v19 }
 0x34a   :  { %6442 = vmatpush1.bf16.msra.mxu1 %v8824_v24  ;;  %6412 = vmatprep.subr.bf16.mxu0 %v8828_v28 }
 0x34b   :  { %6444 = vmatprep.subr.bf16.mxu1 %v8831_v32 }
 0x34d   :  { %6414 = vmatpush1.bf16.msra.mxu0 %v8837_v36 }
 0x34e   :  { %6446 = vmatpush1.bf16.msra.mxu1 %v8841_v38  ;;  %6448 = vmatprep.subr.bf16.mxu0 %v8714_v39 }
 0x34f   :  { %6480 = vmatprep.subr.bf16.mxu1 %v8716_v42 }
 0x3c3   :  { %v5569_v41 = vpop.f32.mrb[2].mxu0 }
 0x3c4   :  { %v5604_v44 = vpop.f32.mrb[2].mxu1  ;;  %v5570_v51 = vpop.f32.mrb[3].mxu0 }
 0x3c5   :  { %v5571_v53 = vadd.f32 %v5570_v51, %v5569_v41  ;;  %v5605_v56 = vpop.f32.mrb[3].mxu1 }
 0x3c6   :  { %v5606_v57 = vadd.f32 %v5605_v56, %v5604_v44 }
 0x3c7   :  { %v1264_v60 = vadd.f32 %v5571_v53, %v5481_v45  ;;  %v1755_v53 = vld [vmem:[#allocation12] sm:$0xff] }
 0x3c9   :  { %v8886_v62 = vadd.f32 %v5606_v57, %v1264_v60 }
 0x403   :  { %v1829_v6 = vpop.f32.mrb[4].mxu0 }
 0x404   :  { %v7501_v8 = vadd.f32 %v1829_v6, %v8889_v2  ;;  %v1900_v11 = vpop.f32.mrb[4].mxu1  ;;  %v1831_v12 = vpop.f32.mrb[5].mxu0 }
 0x405   :  { %v7502_v15 = vadd.f32 %v1831_v12, %v8892_v3  ;;  %v1902_v16 = vpop.f32.mrb[5].mxu1  ;;  %v7517_v31 = vadd.f32 %v1900_v11, %v8901_v26 }
 0x406   :  { %v5482_v18 = vmul.f32 -1.442695, %v7501_v8  ;;  %v7518_v25 = vadd.f32 %v1902_v16, %v8897_v21 }
 0x407   :  { %v5483_v22 = vmul.f32 -1.442695, %v7502_v15 }
 0x408   :  { %7663 = vpow2.f32 %v5482_v18  ;;  %v5484_v29 = vmul.f32 -1.442695, %v7518_v25 }
 0x409   :  { %7665 = vpow2.f32 %v5483_v22 }
 0x40a   :  { %7667 = vpow2.f32 %v5484_v29 }
 0x40b   :  { %7669 = vtanh.f32 %v7517_v31 }
 0x412   :  { %v7664_v35 = vpop.eup %7663 }
 0x413   :  { %v7666_v40 = vpop.eup %7665  ;;  %v1912_v41 = vadd.f32 1.0, %v7664_v35 }
 0x414   :  { %v1918_v44 = vadd.f32 1.0, %v7666_v40  ;;  %v7668_v45 = vpop.eup %7667 }
 0x415   :  { %7671 = vrcp.f32 %v1912_v41  ;;  %v7670_v51 = vpop.eup %7669  ;;  %v1925_v6 = vadd.f32 1.0, %v7668_v45 }
 0x416   :  { %7673 = vrcp.f32 %v1918_v44 }
 0x417   :  { %7675 = vrcp.f32 %v1925_v6 }
 0x41f   :  { %v7672_v56 = vpop.eup %7671 }
 0x420   :  { %v7674_v57 = vpop.eup %7673  ;;  %v1929_v60 = vmul.f32 %v7672_v56, %v7670_v51 }
 0x421   :  { %v1928_v63 = vmul.f32 %v7674_v57, %v1755_v53  ;;  %v7676_v11 = vpop.eup %7675 }
 0x423   :  { %v8904_v8 = vadd.f32 %v1929_v60, %v1928_v63 }
 0x425   :  { %7677 = vtanh.f32 %v8904_v8 }
 0x42f   :  { %v7678_v12 = vpop.eup %7677 }
 0x430   :  { %v8907_v15 = vmul.f32 %v7678_v12, %v7676_v11 }
 0x432   :  { %2006 = vmatmul.mubr.f32.vlgmr.msra.gmra.mrb[6].mxu0 %v8907_v15  ;;  %2077 = vmatmul.mubr.f32.vlgmr.msra.gmra.mrb[6].mxu1 %v8907_v15 }
 0x433   :  { %6450 = vmatpush1.bf16.msra.mxu0 %v8721_v52  ;;  %6482 = vmatpush1.bf16.msra.mxu1 %v8724_v55 }
 0x434   :  { %6452 = vmatprep.subr.bf16.mxu0 %v8727_v58  ;;  %6484 = vmatprep.subr.bf16.mxu1 %v8729_v61 }
 0x435   :  { %2184 = vmatprep.mubr.f32.mxu0 %v8338_v33  ;;  %2255 = vmatprep.mubr.f32.mxu1 %v8338_v33 }
 0x437   :  { %6454 = vmatpush1.bf16.msra.mxu0 %v8735_v1  ;;  %6486 = vmatpush1.bf16.msra.mxu1 %v8739_v4 }
 0x438   :  { %6456 = vmatprep.subr.bf16.mxu0 %v8743_v7  ;;  %6488 = vmatprep.subr.bf16.mxu1 %v8746_v10 }
 0x43b   :  { %6458 = vmatpush1.bf16.msra.mxu0 %v8752_v14  ;;  %6490 = vmatpush1.bf16.msra.mxu1 %v8756_v17 }
 0x43c   :  { %6460 = vmatprep.subr.bf16.mxu0 %v8760_v20  ;;  %6492 = vmatprep.subr.bf16.mxu1 %v8763_v23 }
 0x43f   :  { %6462 = vmatpush1.bf16.msra.mxu0 %v8769_v27  ;;  %6494 = vmatpush1.bf16.msra.mxu1 %v8773_v30 }
 0x440   :  { %6464 = vmatprep.subr.bf16.mxu0 %v8777_v34  ;;  %6496 = vmatprep.subr.bf16.mxu1 %v8780_v37 }
 0x443   :  { %6466 = vmatpush1.bf16.msra.mxu0 %v8786_v43  ;;  %6498 = vmatpush1.bf16.msra.mxu1 %v8790_v47 }
 0x444   :  { %6468 = vmatprep.subr.bf16.mxu0 %v8794_v54  ;;  %6500 = vmatprep.subr.bf16.mxu1 %v8797_v59 }
 0x447   :  { %6470 = vmatpush1.bf16.msra.mxu0 %v8803_v0  ;;  %6502 = vmatpush1.bf16.msra.mxu1 %v8807_v5 }
 0x448   :  { %6472 = vmatprep.subr.bf16.mxu0 %v8811_v9  ;;  %6504 = vmatprep.subr.bf16.mxu1 %v8814_v13 }
 0x44b   :  { %6474 = vmatpush1.bf16.msra.mxu0 %v8820_v19  ;;  %6506 = vmatpush1.bf16.msra.mxu1 %v8824_v24 }
 0x44c   :  { %6476 = vmatprep.subr.bf16.mxu0 %v8828_v28  ;;  %6508 = vmatprep.subr.bf16.mxu1 %v8831_v32 }
 0x44f   :  { %6478 = vmatpush1.bf16.msra.mxu0 %v8837_v36  ;;  %6510 = vmatpush1.bf16.msra.mxu1 %v8841_v38 }
 0x450   :  { %6512 = vmatprep.subr.bf16.mxu0 %v8714_v39  ;;  %6544 = vmatprep.subr.bf16.mxu1 %v8716_v42 }
 0x505   :  { %v2007_v16 = vpop.f32.mrb[6].mxu0  ;;  %v2078_v18 = vpop.f32.mrb[6].mxu1 }
 0x506   :  { %v7503_v22 = vadd.f32 %v2007_v16, %v8889_v2  ;;  %v2009_v25 = vpop.f32.mrb[7].mxu0  ;;  %v2080_v29 = vpop.f32.mrb[7].mxu1  ;;  %v7519_v45 = vadd.f32 %v2078_v18, %v8901_v26 }
 0x507   :  { %v7504_v31 = vadd.f32 %v2009_v25, %v8892_v3  ;;  %v7520_v41 = vadd.f32 %v2080_v29, %v8897_v21 }
 0x508   :  { %v5485_v35 = vmul.f32 -1.442695, %v7503_v22 }
 0x509   :  { %v5486_v40 = vmul.f32 -1.442695, %v7504_v31  ;;  %v5487_v44 = vmul.f32 -1.442695, %v7520_v41 }
 0x50a   :  { %7679 = vpow2.f32 %v5485_v35 }
 0x50b   :  { %7681 = vpow2.f32 %v5486_v40 }
 0x50c   :  { %7683 = vpow2.f32 %v5487_v44 }
 0x50d   :  { %7685 = vtanh.f32 %v7519_v45 }
 0x514   :  { %v7680_v51 = vpop.eup %7679 }
 0x515   :  { %v7682_v53 = vpop.eup %7681  ;;  %v2090_v56 = vadd.f32 1.0, %v7680_v51 }
 0x516   :  { %v2096_v57 = vadd.f32 1.0, %v7682_v53  ;;  %v7684_v60 = vpop.eup %7683 }
 0x517   :  { %7687 = vrcp.f32 %v2090_v56  ;;  %v7686_v6 = vpop.eup %7685  ;;  %v2103_v16 = vadd.f32 1.0, %v7684_v60 }
 0x518   :  { %7689 = vrcp.f32 %v2096_v57 }
 0x519   :  { %7691 = vrcp.f32 %v2103_v16 }
 0x521   :  { %v7688_v63 = vpop.eup %7687 }
 0x522   :  { %v7690_v11 = vpop.eup %7689  ;;  %v2107_v12 = vmul.f32 %v7688_v63, %v7686_v6 }
 0x523   :  { %v2106_v22 = vmul.f32 %v7690_v11, %v8904_v8  ;;  %v7692_v18 = vpop.eup %7691 }
 0x525   :  { %v8950_v25 = vadd.f32 %v2107_v12, %v2106_v22 }
 0x527   :  { %7693 = vtanh.f32 %v8950_v25 }
 0x531   :  { %v7694_v29 = vpop.eup %7693 }
 0x532   :  { %v8953_v31 = vmul.f32 %v7694_v29, %v7692_v18 }
 0x534   :  { %2185 = vmatmul.mubr.f32.vlgmr.msra.gmra.mrb[8].mxu0 %v8953_v31  ;;  %2256 = vmatmul.mubr.f32.vlgmr.msra.gmra.mrb[8].mxu1 %v8953_v31 }
 0x535   :  { %6514 = vmatpush1.bf16.msra.mxu0 %v8721_v52  ;;  %6546 = vmatpush1.bf16.msra.mxu1 %v8724_v55 }
 0x536   :  { %6516 = vmatprep.subr.bf16.mxu0 %v8727_v58  ;;  %6548 = vmatprep.subr.bf16.mxu1 %v8729_v61 }
 0x537   :  { %2363 = vmatprep.mubr.f32.mxu0 %v8338_v33  ;;  %2434 = vmatprep.mubr.f32.mxu1 %v8338_v33 }
 0x539   :  { %6518 = vmatpush1.bf16.msra.mxu0 %v8735_v1  ;;  %6550 = vmatpush1.bf16.msra.mxu1 %v8739_v4 }
 0x53a   :  { %6520 = vmatprep.subr.bf16.mxu0 %v8743_v7  ;;  %6552 = vmatprep.subr.bf16.mxu1 %v8746_v10 }
 0x53d   :  { %6522 = vmatpush1.bf16.msra.mxu0 %v8752_v14  ;;  %6554 = vmatpush1.bf16.msra.mxu1 %v8756_v17 }
 0x53e   :  { %6524 = vmatprep.subr.bf16.mxu0 %v8760_v20  ;;  %6556 = vmatprep.subr.bf16.mxu1 %v8763_v23 }
 0x541   :  { %6526 = vmatpush1.bf16.msra.mxu0 %v8769_v27  ;;  %6558 = vmatpush1.bf16.msra.mxu1 %v8773_v30 }
 0x542   :  { %6528 = vmatprep.subr.bf16.mxu0 %v8777_v34  ;;  %6560 = vmatprep.subr.bf16.mxu1 %v8780_v37 }
 0x545   :  { %6530 = vmatpush1.bf16.msra.mxu0 %v8786_v43  ;;  %6562 = vmatpush1.bf16.msra.mxu1 %v8790_v47 }
 0x546   :  { %6532 = vmatprep.subr.bf16.mxu0 %v8794_v54  ;;  %6564 = vmatprep.subr.bf16.mxu1 %v8797_v59 }
 0x549   :  { %6534 = vmatpush1.bf16.msra.mxu0 %v8803_v0  ;;  %6566 = vmatpush1.bf16.msra.mxu1 %v8807_v5 }
 0x54a   :  { %6536 = vmatprep.subr.bf16.mxu0 %v8811_v9  ;;  %6568 = vmatprep.subr.bf16.mxu1 %v8814_v13 }
 0x54d   :  { %6538 = vmatpush1.bf16.msra.mxu0 %v8820_v19  ;;  %6570 = vmatpush1.bf16.msra.mxu1 %v8824_v24 }
 0x54e   :  { %6540 = vmatprep.subr.bf16.mxu0 %v8828_v28  ;;  %6572 = vmatprep.subr.bf16.mxu1 %v8831_v32 }
 0x551   :  { %6542 = vmatpush1.bf16.msra.mxu0 %v8837_v36  ;;  %6574 = vmatpush1.bf16.msra.mxu1 %v8841_v38 }
 0x552   :  { %6576 = vmatprep.subr.bf16.mxu0 %v8714_v39  ;;  %6608 = vmatprep.subr.bf16.mxu1 %v8716_v42 }
 0x607   :  { %v2186_v8 = vpop.f32.mrb[8].mxu0  ;;  %v2257_v35 = vpop.f32.mrb[8].mxu1 }
 0x608   :  { %v7505_v40 = vadd.f32 %v2186_v8, %v8889_v2  ;;  %v2188_v41 = vpop.f32.mrb[9].mxu0  ;;  %v2259_v44 = vpop.f32.mrb[9].mxu1  ;;  %v7521_v60 = vadd.f32 %v2257_v35, %v8901_v26 }
 0x609   :  { %v7506_v45 = vadd.f32 %v2188_v41, %v8892_v3  ;;  %v7522_v56 = vadd.f32 %v2259_v44, %v8897_v21 }
 0x60a   :  { %v5488_v51 = vmul.f32 -1.442695, %v7505_v40 }
 0x60b   :  { %v5489_v53 = vmul.f32 -1.442695, %v7506_v45  ;;  %v5490_v57 = vmul.f32 -1.442695, %v7522_v56 }
 0x60c   :  { %7695 = vpow2.f32 %v5488_v51 }
 0x60d   :  { %7697 = vpow2.f32 %v5489_v53 }
 0x60e   :  { %7699 = vpow2.f32 %v5490_v57 }
 0x60f   :  { %7701 = vtanh.f32 %v7521_v60 }
 0x616   :  { %v7696_v6 = vpop.eup %7695 }
 0x617   :  { %v7698_v63 = vpop.eup %7697  ;;  %v2269_v11 = vadd.f32 1.0, %v7696_v6 }
 0x618   :  { %v2275_v12 = vadd.f32 1.0, %v7698_v63  ;;  %v7700_v16 = vpop.eup %7699 }
 0x619   :  { %7703 = vrcp.f32 %v2269_v11  ;;  %v7702_v22 = vpop.eup %7701  ;;  %v2282_v40 = vadd.f32 1.0, %v7700_v16 }
 0x61a   :  { %7705 = vrcp.f32 %v2275_v12 }
 0x61b   :  { %7707 = vrcp.f32 %v2282_v40 }
 0x623   :  { %v7704_v18 = vpop.eup %7703 }
 0x624   :  { %v7706_v29 = vpop.eup %7705  ;;  %v2286_v8 = vmul.f32 %v7704_v18, %v7702_v22 }
 0x625   :  { %v2285_v41 = vmul.f32 %v7706_v29, %v8950_v25  ;;  %v7708_v35 = vpop.eup %7707 }
 0x627   :  { %v8996_v44 = vadd.f32 %v2286_v8, %v2285_v41 }
 0x629   :  { %7709 = vtanh.f32 %v8996_v44 }
 0x633   :  { %v7710_v45 = vpop.eup %7709 }
 0x634   :  { %v8999_v51 = vmul.f32 %v7710_v45, %v7708_v35 }
 0x636   :  { %2364 = vmatmul.mubr.f32.vlgmr.msra.gmra.mrb[10].mxu0 %v8999_v51  ;;  %2435 = vmatmul.mubr.f32.vlgmr.msra.gmra.mrb[10].mxu1 %v8999_v51 }
 0x637   :  { %6578 = vmatpush1.bf16.msra.mxu0 %v8721_v52  ;;  %6610 = vmatpush1.bf16.msra.mxu1 %v8724_v55 }
 0x638   :  { %6580 = vmatprep.subr.bf16.mxu0 %v8727_v58  ;;  %6612 = vmatprep.subr.bf16.mxu1 %v8729_v61 }
 0x639   :  { %2542 = vmatprep.mubr.f32.mxu0 %v8338_v33  ;;  %2613 = vmatprep.mubr.f32.mxu1 %v8338_v33 }
 0x63b   :  { %6582 = vmatpush1.bf16.msra.mxu0 %v8735_v1  ;;  %6614 = vmatpush1.bf16.msra.mxu1 %v8739_v4 }
 0x63c   :  { %6584 = vmatprep.subr.bf16.mxu0 %v8743_v7  ;;  %6616 = vmatprep.subr.bf16.mxu1 %v8746_v10 }
 0x63f   :  { %6586 = vmatpush1.bf16.msra.mxu0 %v8752_v14  ;;  %6618 = vmatpush1.bf16.msra.mxu1 %v8756_v17 }
 0x640   :  { %6588 = vmatprep.subr.bf16.mxu0 %v8760_v20  ;;  %6620 = vmatprep.subr.bf16.mxu1 %v8763_v23 }
 0x643   :  { %6590 = vmatpush1.bf16.msra.mxu0 %v8769_v27  ;;  %6622 = vmatpush1.bf16.msra.mxu1 %v8773_v30 }
 0x644   :  { %6592 = vmatprep.subr.bf16.mxu0 %v8777_v34  ;;  %6624 = vmatprep.subr.bf16.mxu1 %v8780_v37 }
 0x647   :  { %6594 = vmatpush1.bf16.msra.mxu0 %v8786_v43  ;;  %6626 = vmatpush1.bf16.msra.mxu1 %v8790_v47 }
 0x648   :  { %6596 = vmatprep.subr.bf16.mxu0 %v8794_v54  ;;  %6628 = vmatprep.subr.bf16.mxu1 %v8797_v59 }
 0x64b   :  { %6598 = vmatpush1.bf16.msra.mxu0 %v8803_v0  ;;  %6630 = vmatpush1.bf16.msra.mxu1 %v8807_v5 }
 0x64c   :  { %6600 = vmatprep.subr.bf16.mxu0 %v8811_v9  ;;  %6632 = vmatprep.subr.bf16.mxu1 %v8814_v13 }
 0x64f   :  { %6602 = vmatpush1.bf16.msra.mxu0 %v8820_v19  ;;  %6634 = vmatpush1.bf16.msra.mxu1 %v8824_v24 }
 0x650   :  { %6604 = vmatprep.subr.bf16.mxu0 %v8828_v28  ;;  %6636 = vmatprep.subr.bf16.mxu1 %v8831_v32 }
 0x653   :  { %6606 = vmatpush1.bf16.msra.mxu0 %v8837_v36  ;;  %6638 = vmatpush1.bf16.msra.mxu1 %v8841_v38 }
 0x654   :  { %6640 = vmatprep.subr.bf16.mxu0 %v8714_v39  ;;  %6672 = vmatprep.subr.bf16.mxu1 %v8716_v42 }
 0x709   :  { %v2365_v25 = vpop.f32.mrb[10].mxu0  ;;  %v2436_v53 = vpop.f32.mrb[10].mxu1 }
 0x70a   :  { %v7507_v56 = vadd.f32 %v2365_v25, %v8889_v2  ;;  %v2367_v57 = vpop.f32.mrb[11].mxu0  ;;  %v2438_v60 = vpop.f32.mrb[11].mxu1  ;;  %v7523_v22 = vadd.f32 %v2436_v53, %v8901_v26 }
 0x70b   :  { %v7508_v6 = vadd.f32 %v2367_v57, %v8892_v3  ;;  %v7524_v12 = vadd.f32 %v2438_v60, %v8897_v21 }
 0x70c   :  { %v5491_v63 = vmul.f32 -1.442695, %v7507_v56 }
 0x70d   :  { %v5492_v11 = vmul.f32 -1.442695, %v7508_v6  ;;  %v5493_v16 = vmul.f32 -1.442695, %v7524_v12 }
 0x70e   :  { %7711 = vpow2.f32 %v5491_v63 }
 0x70f   :  { %7713 = vpow2.f32 %v5492_v11 }
 0x710   :  { %7715 = vpow2.f32 %v5493_v16 }
 0x711   :  { %7717 = vtanh.f32 %v7523_v22 }
 0x718   :  { %v7712_v18 = vpop.eup %7711 }
 0x719   :  { %v7714_v29 = vpop.eup %7713  ;;  %v2448_v8 = vadd.f32 1.0, %v7712_v18 }
 0x71a   :  { %v2454_v40 = vadd.f32 1.0, %v7714_v29  ;;  %v7716_v41 = vpop.eup %7715 }
 0x71b   :  { %7719 = vrcp.f32 %v2448_v8  ;;  %v7718_v35 = vpop.eup %7717  ;;  %v2461_v57 = vadd.f32 1.0, %v7716_v41 }
 0x71c   :  { %7721 = vrcp.f32 %v2454_v40 }
 0x71d   :  { %7723 = vrcp.f32 %v2461_v57 }
 0x725   :  { %v7720_v45 = vpop.eup %7719 }
 0x726   :  { %v7722_v25 = vpop.eup %7721  ;;  %v2465_v56 = vmul.f32 %v7720_v45, %v7718_v35 }
 0x727   :  { %v2464_v6 = vmul.f32 %v7722_v25, %v8996_v44  ;;  %v7724_v53 = vpop.eup %7723 }
 0x729   :  { %v9042_v60 = vadd.f32 %v2465_v56, %v2464_v6 }
 0x72b   :  { %7725 = vtanh.f32 %v9042_v60 }
 0x735   :  { %v7726_v63 = vpop.eup %7725 }
 0x736   :  { %v9045_v11 = vmul.f32 %v7726_v63, %v7724_v53 }
 0x738   :  { %2543 = vmatmul.mubr.f32.vlgmr.msra.gmra.mrb[12].mxu0 %v9045_v11  ;;  %2614 = vmatmul.mubr.f32.vlgmr.msra.gmra.mrb[12].mxu1 %v9045_v11 }
 0x739   :  { %6642 = vmatpush1.bf16.msra.mxu0 %v8721_v52  ;;  %6674 = vmatpush1.bf16.msra.mxu1 %v8724_v55 }
 0x73a   :  { %6644 = vmatprep.subr.bf16.mxu0 %v8727_v58  ;;  %6676 = vmatprep.subr.bf16.mxu1 %v8729_v61 }
 0x73b   :  { %2721 = vmatprep.mubr.f32.mxu0 %v8338_v33  ;;  %2792 = vmatprep.mubr.f32.mxu1 %v8338_v33 }
 0x73d   :  { %6646 = vmatpush1.bf16.msra.mxu0 %v8735_v1  ;;  %6678 = vmatpush1.bf16.msra.mxu1 %v8739_v4 }
 0x73e   :  { %6648 = vmatprep.subr.bf16.mxu0 %v8743_v7  ;;  %6680 = vmatprep.subr.bf16.mxu1 %v8746_v10 }
 0x741   :  { %6650 = vmatpush1.bf16.msra.mxu0 %v8752_v14  ;;  %6682 = vmatpush1.bf16.msra.mxu1 %v8756_v17 }
 0x742   :  { %6652 = vmatprep.subr.bf16.mxu0 %v8760_v20  ;;  %6684 = vmatprep.subr.bf16.mxu1 %v8763_v23 }
 0x745   :  { %6654 = vmatpush1.bf16.msra.mxu0 %v8769_v27  ;;  %6686 = vmatpush1.bf16.msra.mxu1 %v8773_v30 }
 0x746   :  { %6656 = vmatprep.subr.bf16.mxu0 %v8777_v34  ;;  %6688 = vmatprep.subr.bf16.mxu1 %v8780_v37 }
 0x749   :  { %6658 = vmatpush1.bf16.msra.mxu0 %v8786_v43  ;;  %6690 = vmatpush1.bf16.msra.mxu1 %v8790_v47 }
 0x74a   :  { %6660 = vmatprep.subr.bf16.mxu0 %v8794_v54  ;;  %6692 = vmatprep.subr.bf16.mxu1 %v8797_v59 }
 0x74d   :  { %6662 = vmatpush1.bf16.msra.mxu0 %v8803_v0  ;;  %6694 = vmatpush1.bf16.msra.mxu1 %v8807_v5 }
 0x74e   :  { %6664 = vmatprep.subr.bf16.mxu0 %v8811_v9  ;;  %6696 = vmatprep.subr.bf16.mxu1 %v8814_v13 }
 0x751   :  { %6666 = vmatpush1.bf16.msra.mxu0 %v8820_v19  ;;  %6698 = vmatpush1.bf16.msra.mxu1 %v8824_v24 }
 0x752   :  { %6668 = vmatprep.subr.bf16.mxu0 %v8828_v28  ;;  %6700 = vmatprep.subr.bf16.mxu1 %v8831_v32 }
 0x755   :  { %6670 = vmatpush1.bf16.msra.mxu0 %v8837_v36  ;;  %6702 = vmatpush1.bf16.msra.mxu1 %v8841_v38 }
 0x756   :  { %6704 = vmatprep.subr.bf16.mxu0 %v8714_v39  ;;  %6736 = vmatprep.subr.bf16.mxu1 %v8716_v42 }
 0x80b   :  { %v2544_v44 = vpop.f32.mrb[12].mxu0  ;;  %v2615_v12 = vpop.f32.mrb[12].mxu1 }
 0x80c   :  { %v7509_v16 = vadd.f32 %v2544_v44, %v8889_v2  ;;  %v2546_v22 = vpop.f32.mrb[13].mxu0  ;;  %v2617_v18 = vpop.f32.mrb[13].mxu1  ;;  %v7525_v45 = vadd.f32 %v2615_v12, %v8901_v26 }
 0x80d   :  { %v7510_v29 = vadd.f32 %v2546_v22, %v8892_v3  ;;  %v7526_v41 = vadd.f32 %v2617_v18, %v8897_v21 }
 0x80e   :  { %v5494_v8 = vmul.f32 -1.442695, %v7509_v16 }
 0x80f   :  { %v5495_v40 = vmul.f32 -1.442695, %v7510_v29  ;;  %v5496_v35 = vmul.f32 -1.442695, %v7526_v41 }
 0x810   :  { %7727 = vpow2.f32 %v5494_v8 }
 0x811   :  { %7729 = vpow2.f32 %v5495_v40 }
 0x812   :  { %7731 = vpow2.f32 %v5496_v35 }
 0x813   :  { %7733 = vtanh.f32 %v7525_v45 }
 0x81a   :  { %v7728_v25 = vpop.eup %7727 }
 0x81b   :  { %v7730_v56 = vpop.eup %7729  ;;  %v2627_v57 = vadd.f32 1.0, %v7728_v25 }
 0x81c   :  { %v2633_v6 = vadd.f32 1.0, %v7730_v56  ;;  %v7732_v53 = vpop.eup %7731 }
 0x81d   :  { %7735 = vrcp.f32 %v2627_v57  ;;  %v7734_v63 = vpop.eup %7733  ;;  %v2640_v29 = vadd.f32 1.0, %v7732_v53 }
 0x81e   :  { %7737 = vrcp.f32 %v2633_v6 }
 0x81f   :  { %7739 = vrcp.f32 %v2640_v29 }
 0x827   :  { %v7736_v44 = vpop.eup %7735 }
 0x828   :  { %v7738_v16 = vpop.eup %7737  ;;  %v2644_v22 = vmul.f32 %v7736_v44, %v7734_v63 }
 0x829   :  { %v2643_v8 = vmul.f32 %v7738_v16, %v9042_v60  ;;  %v7740_v12 = vpop.eup %7739 }
 0x82b   :  { %v9088_v18 = vadd.f32 %v2644_v22, %v2643_v8 }
 0x82d   :  { %7741 = vtanh.f32 %v9088_v18 }
 0x837   :  { %v7742_v40 = vpop.eup %7741 }
 0x838   :  { %v9091_v41 = vmul.f32 %v7742_v40, %v7740_v12 }
 0x83a   :  { %2722 = vmatmul.mubr.f32.vlgmr.msra.gmra.mrb[14].mxu0 %v9091_v41  ;;  %2793 = vmatmul.mubr.f32.vlgmr.msra.gmra.mrb[14].mxu1 %v9091_v41 }
 0x83b   :  { %6706 = vmatpush1.bf16.msra.mxu0 %v8721_v52  ;;  %6738 = vmatpush1.bf16.msra.mxu1 %v8724_v55 }
 0x83c   :  { %6708 = vmatprep.subr.bf16.mxu0 %v8727_v58  ;;  %6740 = vmatprep.subr.bf16.mxu1 %v8729_v61 }
 0x83d   :  { %2900 = vmatprep.mubr.f32.mxu0 %v8338_v33  ;;  %2971 = vmatprep.mubr.f32.mxu1 %v8338_v33 }
 0x83f   :  { %6710 = vmatpush1.bf16.msra.mxu0 %v8735_v1  ;;  %6742 = vmatpush1.bf16.msra.mxu1 %v8739_v4 }
 0x840   :  { %6712 = vmatprep.subr.bf16.mxu0 %v8743_v7  ;;  %6744 = vmatprep.subr.bf16.mxu1 %v8746_v10 }
 0x843   :  { %6714 = vmatpush1.bf16.msra.mxu0 %v8752_v14  ;;  %6746 = vmatpush1.bf16.msra.mxu1 %v8756_v17 }
 0x844   :  { %6716 = vmatprep.subr.bf16.mxu0 %v8760_v20  ;;  %6748 = vmatprep.subr.bf16.mxu1 %v8763_v23 }
 0x847   :  { %6718 = vmatpush1.bf16.msra.mxu0 %v8769_v27  ;;  %6750 = vmatpush1.bf16.msra.mxu1 %v8773_v30 }
 0x848   :  { %6720 = vmatprep.subr.bf16.mxu0 %v8777_v34  ;;  %6752 = vmatprep.subr.bf16.mxu1 %v8780_v37 }
 0x84b   :  { %6722 = vmatpush1.bf16.msra.mxu0 %v8786_v43  ;;  %6754 = vmatpush1.bf16.msra.mxu1 %v8790_v47 }
 0x84c   :  { %6724 = vmatprep.subr.bf16.mxu0 %v8794_v54  ;;  %6756 = vmatprep.subr.bf16.mxu1 %v8797_v59 }
 0x84f   :  { %6726 = vmatpush1.bf16.msra.mxu0 %v8803_v0  ;;  %6758 = vmatpush1.bf16.msra.mxu1 %v8807_v5 }
 0x850   :  { %6728 = vmatprep.subr.bf16.mxu0 %v8811_v9  ;;  %6760 = vmatprep.subr.bf16.mxu1 %v8814_v13 }
 0x853   :  { %6730 = vmatpush1.bf16.msra.mxu0 %v8820_v19  ;;  %6762 = vmatpush1.bf16.msra.mxu1 %v8824_v24 }
 0x854   :  { %6732 = vmatprep.subr.bf16.mxu0 %v8828_v28  ;;  %6764 = vmatprep.subr.bf16.mxu1 %v8831_v32 }
 0x857   :  { %6734 = vmatpush1.bf16.msra.mxu0 %v8837_v36  ;;  %6766 = vmatpush1.bf16.msra.mxu1 %v8841_v38 }
 0x858   :  { %6768 = vmatprep.subr.bf16.mxu0 %v8714_v39  ;;  %6800 = vmatprep.subr.bf16.mxu1 %v8716_v42 }
 0x90d   :  { %v2723_v60 = vpop.f32.mrb[14].mxu0  ;;  %v2794_v35 = vpop.f32.mrb[14].mxu1 }
 0x90e   :  { %v7511_v45 = vadd.f32 %v2723_v60, %v8889_v2  ;;  %v2725_v25 = vpop.f32.mrb[15].mxu0  ;;  %v2796_v56 = vpop.f32.mrb[15].mxu1  ;;  %v7527_v16 = vadd.f32 %v2794_v35, %v8901_v26 }
 0x90f   :  { %v7512_v57 = vadd.f32 %v2725_v25, %v8892_v3  ;;  %v7528_v63 = vadd.f32 %v2796_v56, %v8897_v21 }
 0x910   :  { %v5497_v6 = vmul.f32 -1.442695, %v7511_v45 }
 0x911   :  { %v5498_v53 = vmul.f32 -1.442695, %v7512_v57  ;;  %v5499_v44 = vmul.f32 -1.442695, %v7528_v63  ;;  %v3198_v63 = vld [vmem:[#allocation14 + $0x210] sm:$0xff] }
 0x912   :  { %7743 = vpow2.f32 %v5497_v6 }
 0x913   :  { %7745 = vpow2.f32 %v5498_v53 }
 0x914   :  { %7747 = vpow2.f32 %v5499_v44  ;;  %v3202_v44 = vld [vmem:[#allocation14 + $0x230] sm:$0xff] }
 0x915   :  { %7749 = vtanh.f32 %v7527_v16  ;;  %v3205_v16 = vld [vmem:[#allocation14 + $0x248] sm:$0xff] }
 0x91c   :  { %v7744_v39 = vpop.eup %7743 }
 0x91d   :  { %v7746_v22 = vpop.eup %7745  ;;  %v2806_v42 = vadd.f32 1.0, %v7744_v39  ;;  %v3209_v39 = vld [vmem:[#allocation14 + $0x268] sm:$0xff] }
 0x91e   :  { %v2812_v29 = vadd.f32 1.0, %v7746_v22  ;;  %v7748_v8 = vpop.eup %7747  ;;  %v3207_v22 = vld [vmem:[#allocation14 + $0x258] sm:$0xff] }
 0x91f   :  { %7751 = vrcp.f32 %v2806_v42  ;;  %v7750_v12 = vpop.eup %7749  ;;  %v2819_v25 = vadd.f32 1.0, %v7748_v8  ;;  %v3211_v42 = vld [vmem:[#allocation14 + $0x278] sm:$0xff] }
 0x920   :  { %7753 = vrcp.f32 %v2812_v29 }
 0x921   :  { %7755 = vrcp.f32 %v2819_v25 }
 0x929   :  { %v7752_v40 = vpop.eup %7751 }
 0x92a   :  { %v7754_v60 = vpop.eup %7753  ;;  %v2823_v45 = vmul.f32 %v7752_v40, %v7750_v12  ;;  %v6865_v40 = vpack.c.bf16 %v3202_v44, %v3198_v63  ;;  %v3228_v63 = vld [vmem:[#allocation14 + $0x300] sm:$0xff] }
 0x92b   :  { %v2822_v57 = vmul.f32 %v7754_v60, %v9088_v18  ;;  %v7756_v35 = vpop.eup %7755  ;;  %v3200_v18 = vld [vmem:[#allocation14 + $0x220] sm:$0xff] }
 0x92c   :  { %v3204_v60 = vld [vmem:[#allocation14 + $0x240] sm:$0xff] }
 0x92d   :  { %v9134_v56 = vadd.f32 %v2823_v45, %v2822_v57  ;;  %v3208_v45 = vld [vmem:[#allocation14 + $0x260] sm:$0xff]  ;;  %v6835_v57 = vpack.c.bf16 %v3209_v39, %v3205_v16 }
 0x92e   :  { %v3232_v44 = vld [vmem:[#allocation14 + $0x320] sm:$0xff] }
 0x92f   :  { %7757 = vtanh.f32 %v9134_v56 }
 0x939   :  { %v7758_v6 = vpop.eup %7757 }
 0x93a   :  { %v9137_v53 = vmul.f32 %v7758_v6, %v7756_v35  ;;  %v3206_v35 = vld [vmem:[#allocation14 + $0x250] sm:$0xff] }
 0x93b   :  { %v3210_v6 = vld [vmem:[#allocation14 + $0x270] sm:$0xff] }
 0x93c   :  { %2901 = vmatmul.mubr.f32.vlgmr.msra.gmra.mrb[16].mxu0 %v9137_v53  ;;  %2972 = vmatmul.mubr.f32.vlgmr.msra.gmra.mrb[16].mxu1 %v9137_v53 }
 0x93d   :  { %6770 = vmatpush1.bf16.msra.mxu0 %v8721_v52  ;;  %6802 = vmatpush1.bf16.msra.mxu1 %v8724_v55  ;;  %v3197_v52 = vld [vmem:[#allocation14 + $0x208] sm:$0xff] }
 0x93e   :  { %6772 = vmatprep.subr.bf16.mxu0 %v8727_v58  ;;  %6804 = vmatprep.subr.bf16.mxu1 %v8729_v61  ;;  %v3201_v55 = vld [vmem:[#allocation14 + $0x228] sm:$0xff]  ;;  %v3199_v58 = vld [vmem:[#allocation14 + $0x218] sm:$0xff] }
 0x93f   :  { %3079 = vmatprep.mubr.f32.mxu0 %v8338_v33  ;;  %3150 = vmatprep.mubr.f32.mxu1 %v8338_v33  ;;  %v6831_v61 = vpack.c.bf16 %v3201_v55, %v3197_v52  ;;  %v3213_v52 = vld [vmem:[#allocation14 + $0x288] sm:$0xff] }
 0x940   :  { %v3217_v55 = vld [vmem:[#allocation14 + $0x2a8] sm:$0xff] }
 0x941   :  { %6774 = vmatpush1.bf16.msra.mxu0 %v8735_v1  ;;  %6806 = vmatpush1.bf16.msra.mxu1 %v8739_v4  ;;  %v3203_v1 = vld [vmem:[#allocation14 + $0x238] sm:$0xff] }
 0x942   :  { %6776 = vmatprep.subr.bf16.mxu0 %v8743_v7  ;;  %6808 = vmatprep.subr.bf16.mxu1 %v8746_v10  ;;  %v6863_v4 = vpack.c.bf16 %v3203_v1, %v3199_v58  ;;  %v3215_v58 = vld [vmem:[#allocation14 + $0x298] sm:$0xff]  ;;  %v6837_v1 = vpack.c.bf16 %v3208_v45, %v3204_v60  ;;  %v6849_v60 = vpack.c.bf16 %v3232_v44, %v3228_v63  ;;  %v3544_v44 = vld [vmem:[#allocation15 + $0x210] sm:$0xff] }
 0x945   :  { %6778 = vmatpush1.bf16.msra.mxu0 %v8752_v14  ;;  %6810 = vmatpush1.bf16.msra.mxu1 %v8756_v17 }
 0x946   :  { %6780 = vmatprep.subr.bf16.mxu0 %v8760_v20  ;;  %6812 = vmatprep.subr.bf16.mxu1 %v8763_v23 }
 0x949   :  { %6782 = vmatpush1.bf16.msra.mxu0 %v8769_v27  ;;  %6814 = vmatpush1.bf16.msra.mxu1 %v8773_v30 }
 0x94a   :  { %6784 = vmatprep.subr.bf16.mxu0 %v8777_v34  ;;  %6816 = vmatprep.subr.bf16.mxu1 %v8780_v37 }
 0x94d   :  { %6786 = vmatpush1.bf16.msra.mxu0 %v8786_v43  ;;  %6818 = vmatpush1.bf16.msra.mxu1 %v8790_v47 }
 0x94e   :  { %6788 = vmatprep.subr.bf16.mxu0 %v8794_v54  ;;  %6820 = vmatprep.subr.bf16.mxu1 %v8797_v59 }
 0x951   :  { %6790 = vmatpush1.bf16.msra.mxu0 %v8803_v0  ;;  %6822 = vmatpush1.bf16.msra.mxu1 %v8807_v5 }
 0x952   :  { %6792 = vmatprep.subr.bf16.mxu0 %v8811_v9  ;;  %6824 = vmatprep.subr.bf16.mxu1 %v8814_v13 }
 0x955   :  { %6794 = vmatpush1.bf16.msra.mxu0 %v8820_v19  ;;  %6826 = vmatpush1.bf16.msra.mxu1 %v8824_v24 }
 0x956   :  { %6796 = vmatprep.subr.bf16.mxu0 %v8828_v28  ;;  %6828 = vmatprep.subr.bf16.mxu1 %v8831_v32 }
 0x959   :  { %6798 = vmatpush1.bf16.msra.mxu0 %v8837_v36  ;;  %6830 = vmatpush1.bf16.msra.mxu1 %v8841_v38  ;;  %v3196_v38 = vld [vmem:[#allocation14 + $0x200] sm:$0xff] }
 0x95a   :  { %6832 = vmatprep.subr.bf16.mxu0 %v6831_v61  ;;  %6864 = vmatprep.subr.bf16.mxu1 %v6863_v4  ;;  %v6833_v12 = vpack.c.bf16 %v3200_v18, %v3196_v38  ;;  %v3219_v61 = vld [vmem:[#allocation14 + $0x2b8] sm:$0xff]  ;;  %v6869_v4 = vpack.c.bf16 %v3210_v6, %v3206_v35 }
 0xa0f   :  { %v2902_v7 = vpop.f32.mrb[16].mxu0  ;;  %v2973_v10 = vpop.f32.mrb[16].mxu1 }
 0xa10   :  { %v7513_v14 = vadd.f32 %v2902_v7, %v8889_v2  ;;  %v2904_v17 = vpop.f32.mrb[17].mxu0  ;;  %v2975_v20 = vpop.f32.mrb[17].mxu1  ;;  %v7529_v43 = vadd.f32 %v2973_v10, %v8901_v26  ;;  %v3212_v7 = vld [vmem:[#allocation14 + $0x280] sm:$0xff] }
 0xa11   :  { %v7514_v23 = vadd.f32 %v2904_v17, %v8892_v3  ;;  %v7530_v34 = vadd.f32 %v2975_v20, %v8897_v21  ;;  %v3216_v10 = vld [vmem:[#allocation14 + $0x2a0] sm:$0xff]  ;;  %v6871_v17 = vpack.c.bf16 %v3219_v61, %v3215_v58  ;;  %v3214_v20 = vld [vmem:[#allocation14 + $0x290] sm:$0xff]  ;;  %v3245_v58 = vld [vmem:[#allocation14 + $0x388] sm:$0xff] }
 0xa12   :  { %v5500_v27 = vmul.f32 -1.442695, %v7513_v14  ;;  %v6839_v14 = vpack.c.bf16 %v3217_v55, %v3213_v52  ;;  %v3238_v52 = vld [vmem:[#allocation14 + $0x350] sm:$0xff]  ;;  %v3249_v61 = vld [vmem:[#allocation14 + $0x3a8] sm:$0xff] }
 0xa13   :  { %v5501_v30 = vmul.f32 -1.442695, %v7514_v23  ;;  %v5502_v37 = vmul.f32 -1.442695, %v7530_v34  ;;  %v3218_v23 = vld [vmem:[#allocation14 + $0x2b0] sm:$0xff]  ;;  %v3223_v34 = vld [vmem:[#allocation14 + $0x2d8] sm:$0xff] }
 0xa14   :  { %7759 = vpow2.f32 %v5500_v27  ;;  %v3221_v27 = vld [vmem:[#allocation14 + $0x2c8] sm:$0xff]  ;;  %v3242_v55 = vld [vmem:[#allocation14 + $0x370] sm:$0xff] }
 0xa15   :  { %7761 = vpow2.f32 %v5501_v30  ;;  %v3225_v30 = vld [vmem:[#allocation14 + $0x2e8] sm:$0xff] }
 0xa16   :  { %7763 = vpow2.f32 %v5502_v37  ;;  %v3227_v37 = vld [vmem:[#allocation14 + $0x2f8] sm:$0xff] }
 0xa17   :  { %7765 = vtanh.f32 %v7529_v43  ;;  %v6841_v43 = vpack.c.bf16 %v3216_v10, %v3212_v7  ;;  %v6885_v10 = vpack.c.bf16 %v3242_v55, %v3238_v52  ;;  %v3563_v52 = vld [vmem:[#allocation15 + $0x2a8] sm:$0xff]  ;;  %v3561_v55 = vld [vmem:[#allocation15 + $0x298] sm:$0xff] }
 0xa1e   :  { %v7760_v47 = vpop.eup %7759 }
 0xa1f   :  { %v7762_v54 = vpop.eup %7761  ;;  %v2985_v59 = vadd.f32 1.0, %v7760_v47  ;;  %v6873_v47 = vpack.c.bf16 %v3218_v23, %v3214_v20  ;;  %v6855_v20 = vpack.c.bf16 %v3249_v61, %v3245_v58  ;;  %v3565_v61 = vld [vmem:[#allocation15 + $0x2b8] sm:$0xff] }
 0xa20   :  { %v2991_v0 = vadd.f32 1.0, %v7762_v54  ;;  %v7764_v5 = vpop.eup %7763  ;;  %v3220_v54 = vld [vmem:[#allocation14 + $0x2c0] sm:$0xff] }
 0xa21   :  { %7767 = vrcp.f32 %v2985_v59  ;;  %v7766_v9 = vpop.eup %7765  ;;  %v2998_v28 = vadd.f32 1.0, %v7764_v5  ;;  %v3224_v59 = vld [vmem:[#allocation14 + $0x2e0] sm:$0xff]  ;;  %v6875_v5 = vpack.c.bf16 %v3227_v37, %v3223_v34  ;;  %v3253_v34 = vld [vmem:[#allocation14 + $0x3c8] sm:$0xff] }
 0xa22   :  { %7769 = vrcp.f32 %v2991_v0  ;;  %v6843_v0 = vpack.c.bf16 %v3225_v30, %v3221_v27  ;;  %v6845_v38 = vpack.c.bf16 %v3224_v59, %v3220_v54  ;;  %v3246_v27 = vld [vmem:[#allocation14 + $0x390] sm:$0xff]  ;;  %v3257_v37 = vld [vmem:[#allocation14 + $0x3e8] sm:$0xff] }
 0xa23   :  { %7771 = vrcp.f32 %v2998_v28  ;;  %v3231_v28 = vld [vmem:[#allocation14 + $0x318] sm:$0xff]  ;;  %v3250_v30 = vld [vmem:[#allocation14 + $0x3b0] sm:$0xff] }
 0xa24   :  { %v6889_v59 = vpack.c.bf16 %v3250_v30, %v3246_v27  ;;  %v3571_v27 = vld [vmem:[#allocation15 + $0x2e8] sm:$0xff]  ;;  %v3569_v30 = vld [vmem:[#allocation15 + $0x2d8] sm:$0xff] }
 0xa2b   :  { %v7768_v13 = vpop.eup %7767 }
 0xa2c   :  { %v7770_v19 = vpop.eup %7769  ;;  %v3002_v24 = vmul.f32 %v7768_v13, %v7766_v9  ;;  %v3222_v9 = vld [vmem:[#allocation14 + $0x2d0] sm:$0xff] }
 0xa2d   :  { %v3001_v32 = vmul.f32 %v7770_v19, %v9134_v56  ;;  %v7772_v29 = vpop.eup %7771  ;;  %v6867_v56 = vpack.c.bf16 %v3211_v42, %v3207_v22  ;;  %v3226_v13 = vld [vmem:[#allocation14 + $0x2f0] sm:$0xff]  ;;  %v3229_v19 = vld [vmem:[#allocation14 + $0x308] sm:$0xff] }
 0xa2e   :  { %v6877_v18 = vpack.c.bf16 %v3226_v13, %v3222_v9  ;;  %v3230_v22 = vld [vmem:[#allocation14 + $0x310] sm:$0xff]  ;;  %v3256_v13 = vld [vmem:[#allocation14 + $0x3e0] sm:$0xff] }
 0xa2f   :  { %v9178_v36 = vadd.f32 %v3002_v24, %v3001_v32  ;;  %v3233_v24 = vld [vmem:[#allocation14 + $0x328] sm:$0xff]  ;;  %v3235_v32 = vld [vmem:[#allocation14 + $0x338] sm:$0xff]  ;;  %v3234_v42 = vld [vmem:[#allocation14 + $0x330] sm:$0xff] }
 0xa30   :  { %v6847_v16 = vpack.c.bf16 %v3233_v24, %v3229_v19  ;;  %v6879_v39 = vpack.c.bf16 %v3235_v32, %v3231_v28  ;;  %v6881_v45 = vpack.c.bf16 %v3234_v42, %v3230_v22  ;;  %v3254_v19 = vld [vmem:[#allocation14 + $0x3d0] sm:$0xff]  ;;  %v3555_v22 = vld [vmem:[#allocation15 + $0x268] sm:$0xff]  ;;  %v3553_v42 = vld [vmem:[#allocation15 + $0x258] sm:$0xff] }
 0xa31   :  { %7773 = vtanh.f32 %v9178_v36  ;;  %v3258_v24 = vld [vmem:[#allocation14 + $0x3f0] sm:$0xff] }
 0xa32   :  { %v6893_v32 = vpack.c.bf16 %v3258_v24, %v3254_v19  ;;  %v3579_v19 = vld [vmem:[#allocation15 + $0x328] sm:$0xff]  ;;  %v3577_v24 = vld [vmem:[#allocation15 + $0x318] sm:$0xff] }
 0xa3b   :  { %v7774_v8 = vpop.eup %7773 }
 0xa3c   :  { %v9181_v25 = vmul.f32 %v7774_v8, %v7772_v29  ;;  %v3237_v29 = vld [vmem:[#allocation14 + $0x348] sm:$0xff] }
 0xa3d   :  { %v3241_v8 = vld [vmem:[#allocation14 + $0x368] sm:$0xff] }
 0xa3e   :  { %3080 = vmatmul.mubr.f32.vlgmr.msra.gmra.mrb[18].mxu0 %v9181_v25  ;;  %3151 = vmatmul.mubr.f32.vlgmr.msra.gmra.mrb[18].mxu1 %v9181_v25  ;;  %v6851_v35 = vpack.c.bf16 %v3241_v8, %v3237_v29  ;;  %v3557_v8 = vld [vmem:[#allocation15 + $0x278] sm:$0xff] }
 0xa3f   :  { %6834 = vmatpush1.bf16.msra.mxu0 %v6833_v12  ;;  %6866 = vmatpush1.bf16.msra.mxu1 %v6865_v40  ;;  %v3239_v12 = vld [vmem:[#allocation14 + $0x358] sm:$0xff] }
 0xa40   :  { %6836 = vmatprep.subr.bf16.mxu0 %v6835_v57  ;;  %6868 = vmatprep.subr.bf16.mxu1 %v6867_v56  ;;  %v3243_v40 = vld [vmem:[#allocation14 + $0x378] sm:$0xff]  ;;  %v3236_v57 = vld [vmem:[#allocation14 + $0x340] sm:$0xff] }
 0xa41   :  { %3347 = vmatprep.mubr.f32.mxu0 %v8338_v33  ;;  %3460 = vmatprep.mubr.f32.mxu1 %v8338_v33  ;;  %v3240_v56 = vld [vmem:[#allocation14 + $0x360] sm:$0xff]  ;;  %v6883_v6 = vpack.c.bf16 %v3243_v40, %v3239_v12 }
 0xa42   :  { %v6853_v7 = vpack.c.bf16 %v3240_v56, %v3236_v57  ;;  %v3550_v12 = vld [vmem:[#allocation15 + $0x240] sm:$0xff]  ;;  %v3552_v57 = vld [vmem:[#allocation15 + $0x250] sm:$0xff] }
 0xa43   :  { %6838 = vmatpush1.bf16.msra.mxu0 %v6837_v1  ;;  %6870 = vmatpush1.bf16.msra.mxu1 %v6869_v4  ;;  %v3247_v1 = vld [vmem:[#allocation14 + $0x398] sm:$0xff]  ;;  %v3554_v40 = vld [vmem:[#allocation15 + $0x260] sm:$0xff]  ;;  %v3556_v56 = vld [vmem:[#allocation15 + $0x270] sm:$0xff] }
 0xa44   :  { %6840 = vmatprep.subr.bf16.mxu0 %v6839_v14  ;;  %6872 = vmatprep.subr.bf16.mxu1 %v6871_v17  ;;  %v3251_v4 = vld [vmem:[#allocation14 + $0x3b8] sm:$0xff]  ;;  %v3244_v14 = vld [vmem:[#allocation14 + $0x380] sm:$0xff] }
 0xa45   :  { %v3248_v17 = vld [vmem:[#allocation14 + $0x3a0] sm:$0xff]  ;;  %v6887_v23 = vpack.c.bf16 %v3251_v4, %v3247_v1 }
 0xa46   :  { %v6857_v54 = vpack.c.bf16 %v3248_v17, %v3244_v14  ;;  %v3558_v1 = vld [vmem:[#allocation15 + $0x280] sm:$0xff]  ;;  %v3560_v14 = vld [vmem:[#allocation15 + $0x290] sm:$0xff] }
 0xa47   :  { %6842 = vmatpush1.bf16.msra.mxu0 %v6841_v43  ;;  %6874 = vmatpush1.bf16.msra.mxu1 %v6873_v47  ;;  %v3255_v43 = vld [vmem:[#allocation14 + $0x3d8] sm:$0xff]  ;;  %v3562_v4 = vld [vmem:[#allocation15 + $0x2a0] sm:$0xff]  ;;  %v3564_v17 = vld [vmem:[#allocation15 + $0x2b0] sm:$0xff] }
 0xa48   :  { %6844 = vmatprep.subr.bf16.mxu0 %v6843_v0  ;;  %6876 = vmatprep.subr.bf16.mxu1 %v6875_v5  ;;  %v3259_v47 = vld [vmem:[#allocation14 + $0x3f8] sm:$0xff]  ;;  %v3252_v0 = vld [vmem:[#allocation14 + $0x3c0] sm:$0xff]  ;;  %v6859_v5 = vpack.c.bf16 %v3257_v37, %v3253_v34 }
 0xa49   :  { %v6891_v9 = vpack.c.bf16 %v3259_v47, %v3255_v43  ;;  %v6861_v28 = vpack.c.bf16 %v3256_v13, %v3252_v0  ;;  %v3573_v37 = vld [vmem:[#allocation15 + $0x2f8] sm:$0xff]  ;;  %v3566_v43 = vld [vmem:[#allocation15 + $0x2c0] sm:$0xff]  ;;  %v3568_v0 = vld [vmem:[#allocation15 + $0x2d0] sm:$0xff] }
 0xa4a   :  { %v3570_v47 = vld [vmem:[#allocation15 + $0x2e0] sm:$0xff] }
 0xa4b   :  { %6846 = vmatpush1.bf16.msra.mxu0 %v6845_v38  ;;  %6878 = vmatpush1.bf16.msra.mxu1 %v6877_v18  ;;  %v3542_v38 = vld [vmem:[#allocation15 + $0x200] sm:$0xff] }
 0xa4c   :  { %6848 = vmatprep.subr.bf16.mxu0 %v6847_v16  ;;  %6880 = vmatprep.subr.bf16.mxu1 %v6879_v39  ;;  %v3548_v16 = vld [vmem:[#allocation15 + $0x230] sm:$0xff]  ;;  %v3551_v39 = vld [vmem:[#allocation15 + $0x248] sm:$0xff] }
 0xa4d   :  { %v9227_v29 = vpack.c.bf16 %v3555_v22, %v3551_v39 }
 0xa4f   :  { %6850 = vmatpush1.bf16.msra.mxu0 %v6849_v60  ;;  %6882 = vmatpush1.bf16.msra.mxu1 %v6881_v45  ;;  %v9229_v60 = vpack.c.bf16 %v3557_v8, %v3553_v42  ;;  %v9231_v45 = vpack.c.bf16 %v3554_v40, %v3550_v12  ;;  %v3585_v42 = vld [vmem:[#allocation15 + $0x358] sm:$0xff]  ;;  %v3582_v12 = vld [vmem:[#allocation15 + $0x340] sm:$0xff] }
 0xa50   :  { %6852 = vmatprep.subr.bf16.mxu0 %v6851_v35  ;;  %6884 = vmatprep.subr.bf16.mxu1 %v6883_v6  ;;  %v9234_v35 = vpack.c.bf16 %v3556_v56, %v3552_v57  ;;  %v3559_v6 = vld [vmem:[#allocation15 + $0x288] sm:$0xff]  ;;  %v3589_v8 = vld [vmem:[#allocation15 + $0x378] sm:$0xff]  ;;  %v3586_v57 = vld [vmem:[#allocation15 + $0x360] sm:$0xff] }
 0xa51   :  { %v9239_v58 = vpack.c.bf16 %v3563_v52, %v3559_v6  ;;  %v9275_v40 = vpack.c.bf16 %v3589_v8, %v3585_v42  ;;  %v3584_v56 = vld [vmem:[#allocation15 + $0x350] sm:$0xff]  ;;  %v9278_v52 = vpack.c.bf16 %v3586_v57, %v3582_v12 }
 0xa52   :  { %v3588_v6 = vld [vmem:[#allocation15 + $0x370] sm:$0xff] }
 0xa53   :  { %6854 = vmatpush1.bf16.msra.mxu0 %v6853_v7  ;;  %6886 = vmatpush1.bf16.msra.mxu1 %v6885_v10  ;;  %v9241_v7 = vpack.c.bf16 %v3565_v61, %v3561_v55  ;;  %v9243_v10 = vpack.c.bf16 %v3562_v4, %v3558_v1  ;;  %v3591_v55 = vld [vmem:[#allocation15 + $0x388] sm:$0xff]  ;;  %v3593_v1 = vld [vmem:[#allocation15 + $0x398] sm:$0xff]  ;;  %v9282_v4 = vpack.c.bf16 %v3588_v6, %v3584_v56 }
 0xa54   :  { %6856 = vmatprep.subr.bf16.mxu0 %v6855_v20  ;;  %6888 = vmatprep.subr.bf16.mxu1 %v6887_v23  ;;  %v9246_v20 = vpack.c.bf16 %v3564_v17, %v3560_v14  ;;  %v3567_v23 = vld [vmem:[#allocation15 + $0x2c8] sm:$0xff]  ;;  %v3597_v17 = vld [vmem:[#allocation15 + $0x3b8] sm:$0xff] }
 0xa55   :  { %v9251_v34 = vpack.c.bf16 %v3571_v27, %v3567_v23  ;;  %v3595_v61 = vld [vmem:[#allocation15 + $0x3a8] sm:$0xff]  ;;  %v3590_v23 = vld [vmem:[#allocation15 + $0x380] sm:$0xff] }
 0xa56   :  { %v9284_v14 = vpack.c.bf16 %v3595_v61, %v3591_v55  ;;  %v3594_v27 = vld [vmem:[#allocation15 + $0x3a0] sm:$0xff] }
 0xa57   :  { %6858 = vmatpush1.bf16.msra.mxu0 %v6857_v54  ;;  %6890 = vmatpush1.bf16.msra.mxu1 %v6889_v59  ;;  %v9253_v54 = vpack.c.bf16 %v3573_v37, %v3569_v30  ;;  %v9255_v59 = vpack.c.bf16 %v3570_v47, %v3566_v43  ;;  %v9287_v30 = vpack.c.bf16 %v3597_v17, %v3593_v1  ;;  %v3592_v37 = vld [vmem:[#allocation15 + $0x390] sm:$0xff] }
 0xa58   :  { %6860 = vmatprep.subr.bf16.mxu0 %v6859_v5  ;;  %6892 = vmatprep.subr.bf16.mxu1 %v6891_v9  ;;  %v3572_v5 = vld [vmem:[#allocation15 + $0x2f0] sm:$0xff]  ;;  %v3575_v9 = vld [vmem:[#allocation15 + $0x308] sm:$0xff]  ;;  %v9290_v47 = vpack.c.bf16 %v3594_v27, %v3590_v23 }
 0xa59   :  { %v9258_v13 = vpack.c.bf16 %v3572_v5, %v3568_v0  ;;  %v3596_v43 = vld [vmem:[#allocation15 + $0x3b0] sm:$0xff]  ;;  %v3599_v5 = vld [vmem:[#allocation15 + $0x3c8] sm:$0xff] }
 0xa5a   :  { %v9294_v0 = vpack.c.bf16 %v3596_v43, %v3592_v37 }
 0xa5b   :  { %6862 = vmatpush1.bf16.msra.mxu0 %v6861_v28  ;;  %6894 = vmatpush1.bf16.msra.mxu1 %v6893_v32  ;;  %v3581_v28 = vld [vmem:[#allocation15 + $0x338] sm:$0xff]  ;;  %v9262_v32 = vpack.c.bf16 %v3579_v19, %v3575_v9  ;;  %v3603_v9 = vld [vmem:[#allocation15 + $0x3e8] sm:$0xff] }
 0xa5c   :  { %v3601_v19 = vld [vmem:[#allocation15 + $0x3d8] sm:$0xff] }
 0xa5e   :  { %3348 = vmatmul.mubr.f32.vlgmr.msra.gmra.mrb[20].mxu0 %v8907_v15  ;;  %3461 = vmatmul.mubr.f32.vlgmr.msra.gmra.mrb[20].mxu1 %v8907_v15  ;;  %v3543_v15 = vld [vmem:[#allocation15 + $0x208] sm:$0xff] }
 0xa5f   :  { %3353 = vmatprep.mubr.f32.mxu0 %v8338_v33  ;;  %3466 = vmatprep.mubr.f32.mxu1 %v8338_v33 }
 0xa62   :  { %3354 = vmatmul.mubr.f32.gmra.mrb[22].mxu0 %v8953_v31  ;;  %3467 = vmatmul.mubr.f32.gmra.mrb[22].mxu1 %v8953_v31  ;;  %v3547_v31 = vld [vmem:[#allocation15 + $0x228] sm:$0xff] }
 0xa63   :  { %3359 = vmatprep.mubr.f32.mxu0 %v8338_v33  ;;  %3472 = vmatprep.mubr.f32.mxu1 %v8338_v33 }
 0xa66   :  { %3360 = vmatmul.mubr.f32.gmra.mrb[24].mxu0 %v8999_v51  ;;  %3473 = vmatmul.mubr.f32.gmra.mrb[24].mxu1 %v8999_v51  ;;  %v3545_v51 = vld [vmem:[#allocation15 + $0x218] sm:$0xff] }
 0xa67   :  { %3365 = vmatprep.mubr.f32.mxu0 %v8338_v33  ;;  %3478 = vmatprep.mubr.f32.mxu1 %v8338_v33 }
 0xa6a   :  { %3366 = vmatmul.mubr.f32.gmra.mrb[26].mxu0 %v9045_v11  ;;  %3479 = vmatmul.mubr.f32.gmra.mrb[26].mxu1 %v9045_v11  ;;  %v9215_v11 = vpack.c.bf16 %v3547_v31, %v3543_v15  ;;  %v9264_v15 = vpack.c.bf16 %v3581_v28, %v3577_v24  ;;  %v3574_v31 = vld [vmem:[#allocation15 + $0x300] sm:$0xff]  ;;  %v9299_v24 = vpack.c.bf16 %v3603_v9, %v3599_v5  ;;  %v3605_v28 = vld [vmem:[#allocation15 + $0x3f8] sm:$0xff] }
 0xa6b   :  { %3371 = vmatprep.mubr.f32.mxu0 %v8338_v33  ;;  %3484 = vmatprep.mubr.f32.mxu1 %v8338_v33 }
 0xa6c   :  { %6896 = vmatprep.subr.bf16.mxu0 %v9215_v11 }
 0xa6e   :  { %3372 = vmatmul.mubr.f32.gmra.mrb[28].mxu0 %v9091_v41  ;;  %3485 = vmatmul.mubr.f32.gmra.mrb[28].mxu1 %v9091_v41  ;;  %v3549_v41 = vld [vmem:[#allocation15 + $0x238] sm:$0xff] }
 0xa6f   :  { %3377 = vmatprep.mubr.f32.mxu0 %v8338_v33  ;;  %3490 = vmatprep.mubr.f32.mxu1 %v8338_v33  ;;  %v9217_v18 = vpack.c.bf16 %v3549_v41, %v3545_v51  ;;  %v3578_v51 = vld [vmem:[#allocation15 + $0x320] sm:$0xff]  ;;  %v3576_v41 = vld [vmem:[#allocation15 + $0x310] sm:$0xff] }
 0xa71   :  { %6928 = vmatprep.subr.bf16.mxu1 %v9217_v18 }
 0xa72   :  { %3378 = vmatmul.mubr.f32.gmra.mrb[30].mxu0 %v9137_v53  ;;  %3491 = vmatmul.mubr.f32.gmra.mrb[30].mxu1 %v9137_v53  ;;  %v3546_v53 = vld [vmem:[#allocation15 + $0x220] sm:$0xff] }
 0xa73   :  { %3383 = vmatprep.mubr.f32.mxu0 %v8338_v33  ;;  %3496 = vmatprep.mubr.f32.mxu1 %v8338_v33  ;;  %v9219_v63 = vpack.c.bf16 %v3546_v53, %v3542_v38  ;;  %v9267_v38 = vpack.c.bf16 %v3578_v51, %v3574_v31  ;;  %v3580_v53 = vld [vmem:[#allocation15 + $0x330] sm:$0xff]  ;;  %v3598_v31 = vld [vmem:[#allocation15 + $0x3c0] sm:$0xff] }
 0xa74   :  { %v9271_v39 = vpack.c.bf16 %v3580_v53, %v3576_v41  ;;  %v3602_v51 = vld [vmem:[#allocation15 + $0x3e0] sm:$0xff]  ;;  %v9301_v41 = vpack.c.bf16 %v3605_v28, %v3601_v19 }
 0xa75   :  { %6898 = vmatpush1.bf16.msra.mxu0 %v9219_v63  ;;  %v9303_v53 = vpack.c.bf16 %v3602_v51, %v3598_v31 }
 0xa76   :  { %3384 = vmatmul.mubr.f32.gmra.mrb[32].mxu0 %v9181_v25  ;;  %3497 = vmatmul.mubr.f32.gmra.mrb[32].mxu1 %v9181_v25  ;;  %v9222_v25 = vpack.c.bf16 %v3548_v16, %v3544_v44  ;;  %v3583_v44 = vld [vmem:[#allocation15 + $0x348] sm:$0xff] }
 0xa77   :  { %3389 = vmatprep.mubr.f32.mxu0 %v8338_v33  ;;  %3502 = vmatprep.mubr.f32.mxu1 %v8338_v33  ;;  %v3587_v16 = vld [vmem:[#allocation15 + $0x368] sm:$0xff] }
 0xa78   :  { %6930 = vmatpush1.bf16.msra.mxu1 %v9222_v25  ;;  %6900 = vmatprep.subr.bf16.mxu0 %v9227_v29  ;;  %v9273_v22 = vpack.c.bf16 %v3587_v16, %v3583_v44  ;;  %v3600_v44 = vld [vmem:[#allocation15 + $0x3d0] sm:$0xff] }
 0xa79   :  { %6932 = vmatprep.subr.bf16.mxu1 %v9229_v60  ;;  %6902 = vmatpush1.bf16.msra.mxu0 %v9231_v45  ;;  %v3604_v16 = vld [vmem:[#allocation15 + $0x3f0] sm:$0xff] }
 0xa7a   :  { %6904 = vmatprep.subr.bf16.mxu0 %v9239_v58  ;;  %v9306_v42 = vpack.c.bf16 %v3604_v16, %v3600_v44 }
 0xa7c   :  { %6934 = vmatpush1.bf16.msra.mxu1 %v9234_v35 }
 0xa7d   :  { %6936 = vmatprep.subr.bf16.mxu1 %v9241_v7  ;;  %6906 = vmatpush1.bf16.msra.mxu0 %v9243_v10 }
 0xa7e   :  { %6908 = vmatprep.subr.bf16.mxu0 %v9251_v34 }
 0xa80   :  { %6938 = vmatpush1.bf16.msra.mxu1 %v9246_v20 }
 0xa81   :  { %6940 = vmatprep.subr.bf16.mxu1 %v9253_v54  ;;  %6910 = vmatpush1.bf16.msra.mxu0 %v9255_v59 }
 0xa82   :  { %6912 = vmatprep.subr.bf16.mxu0 %v9262_v32 }
 0xa84   :  { %6942 = vmatpush1.bf16.msra.mxu1 %v9258_v13 }
 0xa85   :  { %6944 = vmatprep.subr.bf16.mxu1 %v9264_v15  ;;  %6914 = vmatpush1.bf16.msra.mxu0 %v9267_v38 }
 0xa86   :  { %6916 = vmatprep.subr.bf16.mxu0 %v9273_v22 }
 0xa88   :  { %6946 = vmatpush1.bf16.msra.mxu1 %v9271_v39 }
 0xa89   :  { %6948 = vmatprep.subr.bf16.mxu1 %v9275_v40  ;;  %6918 = vmatpush1.bf16.msra.mxu0 %v9278_v52 }
 0xa8a   :  { %6920 = vmatprep.subr.bf16.mxu0 %v9284_v14 }
 0xa8c   :  { %6950 = vmatpush1.bf16.msra.mxu1 %v9282_v4 }
 0xa8d   :  { %6952 = vmatprep.subr.bf16.mxu1 %v9287_v30  ;;  %6922 = vmatpush1.bf16.msra.mxu0 %v9290_v47 }
 0xa8e   :  { %6924 = vmatprep.subr.bf16.mxu0 %v9299_v24 }
 0xa90   :  { %6954 = vmatpush1.bf16.msra.mxu1 %v9294_v0 }
 0xa91   :  { %6956 = vmatprep.subr.bf16.mxu1 %v9301_v41  ;;  %6926 = vmatpush1.bf16.msra.mxu0 %v9303_v53 }
 0xa92   :  { %6960 = vmatprep.subr.bf16.mxu0 %v9215_v11 }
 0xa94   :  { %6958 = vmatpush1.bf16.msra.mxu1 %v9306_v42 }
 0xa95   :  { %6992 = vmatprep.subr.bf16.mxu1 %v9217_v18 }
 0xb11   :  { %v3081_v8 = vpop.f32.mrb[18].mxu0  ;;  %v3152_v12 = vpop.f32.mrb[18].mxu1 }
 0xb12   :  { %v7515_v57 = vadd.f32 %v3081_v8, %v8889_v2  ;;  %v3083_v56 = vpop.f32.mrb[19].mxu0  ;;  %v3154_v6 = vpop.f32.mrb[19].mxu1  ;;  %v7531_v27 = vadd.f32 %v3152_v12, %v8901_v26  ;;  %v3607_v12 = vld [vmem:[#allocation11 + $0x8] sm:$0xff] }
 0xb13   :  { %v7516_v55 = vadd.f32 %v3083_v56, %v8892_v3  ;;  %v7532_v17 = vadd.f32 %v3154_v6, %v8897_v21 }
 0xb14   :  { %v5503_v61 = vmul.f32 -1.442695, %v7515_v57 }
 0xb15   :  { %v5504_v1 = vmul.f32 -1.442695, %v7516_v55  ;;  %v5505_v23 = vmul.f32 -1.442695, %v7532_v17 }
 0xb16   :  { %7775 = vpow2.f32 %v5503_v61 }
 0xb17   :  { %7777 = vpow2.f32 %v5504_v1 }
 0xb18   :  { %7779 = vpow2.f32 %v5505_v23 }
 0xb19   :  { %7781 = vtanh.f32 %v7531_v27 }
 0xb20   :  { %v7776_v37 = vpop.eup %7775 }
 0xb21   :  { %v7778_v43 = vpop.eup %7777  ;;  %v3164_v5 = vadd.f32 1.0, %v7776_v37 }
 0xb22   :  { %v3170_v9 = vadd.f32 1.0, %v7778_v43  ;;  %v7780_v2 = vpop.eup %7779 }
 0xb23   :  { %7783 = vrcp.f32 %v3164_v5  ;;  %v7782_v19 = vpop.eup %7781  ;;  %v3177_v51 = vadd.f32 1.0, %v7780_v2 }
 0xb24   :  { %7785 = vrcp.f32 %v3170_v9 }
 0xb25   :  { %7787 = vrcp.f32 %v3177_v51  ;;  %v3609_v51 = vld [vmem:[#allocation12 + $0x8] sm:$0xff] }
 0xb2d   :  { %v7784_v3 = vpop.eup %7783 }
 0xb2e   :  { %v7786_v28 = vpop.eup %7785  ;;  %v3181_v31 = vmul.f32 %v7784_v3, %v7782_v19 }
 0xb2f   :  { %v3180_v44 = vmul.f32 %v7786_v28, %v9178_v36  ;;  %v7788_v26 = vpop.eup %7787  ;;  %v3261_v36 = vld [vmem:[#allocation17 + $0x4] sm:$0xf] }
 0xb30   :  { %v9355_v57 = vrot.slane %v3261_v36, %v8700_v46  ;;  %v9358_v56 = vrot.slane %v3261_v36, %v8704_v49  ;;  %v9363_v37 = vrot.slane %v3261_v36, %v8706_v50  ;;  %v9367_v49 = vrot.slane %v3261_v36, %v8702_v48 }
 0xb31   :  { %v3182_v21 = vadd.f32 %v3181_v31, %v3180_v44 }
 0xb33   :  { %7789 = vtanh.f32 %v3182_v21 }
 0xb3d   :  { %v7790_v16 = vpop.eup %7789 }
 0xb3e   :  { %v3184_v8 = vmul.f32 %v7790_v16, %v7788_v26 }
 0xb40   :  { %3390 = vmatmul.mubr.f32.gmra.mrb[34].mxu0 %v3184_v8  ;;  %3503 = vmatmul.mubr.f32.gmra.mrb[34].mxu1 %v3184_v8 }
 0xb41   :  { %3678 = vmatprep.mubr.f32.mxu0 %v8338_v33  ;;  %3749 = vmatprep.mubr.f32.mxu1 %v8338_v33 }
 0xb44   :  { %3679 = vmatmul.mubr.f32.vlgmr.msra.gmra.mrb[20].mxu0 %v3607_v12  ;;  %3750 = vmatmul.mubr.f32.vlgmr.msra.gmra.mrb[20].mxu1 %v3607_v12 }
 0xb45   :  { %6962 = vmatpush1.bf16.msra.mxu0 %v9219_v63  ;;  %6994 = vmatpush1.bf16.msra.mxu1 %v9222_v25 }
 0xb46   :  { %6964 = vmatprep.subr.bf16.mxu0 %v9227_v29  ;;  %6996 = vmatprep.subr.bf16.mxu1 %v9229_v60 }
 0xb47   :  { %3852 = vmatprep.mubr.f32.mxu0 %v8338_v33  ;;  %3923 = vmatprep.mubr.f32.mxu1 %v8338_v33 }
 0xb49   :  { %6966 = vmatpush1.bf16.msra.mxu0 %v9231_v45  ;;  %6998 = vmatpush1.bf16.msra.mxu1 %v9234_v35 }
 0xb4a   :  { %6968 = vmatprep.subr.bf16.mxu0 %v9239_v58  ;;  %7000 = vmatprep.subr.bf16.mxu1 %v9241_v7 }
 0xb4d   :  { %6970 = vmatpush1.bf16.msra.mxu0 %v9243_v10  ;;  %7002 = vmatpush1.bf16.msra.mxu1 %v9246_v20 }
 0xb4e   :  { %6972 = vmatprep.subr.bf16.mxu0 %v9251_v34  ;;  %7004 = vmatprep.subr.bf16.mxu1 %v9253_v54 }
 0xb51   :  { %6974 = vmatpush1.bf16.msra.mxu0 %v9255_v59  ;;  %7006 = vmatpush1.bf16.msra.mxu1 %v9258_v13 }
 0xb52   :  { %6976 = vmatprep.subr.bf16.mxu0 %v9262_v32  ;;  %7008 = vmatprep.subr.bf16.mxu1 %v9264_v15 }
 0xb55   :  { %6978 = vmatpush1.bf16.msra.mxu0 %v9267_v38  ;;  %7010 = vmatpush1.bf16.msra.mxu1 %v9271_v39 }
 0xb56   :  { %6980 = vmatprep.subr.bf16.mxu0 %v9273_v22  ;;  %7012 = vmatprep.subr.bf16.mxu1 %v9275_v40 }
 0xb59   :  { %6982 = vmatpush1.bf16.msra.mxu0 %v9278_v52  ;;  %7014 = vmatpush1.bf16.msra.mxu1 %v9282_v4 }
 0xb5a   :  { %6984 = vmatprep.subr.bf16.mxu0 %v9284_v14  ;;  %7016 = vmatprep.subr.bf16.mxu1 %v9287_v30 }
 0xb5d   :  { %6986 = vmatpush1.bf16.msra.mxu0 %v9290_v47  ;;  %7018 = vmatpush1.bf16.msra.mxu1 %v9294_v0 }
 0xb5e   :  { %6988 = vmatprep.subr.bf16.mxu0 %v9299_v24  ;;  %7020 = vmatprep.subr.bf16.mxu1 %v9301_v41 }
 0xb61   :  { %6990 = vmatpush1.bf16.msra.mxu0 %v9303_v53  ;;  %7022 = vmatpush1.bf16.msra.mxu1 %v9306_v42 }
 0xb62   :  { %7024 = vmatprep.subr.bf16.mxu0 %v9215_v11  ;;  %7056 = vmatprep.subr.bf16.mxu1 %v9217_v18 }
 0xc17   :  { %v3680_v6 = vpop.f32.mrb[20].mxu0  ;;  %v3751_v55 = vpop.f32.mrb[20].mxu1 }
 0xc18   :  { %v7533_v61 = vadd.f32 %v3680_v6, %v9355_v57  ;;  %v3682_v1 = vpop.f32.mrb[21].mxu0  ;;  %v3753_v17 = vpop.f32.mrb[21].mxu1  ;;  %v7549_v9 = vadd.f32 %v3751_v55, %v9367_v49 }
 0xc19   :  { %v7534_v23 = vadd.f32 %v3682_v1, %v9358_v56  ;;  %v7550_v46 = vadd.f32 %v3753_v17, %v9363_v37 }
 0xc1a   :  { %v5506_v27 = vmul.f32 -1.442695, %v7533_v61 }
 0xc1b   :  { %v5507_v43 = vmul.f32 -1.442695, %v7534_v23  ;;  %v5508_v5 = vmul.f32 -1.442695, %v7550_v46 }
 0xc1c   :  { %7791 = vpow2.f32 %v5506_v27 }
 0xc1d   :  { %7793 = vpow2.f32 %v5507_v43 }
 0xc1e   :  { %7795 = vpow2.f32 %v5508_v5 }
 0xc1f   :  { %7797 = vtanh.f32 %v7549_v9 }
 0xc26   :  { %v7792_v2 = vpop.eup %7791 }
 0xc27   :  { %v7794_v19 = vpop.eup %7793  ;;  %v3763_v3 = vadd.f32 1.0, %v7792_v2 }
 0xc28   :  { %v3769_v28 = vadd.f32 1.0, %v7794_v19  ;;  %v7796_v50 = vpop.eup %7795 }
 0xc29   :  { %7799 = vrcp.f32 %v3763_v3  ;;  %v7798_v31 = vpop.eup %7797  ;;  %v3776_v16 = vadd.f32 1.0, %v7796_v50 }
 0xc2a   :  { %7801 = vrcp.f32 %v3769_v28 }
 0xc2b   :  { %7803 = vrcp.f32 %v3776_v16 }
 0xc33   :  { %v7800_v44 = vpop.eup %7799 }
 0xc34   :  { %v7802_v21 = vpop.eup %7801  ;;  %v3780_v26 = vmul.f32 %v7800_v44, %v7798_v31 }
 0xc35   :  { %v3779_v48 = vmul.f32 %v7802_v21, %v3609_v51  ;;  %v7804_v12 = vpop.eup %7803 }
 0xc37   :  { %v9370_v8 = vadd.f32 %v3780_v26, %v3779_v48 }
 0xc39   :  { %7805 = vtanh.f32 %v9370_v8 }
 0xc43   :  { %v7806_v36 = vpop.eup %7805 }
 0xc44   :  { %v3783_v6 = vmul.f32 %v7806_v36, %v7804_v12 }
 0xc46   :  { %3853 = vmatmul.mubr.f32.vlgmr.msra.gmra.mrb[22].mxu0 %v3783_v6  ;;  %3924 = vmatmul.mubr.f32.vlgmr.msra.gmra.mrb[22].mxu1 %v3783_v6 }
 0xc47   :  { %7026 = vmatpush1.bf16.msra.mxu0 %v9219_v63  ;;  %7058 = vmatpush1.bf16.msra.mxu1 %v9222_v25 }
 0xc48   :  { %7028 = vmatprep.subr.bf16.mxu0 %v9227_v29  ;;  %7060 = vmatprep.subr.bf16.mxu1 %v9229_v60 }
 0xc49   :  { %4026 = vmatprep.mubr.f32.mxu0 %v8338_v33  ;;  %4097 = vmatprep.mubr.f32.mxu1 %v8338_v33 }
 0xc4b   :  { %7030 = vmatpush1.bf16.msra.mxu0 %v9231_v45  ;;  %7062 = vmatpush1.bf16.msra.mxu1 %v9234_v35 }
 0xc4c   :  { %7032 = vmatprep.subr.bf16.mxu0 %v9239_v58  ;;  %7064 = vmatprep.subr.bf16.mxu1 %v9241_v7 }
 0xc4f   :  { %7034 = vmatpush1.bf16.msra.mxu0 %v9243_v10  ;;  %7066 = vmatpush1.bf16.msra.mxu1 %v9246_v20 }
 0xc50   :  { %7036 = vmatprep.subr.bf16.mxu0 %v9251_v34  ;;  %7068 = vmatprep.subr.bf16.mxu1 %v9253_v54 }
 0xc53   :  { %7038 = vmatpush1.bf16.msra.mxu0 %v9255_v59  ;;  %7070 = vmatpush1.bf16.msra.mxu1 %v9258_v13 }
 0xc54   :  { %7040 = vmatprep.subr.bf16.mxu0 %v9262_v32  ;;  %7072 = vmatprep.subr.bf16.mxu1 %v9264_v15 }
 0xc57   :  { %7042 = vmatpush1.bf16.msra.mxu0 %v9267_v38  ;;  %7074 = vmatpush1.bf16.msra.mxu1 %v9271_v39 }
 0xc58   :  { %7044 = vmatprep.subr.bf16.mxu0 %v9273_v22  ;;  %7076 = vmatprep.subr.bf16.mxu1 %v9275_v40 }
 0xc5b   :  { %7046 = vmatpush1.bf16.msra.mxu0 %v9278_v52  ;;  %7078 = vmatpush1.bf16.msra.mxu1 %v9282_v4 }
 0xc5c   :  { %7048 = vmatprep.subr.bf16.mxu0 %v9284_v14  ;;  %7080 = vmatprep.subr.bf16.mxu1 %v9287_v30 }
 0xc5f   :  { %7050 = vmatpush1.bf16.msra.mxu0 %v9290_v47  ;;  %7082 = vmatpush1.bf16.msra.mxu1 %v9294_v0 }
 0xc60   :  { %7052 = vmatprep.subr.bf16.mxu0 %v9299_v24  ;;  %7084 = vmatprep.subr.bf16.mxu1 %v9301_v41 }
 0xc63   :  { %7054 = vmatpush1.bf16.msra.mxu0 %v9303_v53  ;;  %7086 = vmatpush1.bf16.msra.mxu1 %v9306_v42 }
 0xc64   :  { %7088 = vmatprep.subr.bf16.mxu0 %v9215_v11  ;;  %7120 = vmatprep.subr.bf16.mxu1 %v9217_v18 }
 0xd19   :  { %v3854_v55 = vpop.f32.mrb[22].mxu0  ;;  %v3925_v61 = vpop.f32.mrb[22].mxu1 }
 0xd1a   :  { %v7535_v1 = vadd.f32 %v3854_v55, %v9355_v57  ;;  %v3856_v17 = vpop.f32.mrb[23].mxu0  ;;  %v3927_v23 = vpop.f32.mrb[23].mxu1  ;;  %v7551_v2 = vadd.f32 %v3925_v61, %v9367_v49 }
 0xd1b   :  { %v7536_v27 = vadd.f32 %v3856_v17, %v9358_v56  ;;  %v7552_v5 = vadd.f32 %v3927_v23, %v9363_v37 }
 0xd1c   :  { %v5509_v43 = vmul.f32 -1.442695, %v7535_v1 }
 0xd1d   :  { %v5510_v46 = vmul.f32 -1.442695, %v7536_v27  ;;  %v5511_v9 = vmul.f32 -1.442695, %v7552_v5 }
 0xd1e   :  { %7807 = vpow2.f32 %v5509_v43 }
 0xd1f   :  { %7809 = vpow2.f32 %v5510_v46 }
 0xd20   :  { %7811 = vpow2.f32 %v5511_v9 }
 0xd21   :  { %7813 = vtanh.f32 %v7551_v2 }
 0xd28   :  { %v7808_v19 = vpop.eup %7807 }
 0xd29   :  { %v7810_v3 = vpop.eup %7809  ;;  %v3937_v28 = vadd.f32 1.0, %v7808_v19 }
 0xd2a   :  { %v3943_v50 = vadd.f32 1.0, %v7810_v3  ;;  %v7812_v31 = vpop.eup %7811 }
 0xd2b   :  { %7815 = vrcp.f32 %v3937_v28  ;;  %v7814_v51 = vpop.eup %7813  ;;  %v3950_v16 = vadd.f32 1.0, %v7812_v31 }
 0xd2c   :  { %7817 = vrcp.f32 %v3943_v50 }
 0xd2d   :  { %7819 = vrcp.f32 %v3950_v16 }
 0xd35   :  { %v7816_v44 = vpop.eup %7815 }
 0xd36   :  { %v7818_v21 = vpop.eup %7817  ;;  %v3954_v26 = vmul.f32 %v7816_v44, %v7814_v51 }
 0xd37   :  { %v3953_v48 = vmul.f32 %v7818_v21, %v9370_v8  ;;  %v7820_v36 = vpop.eup %7819 }
 0xd39   :  { %v9412_v12 = vadd.f32 %v3954_v26, %v3953_v48 }
 0xd3b   :  { %7821 = vtanh.f32 %v9412_v12 }
 0xd45   :  { %v7822_v6 = vpop.eup %7821 }
 0xd46   :  { %v3957_v55 = vmul.f32 %v7822_v6, %v7820_v36 }
 0xd48   :  { %4027 = vmatmul.mubr.f32.vlgmr.msra.gmra.mrb[24].mxu0 %v3957_v55  ;;  %4098 = vmatmul.mubr.f32.vlgmr.msra.gmra.mrb[24].mxu1 %v3957_v55 }
 0xd49   :  { %7090 = vmatpush1.bf16.msra.mxu0 %v9219_v63  ;;  %7122 = vmatpush1.bf16.msra.mxu1 %v9222_v25 }
 0xd4a   :  { %7092 = vmatprep.subr.bf16.mxu0 %v9227_v29  ;;  %7124 = vmatprep.subr.bf16.mxu1 %v9229_v60 }
 0xd4b   :  { %4200 = vmatprep.mubr.f32.mxu0 %v8338_v33  ;;  %4271 = vmatprep.mubr.f32.mxu1 %v8338_v33 }
 0xd4d   :  { %7094 = vmatpush1.bf16.msra.mxu0 %v9231_v45  ;;  %7126 = vmatpush1.bf16.msra.mxu1 %v9234_v35 }
 0xd4e   :  { %7096 = vmatprep.subr.bf16.mxu0 %v9239_v58  ;;  %7128 = vmatprep.subr.bf16.mxu1 %v9241_v7 }
 0xd51   :  { %7098 = vmatpush1.bf16.msra.mxu0 %v9243_v10  ;;  %7130 = vmatpush1.bf16.msra.mxu1 %v9246_v20 }
 0xd52   :  { %7100 = vmatprep.subr.bf16.mxu0 %v9251_v34  ;;  %7132 = vmatprep.subr.bf16.mxu1 %v9253_v54 }
 0xd55   :  { %7102 = vmatpush1.bf16.msra.mxu0 %v9255_v59  ;;  %7134 = vmatpush1.bf16.msra.mxu1 %v9258_v13 }
 0xd56   :  { %7104 = vmatprep.subr.bf16.mxu0 %v9262_v32  ;;  %7136 = vmatprep.subr.bf16.mxu1 %v9264_v15 }
 0xd59   :  { %7106 = vmatpush1.bf16.msra.mxu0 %v9267_v38  ;;  %7138 = vmatpush1.bf16.msra.mxu1 %v9271_v39 }
 0xd5a   :  { %7108 = vmatprep.subr.bf16.mxu0 %v9273_v22  ;;  %7140 = vmatprep.subr.bf16.mxu1 %v9275_v40 }
 0xd5d   :  { %7110 = vmatpush1.bf16.msra.mxu0 %v9278_v52  ;;  %7142 = vmatpush1.bf16.msra.mxu1 %v9282_v4 }
 0xd5e   :  { %7112 = vmatprep.subr.bf16.mxu0 %v9284_v14  ;;  %7144 = vmatprep.subr.bf16.mxu1 %v9287_v30 }
 0xd61   :  { %7114 = vmatpush1.bf16.msra.mxu0 %v9290_v47  ;;  %7146 = vmatpush1.bf16.msra.mxu1 %v9294_v0 }
 0xd62   :  { %7116 = vmatprep.subr.bf16.mxu0 %v9299_v24  ;;  %7148 = vmatprep.subr.bf16.mxu1 %v9301_v41 }
 0xd65   :  { %7118 = vmatpush1.bf16.msra.mxu0 %v9303_v53  ;;  %7150 = vmatpush1.bf16.msra.mxu1 %v9306_v42 }
 0xd66   :  { %7152 = vmatprep.subr.bf16.mxu0 %v9215_v11  ;;  %7184 = vmatprep.subr.bf16.mxu1 %v9217_v18 }
 0xe1b   :  { %v4028_v8 = vpop.f32.mrb[24].mxu0  ;;  %v4099_v61 = vpop.f32.mrb[24].mxu1 }
 0xe1c   :  { %v7537_v1 = vadd.f32 %v4028_v8, %v9355_v57  ;;  %v4030_v17 = vpop.f32.mrb[25].mxu0  ;;  %v4101_v23 = vpop.f32.mrb[25].mxu1  ;;  %v7553_v2 = vadd.f32 %v4099_v61, %v9367_v49 }
 0xe1d   :  { %v7538_v27 = vadd.f32 %v4030_v17, %v9358_v56  ;;  %v7554_v5 = vadd.f32 %v4101_v23, %v9363_v37 }
 0xe1e   :  { %v5512_v43 = vmul.f32 -1.442695, %v7537_v1 }
 0xe1f   :  { %v5513_v46 = vmul.f32 -1.442695, %v7538_v27  ;;  %v5514_v9 = vmul.f32 -1.442695, %v7554_v5 }
 0xe20   :  { %7823 = vpow2.f32 %v5512_v43 }
 0xe21   :  { %7825 = vpow2.f32 %v5513_v46 }
 0xe22   :  { %7827 = vpow2.f32 %v5514_v9 }
 0xe23   :  { %7829 = vtanh.f32 %v7553_v2 }
 0xe2a   :  { %v7824_v19 = vpop.eup %7823 }
 0xe2b   :  { %v7826_v3 = vpop.eup %7825  ;;  %v4111_v28 = vadd.f32 1.0, %v7824_v19 }
 0xe2c   :  { %v4117_v50 = vadd.f32 1.0, %v7826_v3  ;;  %v7828_v31 = vpop.eup %7827 }
 0xe2d   :  { %7831 = vrcp.f32 %v4111_v28  ;;  %v7830_v51 = vpop.eup %7829  ;;  %v4124_v16 = vadd.f32 1.0, %v7828_v31 }
 0xe2e   :  { %7833 = vrcp.f32 %v4117_v50 }
 0xe2f   :  { %7835 = vrcp.f32 %v4124_v16 }
 0xe37   :  { %v7832_v44 = vpop.eup %7831 }
 0xe38   :  { %v7834_v21 = vpop.eup %7833  ;;  %v4128_v26 = vmul.f32 %v7832_v44, %v7830_v51 }
 0xe39   :  { %v4127_v48 = vmul.f32 %v7834_v21, %v9412_v12  ;;  %v7836_v6 = vpop.eup %7835 }
 0xe3b   :  { %v9454_v36 = vadd.f32 %v4128_v26, %v4127_v48 }
 0xe3d   :  { %7837 = vtanh.f32 %v9454_v36 }
 0xe47   :  { %v7838_v55 = vpop.eup %7837 }
 0xe48   :  { %v4131_v8 = vmul.f32 %v7838_v55, %v7836_v6 }
 0xe4a   :  { %4201 = vmatmul.mubr.f32.vlgmr.msra.gmra.mrb[26].mxu0 %v4131_v8  ;;  %4272 = vmatmul.mubr.f32.vlgmr.msra.gmra.mrb[26].mxu1 %v4131_v8 }
 0xe4b   :  { %7154 = vmatpush1.bf16.msra.mxu0 %v9219_v63  ;;  %7186 = vmatpush1.bf16.msra.mxu1 %v9222_v25 }
 0xe4c   :  { %7156 = vmatprep.subr.bf16.mxu0 %v9227_v29  ;;  %7188 = vmatprep.subr.bf16.mxu1 %v9229_v60 }
 0xe4d   :  { %4374 = vmatprep.mubr.f32.mxu0 %v8338_v33  ;;  %4445 = vmatprep.mubr.f32.mxu1 %v8338_v33 }
 0xe4f   :  { %7158 = vmatpush1.bf16.msra.mxu0 %v9231_v45  ;;  %7190 = vmatpush1.bf16.msra.mxu1 %v9234_v35 }
 0xe50   :  { %7160 = vmatprep.subr.bf16.mxu0 %v9239_v58  ;;  %7192 = vmatprep.subr.bf16.mxu1 %v9241_v7 }
 0xe53   :  { %7162 = vmatpush1.bf16.msra.mxu0 %v9243_v10  ;;  %7194 = vmatpush1.bf16.msra.mxu1 %v9246_v20 }
 0xe54   :  { %7164 = vmatprep.subr.bf16.mxu0 %v9251_v34  ;;  %7196 = vmatprep.subr.bf16.mxu1 %v9253_v54 }
 0xe57   :  { %7166 = vmatpush1.bf16.msra.mxu0 %v9255_v59  ;;  %7198 = vmatpush1.bf16.msra.mxu1 %v9258_v13 }
 0xe58   :  { %7168 = vmatprep.subr.bf16.mxu0 %v9262_v32  ;;  %7200 = vmatprep.subr.bf16.mxu1 %v9264_v15 }
 0xe5b   :  { %7170 = vmatpush1.bf16.msra.mxu0 %v9267_v38  ;;  %7202 = vmatpush1.bf16.msra.mxu1 %v9271_v39 }
 0xe5c   :  { %7172 = vmatprep.subr.bf16.mxu0 %v9273_v22  ;;  %7204 = vmatprep.subr.bf16.mxu1 %v9275_v40 }
 0xe5f   :  { %7174 = vmatpush1.bf16.msra.mxu0 %v9278_v52  ;;  %7206 = vmatpush1.bf16.msra.mxu1 %v9282_v4 }
 0xe60   :  { %7176 = vmatprep.subr.bf16.mxu0 %v9284_v14  ;;  %7208 = vmatprep.subr.bf16.mxu1 %v9287_v30 }
 0xe63   :  { %7178 = vmatpush1.bf16.msra.mxu0 %v9290_v47  ;;  %7210 = vmatpush1.bf16.msra.mxu1 %v9294_v0 }
 0xe64   :  { %7180 = vmatprep.subr.bf16.mxu0 %v9299_v24  ;;  %7212 = vmatprep.subr.bf16.mxu1 %v9301_v41 }
 0xe67   :  { %7182 = vmatpush1.bf16.msra.mxu0 %v9303_v53  ;;  %7214 = vmatpush1.bf16.msra.mxu1 %v9306_v42 }
 0xe68   :  { %7216 = vmatprep.subr.bf16.mxu0 %v9215_v11  ;;  %7248 = vmatprep.subr.bf16.mxu1 %v9217_v18 }
 0xf1d   :  { %v4202_v12 = vpop.f32.mrb[26].mxu0  ;;  %v4273_v61 = vpop.f32.mrb[26].mxu1 }
 0xf1e   :  { %v7539_v1 = vadd.f32 %v4202_v12, %v9355_v57  ;;  %v4204_v17 = vpop.f32.mrb[27].mxu0  ;;  %v4275_v23 = vpop.f32.mrb[27].mxu1  ;;  %v7555_v2 = vadd.f32 %v4273_v61, %v9367_v49 }
 0xf1f   :  { %v7540_v27 = vadd.f32 %v4204_v17, %v9358_v56  ;;  %v7556_v5 = vadd.f32 %v4275_v23, %v9363_v37 }
 0xf20   :  { %v5515_v43 = vmul.f32 -1.442695, %v7539_v1 }
 0xf21   :  { %v5516_v46 = vmul.f32 -1.442695, %v7540_v27  ;;  %v5517_v9 = vmul.f32 -1.442695, %v7556_v5 }
 0xf22   :  { %7839 = vpow2.f32 %v5515_v43 }
 0xf23   :  { %7841 = vpow2.f32 %v5516_v46 }
 0xf24   :  { %7843 = vpow2.f32 %v5517_v9 }
 0xf25   :  { %7845 = vtanh.f32 %v7555_v2 }
 0xf2c   :  { %v7840_v19 = vpop.eup %7839 }
 0xf2d   :  { %v7842_v3 = vpop.eup %7841  ;;  %v4285_v28 = vadd.f32 1.0, %v7840_v19 }
 0xf2e   :  { %v4291_v50 = vadd.f32 1.0, %v7842_v3  ;;  %v7844_v31 = vpop.eup %7843 }
 0xf2f   :  { %7847 = vrcp.f32 %v4285_v28  ;;  %v7846_v51 = vpop.eup %7845  ;;  %v4298_v16 = vadd.f32 1.0, %v7844_v31 }
 0xf30   :  { %7849 = vrcp.f32 %v4291_v50 }
 0xf31   :  { %7851 = vrcp.f32 %v4298_v16 }
 0xf39   :  { %v7848_v44 = vpop.eup %7847 }
 0xf3a   :  { %v7850_v21 = vpop.eup %7849  ;;  %v4302_v26 = vmul.f32 %v7848_v44, %v7846_v51 }
 0xf3b   :  { %v4301_v48 = vmul.f32 %v7850_v21, %v9454_v36  ;;  %v7852_v55 = vpop.eup %7851 }
 0xf3d   :  { %v9496_v6 = vadd.f32 %v4302_v26, %v4301_v48 }
 0xf3f   :  { %7853 = vtanh.f32 %v9496_v6 }
 0xf49   :  { %v7854_v8 = vpop.eup %7853 }
 0xf4a   :  { %v4305_v12 = vmul.f32 %v7854_v8, %v7852_v55 }
 0xf4c   :  { %4375 = vmatmul.mubr.f32.vlgmr.msra.gmra.mrb[28].mxu0 %v4305_v12  ;;  %4446 = vmatmul.mubr.f32.vlgmr.msra.gmra.mrb[28].mxu1 %v4305_v12 }
 0xf4d   :  { %7218 = vmatpush1.bf16.msra.mxu0 %v9219_v63  ;;  %7250 = vmatpush1.bf16.msra.mxu1 %v9222_v25 }
 0xf4e   :  { %7220 = vmatprep.subr.bf16.mxu0 %v9227_v29  ;;  %7252 = vmatprep.subr.bf16.mxu1 %v9229_v60 }
 0xf4f   :  { %4548 = vmatprep.mubr.f32.mxu0 %v8338_v33  ;;  %4619 = vmatprep.mubr.f32.mxu1 %v8338_v33 }
 0xf51   :  { %7222 = vmatpush1.bf16.msra.mxu0 %v9231_v45  ;;  %7254 = vmatpush1.bf16.msra.mxu1 %v9234_v35 }
 0xf52   :  { %7224 = vmatprep.subr.bf16.mxu0 %v9239_v58  ;;  %7256 = vmatprep.subr.bf16.mxu1 %v9241_v7 }
 0xf55   :  { %7226 = vmatpush1.bf16.msra.mxu0 %v9243_v10  ;;  %7258 = vmatpush1.bf16.msra.mxu1 %v9246_v20 }
 0xf56   :  { %7228 = vmatprep.subr.bf16.mxu0 %v9251_v34  ;;  %7260 = vmatprep.subr.bf16.mxu1 %v9253_v54 }
 0xf59   :  { %7230 = vmatpush1.bf16.msra.mxu0 %v9255_v59  ;;  %7262 = vmatpush1.bf16.msra.mxu1 %v9258_v13 }
 0xf5a   :  { %7232 = vmatprep.subr.bf16.mxu0 %v9262_v32  ;;  %7264 = vmatprep.subr.bf16.mxu1 %v9264_v15 }
 0xf5d   :  { %7234 = vmatpush1.bf16.msra.mxu0 %v9267_v38  ;;  %7266 = vmatpush1.bf16.msra.mxu1 %v9271_v39 }
 0xf5e   :  { %7236 = vmatprep.subr.bf16.mxu0 %v9273_v22  ;;  %7268 = vmatprep.subr.bf16.mxu1 %v9275_v40 }
 0xf61   :  { %7238 = vmatpush1.bf16.msra.mxu0 %v9278_v52  ;;  %7270 = vmatpush1.bf16.msra.mxu1 %v9282_v4 }
 0xf62   :  { %7240 = vmatprep.subr.bf16.mxu0 %v9284_v14  ;;  %7272 = vmatprep.subr.bf16.mxu1 %v9287_v30 }
 0xf65   :  { %7242 = vmatpush1.bf16.msra.mxu0 %v9290_v47  ;;  %7274 = vmatpush1.bf16.msra.mxu1 %v9294_v0 }
 0xf66   :  { %7244 = vmatprep.subr.bf16.mxu0 %v9299_v24  ;;  %7276 = vmatprep.subr.bf16.mxu1 %v9301_v41 }
 0xf69   :  { %7246 = vmatpush1.bf16.msra.mxu0 %v9303_v53  ;;  %7278 = vmatpush1.bf16.msra.mxu1 %v9306_v42 }
 0xf6a   :  { %7280 = vmatprep.subr.bf16.mxu0 %v9215_v11  ;;  %7312 = vmatprep.subr.bf16.mxu1 %v9217_v18 }
0x101f   :  { %v4376_v36 = vpop.f32.mrb[28].mxu0  ;;  %v4447_v61 = vpop.f32.mrb[28].mxu1 }
0x1020   :  { %v7541_v1 = vadd.f32 %v4376_v36, %v9355_v57  ;;  %v4378_v17 = vpop.f32.mrb[29].mxu0  ;;  %v4449_v23 = vpop.f32.mrb[29].mxu1  ;;  %v7557_v2 = vadd.f32 %v4447_v61, %v9367_v49 }
0x1021   :  { %v7542_v27 = vadd.f32 %v4378_v17, %v9358_v56  ;;  %v7558_v5 = vadd.f32 %v4449_v23, %v9363_v37 }
0x1022   :  { %v5518_v43 = vmul.f32 -1.442695, %v7541_v1 }
0x1023   :  { %v5519_v46 = vmul.f32 -1.442695, %v7542_v27  ;;  %v5520_v9 = vmul.f32 -1.442695, %v7558_v5 }
0x1024   :  { %7855 = vpow2.f32 %v5518_v43 }
0x1025   :  { %7857 = vpow2.f32 %v5519_v46 }
0x1026   :  { %7859 = vpow2.f32 %v5520_v9 }
0x1027   :  { %7861 = vtanh.f32 %v7557_v2 }
0x102e   :  { %v7856_v19 = vpop.eup %7855 }
0x102f   :  { %v7858_v3 = vpop.eup %7857  ;;  %v4459_v28 = vadd.f32 1.0, %v7856_v19 }
0x1030   :  { %v4465_v50 = vadd.f32 1.0, %v7858_v3  ;;  %v7860_v31 = vpop.eup %7859 }
0x1031   :  { %7863 = vrcp.f32 %v4459_v28  ;;  %v7862_v51 = vpop.eup %7861  ;;  %v4472_v16 = vadd.f32 1.0, %v7860_v31 }
0x1032   :  { %7865 = vrcp.f32 %v4465_v50 }
0x1033   :  { %7867 = vrcp.f32 %v4472_v16 }
0x103b   :  { %v7864_v44 = vpop.eup %7863 }
0x103c   :  { %v7866_v21 = vpop.eup %7865  ;;  %v4476_v26 = vmul.f32 %v7864_v44, %v7862_v51 }
0x103d   :  { %v4475_v48 = vmul.f32 %v7866_v21, %v9496_v6  ;;  %v7868_v8 = vpop.eup %7867 }
0x103f   :  { %v9538_v55 = vadd.f32 %v4476_v26, %v4475_v48 }
0x1041   :  { %7869 = vtanh.f32 %v9538_v55 }
0x104b   :  { %v7870_v12 = vpop.eup %7869 }
0x104c   :  { %v4479_v36 = vmul.f32 %v7870_v12, %v7868_v8 }
0x104e   :  { %4549 = vmatmul.mubr.f32.vlgmr.msra.gmra.mrb[30].mxu0 %v4479_v36  ;;  %4620 = vmatmul.mubr.f32.vlgmr.msra.gmra.mrb[30].mxu1 %v4479_v36  ;;  %v5005_v36 = vld [vmem:[#allocation18 + $0x18] sm:$0xff] }
0x104f   :  { %7282 = vmatpush1.bf16.msra.mxu0 %v9219_v63  ;;  %7314 = vmatpush1.bf16.msra.mxu1 %v9222_v25 }
0x1050   :  { %7284 = vmatprep.subr.bf16.mxu0 %v9227_v29  ;;  %7316 = vmatprep.subr.bf16.mxu1 %v9229_v60 }
0x1051   :  { %4722 = vmatprep.mubr.f32.mxu0 %v8338_v33  ;;  %4793 = vmatprep.mubr.f32.mxu1 %v8338_v33 }
0x1053   :  { %7286 = vmatpush1.bf16.msra.mxu0 %v9231_v45  ;;  %7318 = vmatpush1.bf16.msra.mxu1 %v9234_v35 }
0x1054   :  { %7288 = vmatprep.subr.bf16.mxu0 %v9239_v58  ;;  %7320 = vmatprep.subr.bf16.mxu1 %v9241_v7 }
0x1057   :  { %7290 = vmatpush1.bf16.msra.mxu0 %v9243_v10  ;;  %7322 = vmatpush1.bf16.msra.mxu1 %v9246_v20 }
0x1058   :  { %7292 = vmatprep.subr.bf16.mxu0 %v9251_v34  ;;  %7324 = vmatprep.subr.bf16.mxu1 %v9253_v54 }
0x105b   :  { %7294 = vmatpush1.bf16.msra.mxu0 %v9255_v59  ;;  %7326 = vmatpush1.bf16.msra.mxu1 %v9258_v13 }
0x105c   :  { %7296 = vmatprep.subr.bf16.mxu0 %v9262_v32  ;;  %7328 = vmatprep.subr.bf16.mxu1 %v9264_v15 }
0x105f   :  { %7298 = vmatpush1.bf16.msra.mxu0 %v9267_v38  ;;  %7330 = vmatpush1.bf16.msra.mxu1 %v9271_v39 }
0x1060   :  { %7300 = vmatprep.subr.bf16.mxu0 %v9273_v22  ;;  %7332 = vmatprep.subr.bf16.mxu1 %v9275_v40 }
0x1063   :  { %7302 = vmatpush1.bf16.msra.mxu0 %v9278_v52  ;;  %7334 = vmatpush1.bf16.msra.mxu1 %v9282_v4 }
0x1064   :  { %7304 = vmatprep.subr.bf16.mxu0 %v9284_v14  ;;  %7336 = vmatprep.subr.bf16.mxu1 %v9287_v30 }
0x1067   :  { %7306 = vmatpush1.bf16.msra.mxu0 %v9290_v47  ;;  %7338 = vmatpush1.bf16.msra.mxu1 %v9294_v0 }
0x1068   :  { %7308 = vmatprep.subr.bf16.mxu0 %v9299_v24  ;;  %7340 = vmatprep.subr.bf16.mxu1 %v9301_v41 }
0x106b   :  { %7310 = vmatpush1.bf16.msra.mxu0 %v9303_v53  ;;  %7342 = vmatpush1.bf16.msra.mxu1 %v9306_v42 }
0x106c   :  { %7344 = vmatprep.subr.bf16.mxu0 %v9215_v11  ;;  %7376 = vmatprep.subr.bf16.mxu1 %v9217_v18 }
0x1121   :  { %v4550_v6 = vpop.f32.mrb[30].mxu0  ;;  %v4621_v61 = vpop.f32.mrb[30].mxu1 }
0x1122   :  { %v7543_v1 = vadd.f32 %v4550_v6, %v9355_v57  ;;  %v4552_v17 = vpop.f32.mrb[31].mxu0  ;;  %v4623_v23 = vpop.f32.mrb[31].mxu1  ;;  %v7559_v2 = vadd.f32 %v4621_v61, %v9367_v49  ;;  %v5006_v61 = vld [vmem:[#allocation18 + $0x20] sm:$0xff] }
0x1123   :  { %v7544_v27 = vadd.f32 %v4552_v17, %v9358_v56  ;;  %v7560_v5 = vadd.f32 %v4623_v23, %v9363_v37  ;;  %v5008_v23 = vld [vmem:[#allocation18 + $0x30] sm:$0xff] }
0x1124   :  { %v5521_v43 = vmul.f32 -1.442695, %v7543_v1  ;;  %v5007_v1 = vld [vmem:[#allocation18 + $0x28] sm:$0xff] }
0x1125   :  { %v5522_v46 = vmul.f32 -1.442695, %v7544_v27  ;;  %v5523_v9 = vmul.f32 -1.442695, %v7560_v5  ;;  %v7414_v17 = vpack.c.bf16 %v5007_v1, %v5006_v61  ;;  %v5009_v27 = vld [vmem:[#allocation18 + $0x38] sm:$0xff]  ;;  %v5011_v5 = vld [vmem:[#allocation18 + $0x48] sm:$0xff] }
0x1126   :  { %7871 = vpow2.f32 %v5521_v43  ;;  %v7417_v43 = vpack.c.bf16 %v5009_v27, %v5008_v23  ;;  %v5110_v23 = vld [vmem:[#allocation21 + $0x68] sm:$0xff] }
0x1127   :  { %7873 = vpow2.f32 %v5522_v46  ;;  %v5010_v46 = vld [vmem:[#allocation18 + $0x40] sm:$0xff] }
0x1128   :  { %7875 = vpow2.f32 %v5523_v9  ;;  %v7420_v9 = vpack.c.bf16 %v5011_v5, %v5010_v46  ;;  %v5112_v46 = vld [vmem:[#allocation21 + $0x78] sm:$0xff] }
0x1129   :  { %7877 = vtanh.f32 %v7559_v2  ;;  %v5012_v2 = vld [vmem:[#allocation18 + $0x50] sm:$0xff] }
0x1130   :  { %v7872_v11 = vpop.eup %7871 }
0x1131   :  { %v7874_v19 = vpop.eup %7873  ;;  %v4633_v18 = vadd.f32 1.0, %v7872_v11  ;;  %v5013_v11 = vld [vmem:[#allocation18 + $0x58] sm:$0xff] }
0x1132   :  { %v4639_v3 = vadd.f32 1.0, %v7874_v19  ;;  %v7876_v28 = vpop.eup %7875  ;;  %v5014_v19 = vld [vmem:[#allocation18 + $0x60] sm:$0xff] }
0x1133   :  { %7879 = vrcp.f32 %v4633_v18  ;;  %v7878_v50 = vpop.eup %7877  ;;  %v4646_v21 = vadd.f32 1.0, %v7876_v28  ;;  %v7423_v18 = vpack.c.bf16 %v5013_v11, %v5012_v2  ;;  %v5193_v2 = vld [vmem:[%s9759_s15 + $0x10] sm:$0xff] }
0x1134   :  { %7881 = vrcp.f32 %v4639_v3  ;;  %v5015_v3 = vld [vmem:[#allocation18 + $0x68] sm:$0xff] }
0x1135   :  { %7883 = vrcp.f32 %v4646_v21  ;;  %v7426_v28 = vpack.c.bf16 %v5015_v3, %v5014_v19  ;;  %v5098_v21 = vld [vmem:[#allocation21 + $0x8] sm:$0xff]  ;;  %v5195_v3 = vld [vmem:[%s9759_s15 + $0x20] sm:$0xff] }
0x1136   :  { %v5194_v19 = vld [vmem:[%s9759_s15 + $0x18] sm:$0xff] }
0x113d   :  { %v7880_v31 = vpop.eup %7879 }
0x113e   :  { %v7882_v51 = vpop.eup %7881  ;;  %v4650_v44 = vmul.f32 %v7880_v31, %v7878_v50  ;;  %v5016_v50 = vld [vmem:[#allocation18 + $0x70] sm:$0xff]  ;;  %v5017_v31 = vld [vmem:[#allocation18 + $0x78] sm:$0xff] }
0x113f   :  { %v4649_v26 = vmul.f32 %v7882_v51, %v9538_v55  ;;  %v7884_v48 = vpop.eup %7883  ;;  %v5004_v55 = vld [vmem:[#allocation18 + $0x10] sm:$0xff]  ;;  %v7429_v51 = vpack.c.bf16 %v5017_v31, %v5016_v50  ;;  %v5197_v31 = vld [vmem:[%s9759_s15 + $0x30] sm:$0xff] }
0x1140   :  { %v7411_v6 = vpack.c.bf16 %v5005_v36, %v5004_v55 }
0x1141   :  { %v9580_v16 = vadd.f32 %v4650_v44, %v4649_v26  ;;  %v5097_v44 = vld [vmem:[#allocation21] sm:$0xff]  ;;  %v5099_v26 = vld [vmem:[#allocation21 + $0x10] sm:$0xff] }
0x1143   :  { %7885 = vtanh.f32 %v9580_v16 }
0x114d   :  { %v7886_v8 = vpop.eup %7885 }
0x114e   :  { %v4653_v12 = vmul.f32 %v7886_v8, %v7884_v48  ;;  %v5100_v48 = vld [vmem:[#allocation21 + $0x18] sm:$0xff] }
0x114f   :  { %v7435_v8 = vpack.c.bf16 %v5100_v48, %v5099_v26  ;;  %v5200_v26 = vld [vmem:[%s9759_s15 + $0x48] sm:$0xff] }
0x1150   :  { %4723 = vmatmul.mubr.f32.vlgmr.msra.gmra.mrb[32].mxu0 %v4653_v12  ;;  %4794 = vmatmul.mubr.f32.vlgmr.msra.gmra.mrb[32].mxu1 %v4653_v12  ;;  %v5101_v12 = vld [vmem:[#allocation21 + $0x20] sm:$0xff]  ;;  %v5530_v48 = vld [vmem:[#allocation20] ss:$0 sm:$0xff] }
0x1151   :  { %7346 = vmatpush1.bf16.msra.mxu0 %v9219_v63  ;;  %7378 = vmatpush1.bf16.msra.mxu1 %v9222_v25 }
0x1152   :  { %7348 = vmatprep.subr.bf16.mxu0 %v9227_v29  ;;  %7380 = vmatprep.subr.bf16.mxu1 %v9229_v60 }
0x1153   :  { %4896 = vmatprep.mubr.f32.mxu0 %v8338_v33  ;;  %4967 = vmatprep.mubr.f32.mxu1 %v8338_v33 }
0x1155   :  { %7350 = vmatpush1.bf16.msra.mxu0 %v9231_v45  ;;  %7382 = vmatpush1.bf16.msra.mxu1 %v9234_v35 }
0x1156   :  { %7352 = vmatprep.subr.bf16.mxu0 %v9239_v58  ;;  %7384 = vmatprep.subr.bf16.mxu1 %v9241_v7 }
0x1159   :  { %7354 = vmatpush1.bf16.msra.mxu0 %v9243_v10  ;;  %7386 = vmatpush1.bf16.msra.mxu1 %v9246_v20 }
0x115a   :  { %7356 = vmatprep.subr.bf16.mxu0 %v9251_v34  ;;  %7388 = vmatprep.subr.bf16.mxu1 %v9253_v54 }
0x115d   :  { %7358 = vmatpush1.bf16.msra.mxu0 %v9255_v59  ;;  %7390 = vmatpush1.bf16.msra.mxu1 %v9258_v13 }
0x115e   :  { %7360 = vmatprep.subr.bf16.mxu0 %v9262_v32  ;;  %7392 = vmatprep.subr.bf16.mxu1 %v9264_v15 }
0x1161   :  { %7362 = vmatpush1.bf16.msra.mxu0 %v9267_v38  ;;  %7394 = vmatpush1.bf16.msra.mxu1 %v9271_v39 }
0x1162   :  { %7364 = vmatprep.subr.bf16.mxu0 %v9273_v22  ;;  %7396 = vmatprep.subr.bf16.mxu1 %v9275_v40 }
0x1165   :  { %7366 = vmatpush1.bf16.msra.mxu0 %v9278_v52  ;;  %7398 = vmatpush1.bf16.msra.mxu1 %v9282_v4 }
0x1166   :  { %7368 = vmatprep.subr.bf16.mxu0 %v9284_v14  ;;  %7400 = vmatprep.subr.bf16.mxu1 %v9287_v30 }
0x1169   :  { %7370 = vmatpush1.bf16.msra.mxu0 %v9290_v47  ;;  %7402 = vmatpush1.bf16.msra.mxu1 %v9294_v0 }
0x116a   :  { %7372 = vmatprep.subr.bf16.mxu0 %v9299_v24  ;;  %7404 = vmatprep.subr.bf16.mxu1 %v9301_v41  ;;  %v5002_v24 = vld [vmem:[#allocation18] sm:$0xff]  ;;  %v5003_v41 = vld [vmem:[#allocation18 + $0x8] sm:$0xff] }
0x116d   :  { %7374 = vmatpush1.bf16.msra.mxu0 %v9303_v53  ;;  %7406 = vmatpush1.bf16.msra.mxu1 %v9306_v42  ;;  %v7408_v53 = vpack.c.bf16 %v5003_v41, %v5002_v24  ;;  %v8339_v42 = vmov 0.0|0.0  }
0x116e   :  { %7407 = vmatprep.subr.bf16.mxu0 %v8339_v42  ;;  %7431 = vmatprep.subr.bf16.mxu1 %v8339_v42 }
0x1223   :  { %v4724_v63 = vpop.f32.mrb[32].mxu0  ;;  %v4795_v25 = vpop.f32.mrb[32].mxu1 }
0x1224   :  { %v7545_v29 = vadd.f32 %v4724_v63, %v9355_v57  ;;  %v4726_v60 = vpop.f32.mrb[33].mxu0  ;;  %v4797_v45 = vpop.f32.mrb[33].mxu1  ;;  %v7561_v34 = vadd.f32 %v4795_v25, %v9367_v49  ;;  %v5102_v63 = vld [vmem:[#allocation21 + $0x28] sm:$0xff] }
0x1225   :  { %v7546_v35 = vadd.f32 %v4726_v60, %v9358_v56  ;;  %v7562_v10 = vadd.f32 %v4797_v45, %v9363_v37  ;;  %v7438_v25 = vpack.c.bf16 %v5102_v63, %v5101_v12  ;;  %v5104_v60 = vld [vmem:[#allocation21 + $0x38] sm:$0xff] }
0x1226   :  { %v5524_v58 = vmul.f32 -1.442695, %v7545_v29  ;;  %v5103_v29 = vld [vmem:[#allocation21 + $0x30] sm:$0xff] }
0x1227   :  { %v5525_v7 = vmul.f32 -1.442695, %v7546_v35  ;;  %v5526_v20 = vmul.f32 -1.442695, %v7562_v10  ;;  %v7441_v45 = vpack.c.bf16 %v5104_v60, %v5103_v29  ;;  %v5105_v35 = vld [vmem:[#allocation21 + $0x40] sm:$0xff]  ;;  %v5107_v10 = vld [vmem:[#allocation21 + $0x50] sm:$0xff] }
0x1228   :  { %7887 = vpow2.f32 %v5524_v58  ;;  %v5106_v58 = vld [vmem:[#allocation21 + $0x48] sm:$0xff] }
0x1229   :  { %7889 = vpow2.f32 %v5525_v7  ;;  %v7444_v7 = vpack.c.bf16 %v5106_v58, %v5105_v35  ;;  %v5202_v35 = vld [vmem:[%s9759_s15 + $0x58] sm:$0xff]  ;;  %v5203_v58 = vld [vmem:[%s9759_s15 + $0x60] sm:$0xff] }
0x122a   :  { %7891 = vpow2.f32 %v5526_v20  ;;  %v5108_v20 = vld [vmem:[#allocation21 + $0x58] sm:$0xff] }
0x122b   :  { %7893 = vtanh.f32 %v7561_v34  ;;  %v7447_v34 = vpack.c.bf16 %v5108_v20, %v5107_v10  ;;  %v5205_v20 = vld [vmem:[%s9759_s15 + $0x70] sm:$0xff] }
0x1232   :  { %v7888_v54 = vpop.eup %7887 }
0x1233   :  { %v7890_v59 = vpop.eup %7889  ;;  %v4807_v13 = vadd.f32 1.0, %v7888_v54 }
0x1234   :  { %v4813_v32 = vadd.f32 1.0, %v7890_v59  ;;  %v7892_v15 = vpop.eup %7891 }
0x1235   :  { %7895 = vrcp.f32 %v4807_v13  ;;  %v7894_v38 = vpop.eup %7893  ;;  %v4820_v52 = vadd.f32 1.0, %v7892_v15 }
0x1236   :  { %7897 = vrcp.f32 %v4813_v32 }
0x1237   :  { %7899 = vrcp.f32 %v4820_v52 }
0x123f   :  { %v7896_v39 = vpop.eup %7895 }
0x1240   :  { %v7898_v22 = vpop.eup %7897  ;;  %v4824_v40 = vmul.f32 %v7896_v39, %v7894_v38 }
0x1241   :  { %v4823_v4 = vmul.f32 %v7898_v22, %v9580_v16  ;;  %v7900_v30 = vpop.eup %7899  ;;  %v7432_v16 = vpack.c.bf16 %v5098_v21, %v5097_v44  ;;  %v5199_v21 = vld [vmem:[%s9759_s15 + $0x40] sm:$0xff] }
0x1243   :  { %v9620_v14 = vadd.f32 %v4824_v40, %v4823_v4 }
0x1245   :  { %7901 = vtanh.f32 %v9620_v14 }
0x124f   :  { %v7902_v47 = vpop.eup %7901 }
0x1250   :  { %v4827_v0 = vmul.f32 %v7902_v47, %v7900_v30 }
0x1252   :  { %4897 = vmatmul.mubr.f32.vlgmr.msra.gmra.mrb[34].mxu0 %v4827_v0  ;;  %4968 = vmatmul.mubr.f32.vlgmr.msra.gmra.mrb[34].mxu1 %v4827_v0 }
0x1253   :  { %7409 = vmatpush3.bf16.msra.mxu0 %v7408_v53  ;;  %5704 = vmatprep.mubr.msk.f32.mxu0 %vm8340_vm0, %v8338_v33 }
0x1254   :  { %7410 = vmatprep.subr.bf16.mxu0 %v8339_v42  ;;  %5739 = vmatprep.mubr.msk.f32.mxu1 %vm8340_vm0, %v8338_v33 }
0x1255   :  { %7433 = vmatpush3.bf16.msra.mxu1 %v7432_v16  ;;  %v7468_v16 = vpack.c.bf16 %v5200_v26, %v5199_v21 }
0x1256   :  { %7434 = vmatprep.subr.bf16.mxu1 %v8339_v42 }
0x1257   :  { %7412 = vmatpush3.bf16.msra.mxu0 %v7411_v6 }
0x1258   :  { %7413 = vmatprep.subr.bf16.mxu0 %v8339_v42 }
0x1259   :  { %7436 = vmatpush3.bf16.msra.mxu1 %v7435_v8 }
0x125a   :  { %7437 = vmatprep.subr.bf16.mxu1 %v8339_v42 }
0x125b   :  { %7415 = vmatpush3.bf16.msra.mxu0 %v7414_v17  ;;  %v5109_v17 = vld [vmem:[#allocation21 + $0x60] sm:$0xff] }
0x125c   :  { %7416 = vmatprep.subr.bf16.mxu0 %v8339_v42  ;;  %v7450_v27 = vpack.c.bf16 %v5110_v23, %v5109_v17  ;;  %v5377_v17 = vld [vmem:[#allocation27 + $0x10] sm:$0xff]  ;;  %v5378_v23 = vld [vmem:[#allocation27 + $0x18] sm:$0xff] }
0x125d   :  { %7439 = vmatpush3.bf16.msra.mxu1 %v7438_v25 }
0x125e   :  { %7440 = vmatprep.subr.bf16.mxu1 %v8339_v42 }
0x125f   :  { %7418 = vmatpush3.bf16.msra.mxu0 %v7417_v43  ;;  %v5111_v43 = vld [vmem:[#allocation21 + $0x70] sm:$0xff] }
0x1260   :  { %7419 = vmatprep.subr.bf16.mxu0 %v8339_v42  ;;  %v7453_v5 = vpack.c.bf16 %v5112_v46, %v5111_v43  ;;  %v5533_v43 = vld [vmem:[#allocation26] ss:$0 sm:$0xff] }
0x1261   :  { %7442 = vmatpush3.bf16.msra.mxu1 %v7441_v45  ;;  %v5201_v45 = vld [vmem:[%s9759_s15 + $0x50] sm:$0xff] }
0x1262   :  { %7443 = vmatprep.subr.bf16.mxu1 %v8339_v42 }
0x1263   :  { %7421 = vmatpush3.bf16.msra.mxu0 %v7420_v9  ;;  %v5192_v9 = vld [vmem:[%s9759_s15 + $0x8] sm:$0xff] }
0x1264   :  { %7422 = vmatprep.subr.bf16.mxu0 %v8339_v42 }
0x1265   :  { %7445 = vmatpush3.bf16.msra.mxu1 %v7444_v7  ;;  %v5204_v7 = vld [vmem:[%s9759_s15 + $0x68] sm:$0xff] }
0x1266   :  { %7446 = vmatprep.subr.bf16.mxu1 %v8339_v42  ;;  %v7474_v10 = vpack.c.bf16 %v5204_v7, %v5203_v58 }
0x1267   :  { %7424 = vmatpush3.bf16.msra.mxu0 %v7423_v18  ;;  %v7459_v18 = vpack.c.bf16 %v5194_v19, %v5193_v2  ;;  %v5535_v2 = vld [vmem:[#allocation29] ss:$0 sm:$0xff] }
0x1268   :  { %7425 = vmatprep.subr.bf16.mxu0 %v8339_v42 }
0x1269   :  { %7448 = vmatpush3.bf16.msra.mxu1 %v7447_v34  ;;  %v5206_v34 = vld [vmem:[%s9759_s15 + $0x78] sm:$0xff] }
0x126a   :  { %7449 = vmatprep.subr.bf16.mxu1 %v8339_v42 }
0x126b   :  { %7427 = vmatpush3.bf16.msra.mxu0 %v7426_v28  ;;  %v5196_v28 = vld [vmem:[%s9759_s15 + $0x28] sm:$0xff] }
0x126c   :  { %7428 = vmatprep.subr.bf16.mxu0 %v8339_v42  ;;  %v7462_v50 = vpack.c.bf16 %v5196_v28, %v5195_v3 }
0x126d   :  { %7451 = vmatpush3.bf16.msra.mxu1 %v7450_v27  ;;  %v7495_v27 = vpack.c.bf16 %v5378_v23, %v5377_v17 }
0x126e   :  { %7452 = vmatprep.subr.bf16.mxu1 %v8339_v42 }
0x126f   :  { %7430 = vmatpush3.bf16.msra.mxu0 %v7429_v51  ;;  %v5198_v51 = vld [vmem:[%s9759_s15 + $0x38] sm:$0xff] }
0x1270   :  { %7455 = vmatprep.subr.bf16.mxu0 %v8339_v42  ;;  %v7465_v44 = vpack.c.bf16 %v5198_v51, %v5197_v31 }
0x1271   :  { %7454 = vmatpush3.bf16.msra.mxu1 %v7453_v5 }
0x1272   :  { %7479 = vmatprep.subr.bf16.mxu1 %v8339_v42 }
0x1325   :  { %v4898_v54 = vpop.f32.mrb[34].mxu0  ;;  %v4969_v59 = vpop.f32.mrb[34].mxu1 }
0x1326   :  { %v7547_v13 = vadd.f32 %v4898_v54, %v9355_v57  ;;  %v4900_v32 = vpop.f32.mrb[35].mxu0  ;;  %v4971_v15 = vpop.f32.mrb[35].mxu1  ;;  %v7563_v4 = vadd.f32 %v4969_v59, %v9367_v49  ;;  %v7477_v54 = vpack.c.bf16 %v5206_v34, %v5205_v20  ;;  %v5285_v59 = vld [vmem:[%s9761_s17] sm:$0xff] }
0x1327   :  { %v7548_v38 = vadd.f32 %v4900_v32, %v9358_v56  ;;  %v7564_v40 = vadd.f32 %v4971_v15, %v9363_v37  ;;  %v5287_v32 = vld [vmem:[%s9761_s17 + $0x10] sm:$0xff] }
0x1328   :  { %v5527_v39 = vmul.f32 -1.442695, %v7547_v13  ;;  %v5286_v13 = vld [vmem:[%s9761_s17 + $0x8] sm:$0xff] }
0x1329   :  { %v5528_v22 = vmul.f32 -1.442695, %v7548_v38  ;;  %v5529_v52 = vmul.f32 -1.442695, %v7564_v40  ;;  %v7480_v15 = vpack.c.bf16 %v5286_v13, %v5285_v59  ;;  %v5288_v38 = vld [vmem:[%s9761_s17 + $0x18] sm:$0xff]  ;;  %v5290_v40 = vld [vmem:[%s9761_s17 + $0x28] sm:$0xff] }
0x132a   :  { %7903 = vpow2.f32 %v5527_v39  ;;  %v7483_v39 = vpack.c.bf16 %v5288_v38, %v5287_v32 }
0x132b   :  { %7905 = vpow2.f32 %v5528_v22  ;;  %v5289_v22 = vld [vmem:[%s9761_s17 + $0x20] sm:$0xff] }
0x132c   :  { %7907 = vpow2.f32 %v5529_v52  ;;  %v7486_v52 = vpack.c.bf16 %v5290_v40, %v5289_v22 }
0x132d   :  { %7909 = vtanh.f32 %v7563_v4  ;;  %v5531_v4 = vld [vmem:[#allocation23] ss:$0 sm:$0xff] }
0x1334   :  { %v7904_v30 = vpop.eup %7903 }
0x1335   :  { %v7906_v47 = vpop.eup %7905  ;;  %v4981_v0 = vadd.f32 1.0, %v7904_v30 }
0x1336   :  { %v4987_v24 = vadd.f32 1.0, %v7906_v47  ;;  %v7908_v57 = vpop.eup %7907 }
0x1337   :  { %7911 = vrcp.f32 %v4981_v0  ;;  %v7910_v41 = vpop.eup %7909  ;;  %v4994_v36 = vadd.f32 1.0, %v7908_v57  ;;  %v5291_v57 = vld [vmem:[%s9761_s17 + $0x30] sm:$0xff] }
0x1338   :  { %7913 = vrcp.f32 %v4987_v24 }
0x1339   :  { %7915 = vrcp.f32 %v4994_v36  ;;  %v5376_v36 = vld [vmem:[#allocation27 + $0x8] sm:$0xff] }
0x1341   :  { %v7912_v56 = vpop.eup %7911 }
0x1342   :  { %v7914_v53 = vpop.eup %7913  ;;  %v4998_v55 = vmul.f32 %v7912_v56, %v7910_v41  ;;  %v5292_v41 = vld [vmem:[%s9761_s17 + $0x38] sm:$0xff] }
0x1343   :  { %v4997_v6 = vmul.f32 %v7914_v53, %v9620_v14  ;;  %v7916_v49 = vpop.eup %7915  ;;  %v5191_v14 = vld [vmem:[%s9759_s15] sm:$0xff]  ;;  %v7489_v56 = vpack.c.bf16 %v5292_v41, %v5291_v57  ;;  %v5532_v53 = vld [vmem:[#allocation24] ss:$0 sm:$0xff] }
0x1344   :  { %v7456_v11 = vpack.c.bf16 %v5192_v9, %v5191_v14 }
0x1345   :  { %v4999_v37 = vadd.f32 %v4998_v55, %v4997_v6  ;;  %v5375_v55 = vld [vmem:[#allocation27] sm:$0xff] }
0x1347   :  { %7917 = vtanh.f32 %v4999_v37 }
0x1348   :  { %7919 = vtanh.f32 %v8886_v62  ;;  %v7471_v62 = vpack.c.bf16 %v5202_v35, %v5201_v45 }
0x1351   :  { %v7918_v61 = vpop.eup %7917 }
0x1352   :  { %v5001_v1 = vmul.f32 %v7918_v61, %v7916_v49  ;;  %v7920_v29 = vpop.eup %7919  ;;  %v7492_v61 = vpack.c.bf16 %v5376_v36, %v5375_v55 }
0x1354   :  { %5705 = vmatmul.mubr.f32.vlgmr.msra.gmra.mrb[36].mxu0 %v5001_v1 }
0x1355   :  { %5774 = vmatprep.mubr.msk.f32.mxu0 %vm8340_vm0, %v8338_v33  ;;  %7457 = vmatpush3.bf16.msra.mxu0 %v7456_v11 }
0x1356   :  { %7458 = vmatprep.subr.bf16.mxu0 %v8339_v42 }
0x1359   :  { %7460 = vmatpush3.bf16.msra.mxu0 %v7459_v18 }
0x135a   :  { %7461 = vmatprep.subr.bf16.mxu0 %v8339_v42 }
0x135d   :  { %7463 = vmatpush3.bf16.msra.mxu0 %v7462_v50 }
0x135e   :  { %7464 = vmatprep.subr.bf16.mxu0 %v8339_v42 }
0x1361   :  { %7466 = vmatpush3.bf16.msra.mxu0 %v7465_v44 }
0x1362   :  { %7467 = vmatprep.subr.bf16.mxu0 %v8339_v42 }
0x1365   :  { %7469 = vmatpush3.bf16.msra.mxu0 %v7468_v16 }
0x1366   :  { %7470 = vmatprep.subr.bf16.mxu0 %v8339_v42 }
0x1369   :  { %7472 = vmatpush3.bf16.msra.mxu0 %v7471_v62 }
0x136a   :  { %7473 = vmatprep.subr.bf16.mxu0 %v8339_v42 }
0x136d   :  { %7475 = vmatpush3.bf16.msra.mxu0 %v7474_v10 }
0x136e   :  { %7476 = vmatprep.subr.bf16.mxu0 %v8339_v42 }
0x1371   :  { %7478 = vmatpush3.bf16.msra.mxu0 %v7477_v54 }
0x1427   :  { %v5091_v8 = vpop.f32.mrb[36].mxu0 }
0x1428   :  { %v5092_v12 = vadd.f32 %v5530_v48, %v5091_v8  ;;  %v5706_v63 = vpop.f32.mrb[37].mxu0 }
0x142a   :  { %v5095_v25 = vmax.f32 %v5092_v12, 0.0 }
0x142c   :  { %v5096_v60 = vadd.f32 %v7920_v29, %v5095_v25 }
0x142e   :  { %5740 = vmatmul.mubr.f32.vlgmr.msra.gmra.mrb[36].mxu1 %v5096_v60 }
0x142f   :  { %5793 = vmatprep.mubr.msk.f32.mxu1 %vm8340_vm0, %v8338_v33  ;;  %7481 = vmatpush3.bf16.msra.mxu1 %v7480_v15 }
0x1430   :  { %7482 = vmatprep.subr.bf16.mxu1 %v8339_v42 }
0x1433   :  { %7484 = vmatpush3.bf16.msra.mxu1 %v7483_v39 }
0x1434   :  { %7485 = vmatprep.subr.bf16.mxu1 %v8339_v42 }
0x1437   :  { %7487 = vmatpush3.bf16.msra.mxu1 %v7486_v52 }
0x1438   :  { %7488 = vmatprep.subr.bf16.mxu1 %v8339_v42 }
0x143b   :  { %7490 = vmatpush3.bf16.msra.mxu1 %v7489_v56 }
0x143c   :  { %7491 = vmatprep.subr.bf16.mxu1 %v8339_v42 }
0x1501   :  { %v5186_v30 = vpop.f32.mrb[36].mxu1 }
0x1502   :  { %v5187_v47 = vadd.f32 %v5531_v4, %v5186_v30  ;;  %v5741_v0 = vpop.f32.mrb[37].mxu1 }
0x1504   :  { %7921 = vtanh.f32 %v5187_v47 }
0x150e   :  { %v7922_v24 = vpop.eup %7921 }
0x150f   :  { %5775 = vmatmul.mubr.f32.vlgmr.msra.gmra.mrb[38].mxu0 %v7922_v24 }
0x15e2   :  { %v5280_v6 = vpop.f32.mrb[38].mxu0 }
0x15e3   :  { %v5281_v37 = vadd.f32 %v5532_v53, %v5280_v6  ;;  %v5776_v49 = vpop.f32.mrb[39].mxu0 }
0x15e5   :  { %v5284_v1 = vmax.f32 %v5281_v37, 0.0 }
0x15e7   :  { %5794 = vmatmul.mubr.msk.f32.vlgmr.msra.gmra.mrb[38].mxu1 %vm5300_vm1, %v5284_v1 }
0x15e8   :  { %7493 = vmatpush3.bf16.msra.mxu1 %v7492_v61  ;;  %5804 = vmatprep.mubr.msk.f32.mxu1 %vm8340_vm0, %v8338_v33 }
0x15e9   :  { %7494 = vmatprep.subr.bf16.mxu1 %v8339_v42 }
0x15ec   :  { %7496 = vmatpush3.bf16.msra.mxu1 %v7495_v27 }
0x16ba   :  { %v5370_v46 = vpop.f32.mrb[38].mxu1 }
0x16bb   :  { %v5371_v5 = vadd.f32 %v5533_v43, %v5370_v46  ;;  %v5795_v14 = vpop.f32.mrb[39].mxu1 }
0x16bd   :  { %v5374_v9 = vmax.f32 %v5371_v5, 0.0 }
0x16bf   :  { %5805 = vmatmul.mubr.msk.f32.vlgmr.msra.gmra.mrb[40].mxu1 %vm5386_vm2, %v5374_v9 }
0x1792   :  { %v5456_v11 = vpop.f32.mrb[40].mxu1 }
0x1793   :  { %v5457_v19 = vadd.f32 %v5535_v2, %v5456_v11  ;;  %v5806_v18 = vpop.f32.mrb[41].mxu1 }
0x1795   :  { %5460 = vst [vmem:[%s9785_s0] sm:$0xff] %v5457_v19 }
0x1796   :  { %5465 = vsyncpa [#allocation5], 1 }
0x1797   :  { %5466 = vsyncpa [#allocation7], 1 }
0x1798   :  { %5467 = vsyncpa [#allocation10], 1 }
0x1799   :  { %5468 = vsyncpa [#allocation13], 1 }
0x179a   :  { %5469 = vsyncpa [#allocation16], 1 }
0x179b   :  { %5470 = vsyncpa [#allocation19], 1 }
0x179c   :  { %5471 = vsyncpa [#allocation22], 1 }
0x179d   :  { %5472 = vsyncpa [#allocation25], 1 }
0x179e   :  { %5473 = vsyncpa [#allocation28], 1 }

</bundles_post_ra>
